<compile_context>
chip_gen: v5e
topology: v5e:2x2
jax: 0.10.0
libtpu: 0.0.40
codegen_flags: <defaults>
</compile_context>

<pallas_src>
import functools

import jax
import jax.numpy as jnp
from jax import lax
from jax.experimental import pallas as pl
from jax.experimental.pallas import tpu as pltpu

EPS = 1e-5  # nn.BatchNorm2d default eps


def _vmem_limit_bytes():
    # ~3/4 of physical VMEM, capped at 96 MiB (128 MiB chips) -> 48 MiB on v7x.
    try:
        cap = pltpu.get_tpu_info().vmem_capacity_bytes
        return int(min(cap * 3 // 4, 96 * 1024 * 1024))
    except Exception:
        return 48 * 1024 * 1024


_VMEM_LIMIT_BYTES = _vmem_limit_bytes()


def _partial_stats(y_f32):
    """(rows, C) f32 -> (1, 2, C): row 0 = sum, row 1 = sum of squares."""
    return jnp.concatenate([jnp.sum(y_f32, axis=0, keepdims=True),
                            jnp.sum(y_f32 * y_f32, axis=0, keepdims=True)],
                           axis=0)[None]


def _bn_scale_shift(partial_stats, gamma, beta, count):
    """Fold BN into a fused per-channel scale/shift (tiny jnp math)."""
    s = jnp.sum(partial_stats, axis=0)                    # (2, C)
    mean = s[0] / count
    var = s[1] / count - mean * mean                      # biased variance
    scale = gamma.reshape(-1) * lax.rsqrt(var + EPS)
    shift = beta.reshape(-1) - mean * scale
    return scale.reshape(1, -1), shift.reshape(1, -1)


def _pick_tm(m):
    for tm in (512, 256, 128, 64, 32, 16):
        if m % tm == 0:
            return tm
    raise ValueError("M = N*H*W must be divisible by 16")


# ---------------------------------------------------------------------------
# K1: 1x1 conv (bf16 MXU, in-kernel cast of x) + partial BN stats.
# ---------------------------------------------------------------------------
def _conv1x1_stats_kernel(x_ref, w_ref, y_ref, st_ref):
    xb = x_ref[...].astype(jnp.bfloat16)                  # cast hidden under dot
    y = jnp.dot(xb, w_ref[...], preferred_element_type=jnp.float32)
    st_ref[...] = _partial_stats(y)                       # stats from f32
    y_ref[...] = y.astype(jnp.bfloat16)                   # bf16 intermediate


def _conv1x1_stats(x_rows, w_bf16, tm):
    m, cin = x_rows.shape
    cout = w_bf16.shape[1]
    g = m // tm
    return pl.pallas_call(
        _conv1x1_stats_kernel,
        grid=(g,),
        in_specs=[pl.BlockSpec((tm, cin), lambda i: (i, 0)),
                  pl.BlockSpec((cin, cout), lambda i: (0, 0))],
        out_specs=(pl.BlockSpec((tm, cout), lambda i: (i, 0)),
                   pl.BlockSpec((1, 2, cout), lambda i: (i, 0, 0))),
        out_shape=(jax.ShapeDtypeStruct((m, cout), jnp.bfloat16),
                   jax.ShapeDtypeStruct((g, 2, cout), jnp.float32)),
        compiler_params=pltpu.CompilerParams(
            dimension_semantics=("parallel",),
            vmem_limit_bytes=_VMEM_LIMIT_BYTES),
        cost_estimate=pl.CostEstimate(
            flops=2 * m * cin * cout, transcendentals=0,
            bytes_accessed=m * cin * 4 + cin * cout * 2 + m * cout * 2),
    )(x_rows, w_bf16)


# ---------------------------------------------------------------------------
# K2: bn1 + relu + 3x3 conv as 3 accumulated K=3P MXU dots (one per kernel
#     row) + partial BN stats.  Grid over images.
# ---------------------------------------------------------------------------
def _bn_relu_conv3x3_stats_kernel(h, w, p, y1_ref, sc_ref, sh_ref, w2_ref,
                                  y2_ref, st_ref, zpad_ref):
    rows = h * w
    # Fused bn1 scale/shift + relu in f32.
    z1 = jnp.maximum(y1_ref[...].astype(jnp.float32) * sc_ref[...]
                     + sh_ref[...], 0.0)                  # (h*w, p)

    # Zero only the halo of the padded scratch (aligned strips); the interior
    # store below overwrites everything else.
    zpad_ref[0:1, :, :] = jnp.zeros((1, w + 16, p), jnp.float32)
    zpad_ref[h + 1:h + 2, :, :] = jnp.zeros((1, w + 16, p), jnp.float32)
    zpad_ref[1:h + 1, 0:8, :] = jnp.zeros((h, 8, p), jnp.float32)
    zpad_ref[1:h + 1, w + 8:w + 16, :] = jnp.zeros((h, 8, p), jnp.float32)
    zpad_ref[1:h + 1, 8:8 + w, :] = z1.reshape(h, w, p)

    # Three accumulated dots, K = 3P each: no (h*w, 9P) patch materialization.
    acc = None
    for dh in range(3):
        taps = [zpad_ref[dh:dh + h, 7 + dw:7 + dw + w, :].reshape(rows, p)
                for dw in range(3)]
        patch = jnp.concatenate(taps, axis=-1).astype(jnp.bfloat16)  # (rows,3P)
        part = jnp.dot(patch, w2_ref[dh],                 # (3P, P) slab
                       preferred_element_type=jnp.float32)
        acc = part if acc is None else acc + part

    st_ref[...] = _partial_stats(acc)                     # stats from f32
    y2_ref[...] = acc.astype(jnp.bfloat16)                # bf16 intermediate


def _bn_relu_conv3x3_stats(y1_bf16, s1, t1, w2_bf16, n, h, w, p):
    m = n * h * w
    rows = h * w
    kern = functools.partial(_bn_relu_conv3x3_stats_kernel, h, w, p)
    return pl.pallas_call(
        kern,
        grid=(n,),
        in_specs=[pl.BlockSpec((rows, p), lambda b: (b, 0)),
                  pl.BlockSpec((1, p), lambda b: (0, 0)),
                  pl.BlockSpec((1, p), lambda b: (0, 0)),
                  pl.BlockSpec((3, 3 * p, p), lambda b: (0, 0, 0))],
        out_specs=(pl.BlockSpec((rows, p), lambda b: (b, 0)),
                   pl.BlockSpec((1, 2, p), lambda b: (b, 0, 0))),
        out_shape=(jax.ShapeDtypeStruct((m, p), jnp.bfloat16),
                   jax.ShapeDtypeStruct((n, 2, p), jnp.float32)),
        scratch_shapes=[pltpu.VMEM((h + 2, w + 16, p), jnp.float32)],
        compiler_params=pltpu.CompilerParams(
            dimension_semantics=("parallel",),
            vmem_limit_bytes=_VMEM_LIMIT_BYTES),
        cost_estimate=pl.CostEstimate(
            flops=2 * m * 9 * p * p, transcendentals=0,
            bytes_accessed=2 * m * p * 2 + 9 * p * p * 2),
    )(y1_bf16, s1, t1, w2_bf16)


# ---------------------------------------------------------------------------
# K3: bn2 + relu + 1x1 conv (bf16 MXU) + partial BN stats.
# ---------------------------------------------------------------------------
def _bn_relu_conv1x1_stats_kernel(y2_ref, sc_ref, sh_ref, w_ref, y3_ref, st_ref):
    z2 = jnp.maximum(y2_ref[...].astype(jnp.float32) * sc_ref[...]
                     + sh_ref[...], 0.0)
    y3 = jnp.dot(z2.astype(jnp.bfloat16), w_ref[...],
                 preferred_element_type=jnp.float32)
    st_ref[...] = _partial_stats(y3)                      # stats from f32
    y3_ref[...] = y3.astype(jnp.bfloat16)                 # bf16 intermediate


def _bn_relu_conv1x1_stats(y2_bf16, s2, t2, w3_bf16, tm):
    m, p = y2_bf16.shape
    cout = w3_bf16.shape[1]
    g = m // tm
    return pl.pallas_call(
        _bn_relu_conv1x1_stats_kernel,
        grid=(g,),
        in_specs=[pl.BlockSpec((tm, p), lambda i: (i, 0)),
                  pl.BlockSpec((1, p), lambda i: (0, 0)),
                  pl.BlockSpec((1, p), lambda i: (0, 0)),
                  pl.BlockSpec((p, cout), lambda i: (0, 0))],
        out_specs=(pl.BlockSpec((tm, cout), lambda i: (i, 0)),
                   pl.BlockSpec((1, 2, cout), lambda i: (i, 0, 0))),
        out_shape=(jax.ShapeDtypeStruct((m, cout), jnp.bfloat16),
                   jax.ShapeDtypeStruct((g, 2, cout), jnp.float32)),
        compiler_params=pltpu.CompilerParams(
            dimension_semantics=("parallel",),
            vmem_limit_bytes=_VMEM_LIMIT_BYTES),
        cost_estimate=pl.CostEstimate(
            flops=2 * m * p * cout, transcendentals=0,
            bytes_accessed=m * p * 2 + m * cout * 2 + p * cout * 2),
    )(y2_bf16, s2, t2, w3_bf16)


# ---------------------------------------------------------------------------
# K4: bn3 + residual add + relu (f32 output, matches the module's dtype).
# ---------------------------------------------------------------------------
def _bn_residual_relu_kernel(y3_ref, res_ref, sc_ref, sh_ref, out_ref):
    out_ref[...] = jnp.maximum(
        y3_ref[...].astype(jnp.float32) * sc_ref[...] + sh_ref[...]
        + res_ref[...], 0.0)


def _bn_residual_relu(y3_bf16, x_rows, s3, t3, tm):
    m, c = x_rows.shape
    g = m // tm
    return pl.pallas_call(
        _bn_residual_relu_kernel,
        grid=(g,),
        in_specs=[pl.BlockSpec((tm, c), lambda i: (i, 0)),
                  pl.BlockSpec((tm, c), lambda i: (i, 0)),
                  pl.BlockSpec((1, c), lambda i: (0, 0)),
                  pl.BlockSpec((1, c), lambda i: (0, 0))],
        out_specs=pl.BlockSpec((tm, c), lambda i: (i, 0)),
        out_shape=jax.ShapeDtypeStruct((m, c), jnp.float32),
        compiler_params=pltpu.CompilerParams(
            dimension_semantics=("parallel",),
            vmem_limit_bytes=_VMEM_LIMIT_BYTES),
        cost_estimate=pl.CostEstimate(
            flops=4 * m * c, transcendentals=0,
            bytes_accessed=m * c * 2 + 2 * m * c * 4),
    )(y3_bf16, x_rows, s3, t3)


# ---------------------------------------------------------------------------
# Full block forward (call under jax.jit).
# ---------------------------------------------------------------------------
def bottleneck_forward(x_nchw, params):
    w1, w2s, w3, g1, b1, g2, b2, g3, b3 = params
    n, cin, h, w = x_nchw.shape
    p = w1.shape[1]
    assert cin == 4 * p, "identity residual requires inplanes == planes * 4"
    m = n * h * w
    rows = h * w
    assert rows % 16 == 0, "kernel assumes H*W is a multiple of 16"
    assert w % 8 == 0, "kernel assumes W is a multiple of 8"
    tm = _pick_tm(m)

    # NCHW -> (M, C) rows, channels-last (done under the same jit).
    x_rows = jnp.transpose(x_nchw, (0, 2, 3, 1)).reshape(m, cin)
    w1b = w1.astype(jnp.bfloat16)
    w2b = w2s.astype(jnp.bfloat16)
    w3b = w3.astype(jnp.bfloat16)

    # conv1 + stats1  ->  bn1 scale/shift
    y1, st1 = _conv1x1_stats(x_rows, w1b, tm)
    s1, t1 = _bn_scale_shift(st1, g1, b1, m)

    # bn1+relu fused into 3x3 conv2 (3 accumulated K=3P dots) + stats2
    y2, st2 = _bn_relu_conv3x3_stats(y1, s1, t1, w2b, n, h, w, p)
    s2, t2 = _bn_scale_shift(st2, g2, b2, m)

    # bn2+relu fused into conv3 + stats3
    y3, st3 = _bn_relu_conv1x1_stats(y2, s2, t2, w3b, tm)
    s3, t3 = _bn_scale_shift(st3, g3, b3, m)

    # bn3 + residual + relu
    out_rows = _bn_residual_relu(y3, x_rows, s3, t3, tm)

    return jnp.transpose(out_rows.reshape(n, h, w, cin), (0, 3, 1, 2))


# ---------------------------------------------------------------------------
# Parameter construction and pure-JAX references.
# ---------------------------------------------------------------------------
def init_params(key, inplanes, planes):
    ks = jax.random.split(key, 9)
    w1_t = 0.2 * jax.random.normal(ks[0], (planes, inplanes, 1, 1), jnp.float32)
    w2_t = 0.2 * jax.random.normal(ks[1], (planes, planes, 3, 3), jnp.float32)
    w3_t = 0.2 * jax.random.normal(ks[2], (4 * planes, planes, 1, 1), jnp.float32)
    g1 = 1.0 + 0.1 * jax.random.normal(ks[3], (1, planes), jnp.float32)
    b1 = 0.1 * jax.random.normal(ks[4], (1, planes), jnp.float32)
    g2 = 1.0 + 0.1 * jax.random.normal(ks[5], (1, planes), jnp.float32)
    b2 = 0.1 * jax.random.normal(ks[6], (1, planes), jnp.float32)
    g3 = 1.0 + 0.1 * jax.random.normal(ks[7], (1, 4 * planes), jnp.float32)
    b3 = 0.1 * jax.random.normal(ks[8], (1, 4 * planes), jnp.float32)
    torch_params = (w1_t, w2_t, w3_t, g1, b1, g2, b2, g3, b3)

    # Kernel-layout weights.
    w1 = jnp.transpose(w1_t[:, :, 0, 0], (1, 0))                     # (Cin, P)
    # 3x3 weight packed per kernel row: (3, 3P, P), row index kw*P + ci.
    w2s = jnp.transpose(w2_t, (2, 3, 1, 0)).reshape(3, 3 * planes, planes)
    w3 = jnp.transpose(w3_t[:, :, 0, 0], (1, 0))                     # (P, 4P)
    kernel_params = (w1, w2s, w3, g1, b1, g2, b2, g3, b3)
    return torch_params, kernel_params


def reference_forward(x_nchw, torch_params, policy="f32"):
    """Pure-JAX reference mirroring the PyTorch module (training-mode BN).

    policy="kernel" mirrors the kernels' precision policy exactly: bf16 MXU
    operands, bf16-stored intermediates, f32 accumulation and f32 BN stats.
    """
    w1_t, w2_t, w3_t, g1, b1, g2, b2, g3, b3 = torch_params
    mxu_dtype = jnp.bfloat16 if policy == "kernel" else jnp.float32
    x = jnp.transpose(x_nchw, (0, 2, 3, 1))  # NHWC

    def conv(inp, w_oihw, padding):
        w_hwio = jnp.transpose(w_oihw, (2, 3, 1, 0)).astype(mxu_dtype)
        return lax.conv_general_dilated(
            inp.astype(mxu_dtype), w_hwio, window_strides=(1, 1),
            padding=padding, dimension_numbers=("NHWC", "HWIO", "NHWC"),
            preferred_element_type=jnp.float32)

    def fold_bn(y, g, b):
        mean = jnp.mean(y, axis=(0, 1, 2))
        var = jnp.mean(y * y, axis=(0, 1, 2)) - mean * mean
        s = g.reshape(-1) * lax.rsqrt(var + EPS)
        return s, b.reshape(-1) - mean * s

    def store(y):  # bf16 round-trip of stored intermediates (kernel policy)
        if policy == "kernel":
            return y.astype(jnp.bfloat16).astype(jnp.float32)
        return y

    y1 = conv(x, w1_t, [(0, 0), (0, 0)])
    s1, t1 = fold_bn(y1, g1, b1)
    z1 = jnp.maximum(store(y1) * s1 + t1, 0.0)
    y2 = conv(z1, w2_t, [(1, 1), (1, 1)])
    s2, t2 = fold_bn(y2, g2, b2)
    z2 = jnp.maximum(store(y2) * s2 + t2, 0.0)
    y3 = conv(z2, w3_t, [(0, 0), (0, 0)])
    s3, t3 = fold_bn(y3, g3, b3)
    out = jnp.maximum(store(y3) * s3 + t3 + x, 0.0)
    return jnp.transpose(out, (0, 3, 1, 2))


if __name__ == "__main__":
    key = jax.random.PRNGKey(0)
    kx, kp = jax.random.split(key)

    planes = 4
    inplanes = planes * 4        # identity residual requires inplanes == planes*4
    n, h, w = 2, 16, 16

    x = jax.random.normal(kx, (n, inplanes, h, w), jnp.float32)
    torch_params, kernel_params = init_params(kp, inplanes, planes)

    fwd = jax.jit(bottleneck_forward)
    out = jax.block_until_ready(fwd(x, kernel_params))
    assert out.shape == (n, planes * 4, h, w)

    # Tight check vs a reference that exactly mirrors the kernels' precision
    # policy (bf16 MXU operands + bf16 stored intermediates, f32 stats/accum).
    ref_pol = reference_forward(x, torch_params, policy="kernel")
    if not bool(jnp.allclose(out, ref_pol, rtol=3e-3, atol=3e-3)):
        max_err = float(jnp.max(jnp.abs(out - ref_pol)))
        raise AssertionError(f"mismatch vs kernel-policy reference, max abs err {max_err}")

    # Loose sanity check vs the pure-f32 PyTorch-equivalent reference; the only
    # differences are bf16 roundings of matmul operands and intermediates.
    ref_f32 = reference_forward(x, torch_params, policy="f32")
    if not bool(jnp.allclose(out, ref_f32, rtol=1e-1, atol=1e-1)):
        max_err = float(jnp.max(jnp.abs(out - ref_f32)))
        raise AssertionError(f"mismatch vs f32 reference, max abs err {max_err}")

    print("KERNEL_OK")
</pallas_src>

<mosaic_0001>
module attributes {stable_mosaic.version = 11 : i64} {
  func.func @_bn_relu_conv1x1_stats_kernel(%arg0: i32, %arg1: memref<512x4xbf16, #tpu.memory_space<vmem>>, %arg2: memref<1x4xf32, #tpu.memory_space<vmem>>, %arg3: memref<1x4xf32, #tpu.memory_space<vmem>>, %arg4: memref<4x16xbf16, #tpu.memory_space<vmem>>, %arg5: memref<512x16xbf16, #tpu.memory_space<vmem>>, %arg6: memref<1x2x16xf32, #tpu.memory_space<vmem>>) attributes {dimension_semantics = [#tpu.dimension_semantics<parallel>], iteration_bounds = array<i64: 1>, scalar_prefetch = 0 : i64, scratch_operands = 0 : i64, tpu.core_type = #tpu.core_type<tc>, window_params = [{transform_indices = @transform_0, window_bounds = array<i64: 512, 4>}, {pipeline_mode = #tpu.pipeline_mode<synchronous>, transform_indices = @transform_1, window_bounds = array<i64: 1, 4>}, {pipeline_mode = #tpu.pipeline_mode<synchronous>, transform_indices = @transform_2, window_bounds = array<i64: 1, 4>}, {pipeline_mode = #tpu.pipeline_mode<synchronous>, transform_indices = @transform_3, window_bounds = array<i64: 4, 16>}, {transform_indices = @transform_4, window_bounds = array<i64: 512, 16>}, {transform_indices = @transform_5, window_bounds = array<i64: 1, 2, 16>}]} {
    %c0 = arith.constant 0 : index
    %c0_0 = arith.constant 0 : index
    %0 = vector.load %arg1[%c0, %c0_0] : memref<512x4xbf16, #tpu.memory_space<vmem>>, vector<512x4xbf16>
    %1 = arith.extf %0 : vector<512x4xbf16> to vector<512x4xf32>
    %c0_1 = arith.constant 0 : index
    %c0_2 = arith.constant 0 : index
    %2 = vector.load %arg2[%c0_1, %c0_2] : memref<1x4xf32, #tpu.memory_space<vmem>>, vector<1x4xf32>
    %3 = vector.broadcast %2 : vector<1x4xf32> to vector<512x4xf32>
    %4 = arith.mulf %1, %3 : vector<512x4xf32>
    %c0_3 = arith.constant 0 : index
    %c0_4 = arith.constant 0 : index
    %5 = vector.load %arg3[%c0_3, %c0_4] : memref<1x4xf32, #tpu.memory_space<vmem>>, vector<1x4xf32>
    %6 = vector.broadcast %5 : vector<1x4xf32> to vector<512x4xf32>
    %7 = arith.addf %4, %6 : vector<512x4xf32>
    %cst = arith.constant 0.000000e+00 : f32
    %8 = vector.broadcast %cst : f32 to vector<512x4xf32>
    %9 = arith.maximumf %7, %8 : vector<512x4xf32>
    %10 = arith.truncf %9 : vector<512x4xf32> to vector<512x4xbf16>
    %c0_5 = arith.constant 0 : index
    %c0_6 = arith.constant 0 : index
    %11 = vector.load %arg4[%c0_5, %c0_6] : memref<4x16xbf16, #tpu.memory_space<vmem>>, vector<4x16xbf16>
    %cst_7 = arith.constant dense<0.000000e+00> : vector<512x16xf32>
    %12 = tpu.matmul %10, %11, %cst_7 {dimension_numbers = #tpu.dot_dimension_numbers<[1], [0], [0], [1], [0, 0, 1, 1], [], []>} : vector<512x4xbf16>, vector<4x16xbf16>, vector<512x16xf32> -> vector<512x16xf32>
    %cst_8 = arith.constant dense<0.000000e+00> : vector<16xf32>
    %13 = vector.multi_reduction <add>, %12, %cst_8 [0] : vector<512x16xf32> to vector<16xf32>
    %14 = vector.shape_cast %13 : vector<16xf32> to vector<1x16xf32>
    %15 = arith.mulf %12, %12 : vector<512x16xf32>
    %cst_9 = arith.constant dense<0.000000e+00> : vector<16xf32>
    %16 = vector.multi_reduction <add>, %15, %cst_9 [0] : vector<512x16xf32> to vector<16xf32>
    %17 = vector.shape_cast %16 : vector<16xf32> to vector<1x16xf32>
    %18 = tpu.concatenate %14, %17 in 0 : vector<1x16xf32>, vector<1x16xf32> -> vector<2x16xf32>
    %19 = vector.shape_cast %18 : vector<2x16xf32> to vector<1x2x16xf32>
    %c0_10 = arith.constant 0 : index
    %c0_11 = arith.constant 0 : index
    %c0_12 = arith.constant 0 : index
    %20 = vector.load %arg6[%c0_10, %c0_11, %c0_12] : memref<1x2x16xf32, #tpu.memory_space<vmem>>, vector<1x2x16xf32>
    tpu.vector_store %arg6[%c0_10, %c0_11, %c0_12], %19 {strides = array<i32>} : memref<1x2x16xf32, #tpu.memory_space<vmem>>, vector<1x2x16xf32>,
    %21 = arith.truncf %12 : vector<512x16xf32> to vector<512x16xbf16>
    %c0_13 = arith.constant 0 : index
    %c0_14 = arith.constant 0 : index
    %22 = vector.load %arg5[%c0_13, %c0_14] : memref<512x16xbf16, #tpu.memory_space<vmem>>, vector<512x16xbf16>
    tpu.vector_store %arg5[%c0_13, %c0_14], %21 {strides = array<i32>} : memref<512x16xbf16, #tpu.memory_space<vmem>>, vector<512x16xbf16>,
    return
  }
  func.func @transform_0(%arg0: i32) -> (i32, i32) {
    %c0_i32 = arith.constant 0 : i32
    %c0_i32_0 = arith.constant 0 : i32
    return %arg0, %c0_i32 : i32, i32
  }
  func.func @transform_1(%arg0: i32) -> (i32, i32) {
    %c0_i32 = arith.constant 0 : i32
    %c0_i32_0 = arith.constant 0 : i32
    %c0_i32_1 = arith.constant 0 : i32
    return %c0_i32, %c0_i32_0 : i32, i32
  }
  func.func @transform_2(%arg0: i32) -> (i32, i32) {
    %c0_i32 = arith.constant 0 : i32
    %c0_i32_0 = arith.constant 0 : i32
    %c0_i32_1 = arith.constant 0 : i32
    return %c0_i32, %c0_i32_0 : i32, i32
  }
  func.func @transform_3(%arg0: i32) -> (i32, i32) {
    %c0_i32 = arith.constant 0 : i32
    %c0_i32_0 = arith.constant 0 : i32
    %c0_i32_1 = arith.constant 0 : i32
    return %c0_i32, %c0_i32_0 : i32, i32
  }
  func.func @transform_4(%arg0: i32) -> (i32, i32) {
    %c0_i32 = arith.constant 0 : i32
    %c0_i32_0 = arith.constant 0 : i32
    return %arg0, %c0_i32 : i32, i32
  }
  func.func @transform_5(%arg0: i32) -> (i32, i32, i32) {
    %c0_i32 = arith.constant 0 : i32
    %c0_i32_0 = arith.constant 0 : i32
    %c0_i32_1 = arith.constant 0 : i32
    return %arg0, %c0_i32, %c0_i32_0 : i32, i32, i32
  }
}

module attributes {stable_mosaic.version = 11 : i64} {
  func.func @_conv1x1_stats_kernel(%arg0: i32, %arg1: memref<512x16xf32, #tpu.memory_space<vmem>>, %arg2: memref<16x4xbf16, #tpu.memory_space<vmem>>, %arg3: memref<512x4xbf16, #tpu.memory_space<vmem>>, %arg4: memref<1x2x4xf32, #tpu.memory_space<vmem>>) attributes {dimension_semantics = [#tpu.dimension_semantics<parallel>], iteration_bounds = array<i64: 1>, scalar_prefetch = 0 : i64, scratch_operands = 0 : i64, tpu.core_type = #tpu.core_type<tc>, window_params = [{transform_indices = @transform_0, window_bounds = array<i64: 512, 16>}, {pipeline_mode = #tpu.pipeline_mode<synchronous>, transform_indices = @transform_1, window_bounds = array<i64: 16, 4>}, {transform_indices = @transform_2, window_bounds = array<i64: 512, 4>}, {transform_indices = @transform_3, window_bounds = array<i64: 1, 2, 4>}]} {
    %c0 = arith.constant 0 : index
    %c0_0 = arith.constant 0 : index
    %0 = vector.load %arg1[%c0, %c0_0] : memref<512x16xf32, #tpu.memory_space<vmem>>, vector<512x16xf32>
    %1 = arith.truncf %0 : vector<512x16xf32> to vector<512x16xbf16>
    %c0_1 = arith.constant 0 : index
    %c0_2 = arith.constant 0 : index
    %2 = vector.load %arg2[%c0_1, %c0_2] : memref<16x4xbf16, #tpu.memory_space<vmem>>, vector<16x4xbf16>
    %cst = arith.constant dense<0.000000e+00> : vector<512x4xf32>
    %3 = tpu.matmul %1, %2, %cst {dimension_numbers = #tpu.dot_dimension_numbers<[1], [0], [0], [1], [0, 0, 1, 1], [], []>} : vector<512x16xbf16>, vector<16x4xbf16>, vector<512x4xf32> -> vector<512x4xf32>
    %cst_3 = arith.constant dense<0.000000e+00> : vector<4xf32>
    %4 = vector.multi_reduction <add>, %3, %cst_3 [0] : vector<512x4xf32> to vector<4xf32>
    %5 = vector.shape_cast %4 : vector<4xf32> to vector<1x4xf32>
    %6 = arith.mulf %3, %3 : vector<512x4xf32>
    %cst_4 = arith.constant dense<0.000000e+00> : vector<4xf32>
    %7 = vector.multi_reduction <add>, %6, %cst_4 [0] : vector<512x4xf32> to vector<4xf32>
    %8 = vector.shape_cast %7 : vector<4xf32> to vector<1x4xf32>
    %9 = tpu.concatenate %5, %8 in 0 : vector<1x4xf32>, vector<1x4xf32> -> vector<2x4xf32>
    %10 = vector.shape_cast %9 : vector<2x4xf32> to vector<1x2x4xf32>
    %c0_5 = arith.constant 0 : index
    %c0_6 = arith.constant 0 : index
    %c0_7 = arith.constant 0 : index
    %11 = vector.load %arg4[%c0_5, %c0_6, %c0_7] : memref<1x2x4xf32, #tpu.memory_space<vmem>>, vector<1x2x4xf32>
    tpu.vector_store %arg4[%c0_5, %c0_6, %c0_7], %10 {strides = array<i32>} : memref<1x2x4xf32, #tpu.memory_space<vmem>>, vector<1x2x4xf32>,
    %12 = arith.truncf %3 : vector<512x4xf32> to vector<512x4xbf16>
    %c0_8 = arith.constant 0 : index
    %c0_9 = arith.constant 0 : index
    %13 = vector.load %arg3[%c0_8, %c0_9] : memref<512x4xbf16, #tpu.memory_space<vmem>>, vector<512x4xbf16>
    tpu.vector_store %arg3[%c0_8, %c0_9], %12 {strides = array<i32>} : memref<512x4xbf16, #tpu.memory_space<vmem>>, vector<512x4xbf16>,
    return
  }
  func.func @transform_0(%arg0: i32) -> (i32, i32) {
    %c0_i32 = arith.constant 0 : i32
    %c0_i32_0 = arith.constant 0 : i32
    return %arg0, %c0_i32 : i32, i32
  }
  func.func @transform_1(%arg0: i32) -> (i32, i32) {
    %c0_i32 = arith.constant 0 : i32
    %c0_i32_0 = arith.constant 0 : i32
    %c0_i32_1 = arith.constant 0 : i32
    return %c0_i32, %c0_i32_0 : i32, i32
  }
  func.func @transform_2(%arg0: i32) -> (i32, i32) {
    %c0_i32 = arith.constant 0 : i32
    %c0_i32_0 = arith.constant 0 : i32
    return %arg0, %c0_i32 : i32, i32
  }
  func.func @transform_3(%arg0: i32) -> (i32, i32, i32) {
    %c0_i32 = arith.constant 0 : i32
    %c0_i32_0 = arith.constant 0 : i32
    %c0_i32_1 = arith.constant 0 : i32
    return %arg0, %c0_i32, %c0_i32_0 : i32, i32, i32
  }
}

module attributes {stable_mosaic.version = 11 : i64} {
  func.func @_bn_relu_conv3x3_stats_kernel(%arg0: i32, %arg1: memref<256x4xbf16, #tpu.memory_space<vmem>>, %arg2: memref<1x4xf32, #tpu.memory_space<vmem>>, %arg3: memref<1x4xf32, #tpu.memory_space<vmem>>, %arg4: memref<3x12x4xbf16, #tpu.memory_space<vmem>>, %arg5: memref<256x4xbf16, #tpu.memory_space<vmem>>, %arg6: memref<1x2x4xf32, #tpu.memory_space<vmem>>, %arg7: memref<18x32x4xf32, #tpu.memory_space<vmem>>) attributes {dimension_semantics = [#tpu.dimension_semantics<parallel>], iteration_bounds = array<i64: 2>, scalar_prefetch = 0 : i64, scratch_operands = 1 : i64, tpu.core_type = #tpu.core_type<tc>, window_params = [{transform_indices = @transform_0, window_bounds = array<i64: 256, 4>}, {pipeline_mode = #tpu.pipeline_mode<synchronous>, transform_indices = @transform_1, window_bounds = array<i64: 1, 4>}, {pipeline_mode = #tpu.pipeline_mode<synchronous>, transform_indices = @transform_2, window_bounds = array<i64: 1, 4>}, {pipeline_mode = #tpu.pipeline_mode<synchronous>, transform_indices = @transform_3, window_bounds = array<i64: 3, 12, 4>}, {transform_indices = @transform_4, window_bounds = array<i64: 256, 4>}, {transform_indices = @transform_5, window_bounds = array<i64: 1, 2, 4>}]} {
    %c0 = arith.constant 0 : index
    %c0_0 = arith.constant 0 : index
    %0 = vector.load %arg1[%c0, %c0_0] : memref<256x4xbf16, #tpu.memory_space<vmem>>, vector<256x4xbf16>
    %1 = arith.extf %0 : vector<256x4xbf16> to vector<256x4xf32>
    %c0_1 = arith.constant 0 : index
    %c0_2 = arith.constant 0 : index
    %2 = vector.load %arg2[%c0_1, %c0_2] : memref<1x4xf32, #tpu.memory_space<vmem>>, vector<1x4xf32>
    %3 = vector.broadcast %2 : vector<1x4xf32> to vector<256x4xf32>
    %4 = arith.mulf %1, %3 : vector<256x4xf32>
    %c0_3 = arith.constant 0 : index
    %c0_4 = arith.constant 0 : index
    %5 = vector.load %arg3[%c0_3, %c0_4] : memref<1x4xf32, #tpu.memory_space<vmem>>, vector<1x4xf32>
    %6 = vector.broadcast %5 : vector<1x4xf32> to vector<256x4xf32>
    %7 = arith.addf %4, %6 : vector<256x4xf32>
    %cst = arith.constant 0.000000e+00 : f32
    %8 = vector.broadcast %cst : f32 to vector<256x4xf32>
    %9 = arith.maximumf %7, %8 : vector<256x4xf32>
    %cst_5 = arith.constant 0.000000e+00 : f32
    %10 = vector.broadcast %cst_5 : f32 to vector<1x32x4xf32>
    %c0_6 = arith.constant 0 : index
    %c0_7 = arith.constant 0 : index
    %c0_8 = arith.constant 0 : index
    %11 = vector.load %arg7[%c0_6, %c0_7, %c0_8] : memref<18x32x4xf32, #tpu.memory_space<vmem>>, vector<1x32x4xf32>
    tpu.vector_store %arg7[%c0_6, %c0_7, %c0_8], %10 {strides = array<i32>} : memref<18x32x4xf32, #tpu.memory_space<vmem>>, vector<1x32x4xf32>,
    %cst_9 = arith.constant 0.000000e+00 : f32
    %12 = vector.broadcast %cst_9 : f32 to vector<1x32x4xf32>
    %c17 = arith.constant 17 : index
    %c0_10 = arith.constant 0 : index
    %c0_11 = arith.constant 0 : index
    %13 = vector.load %arg7[%c17, %c0_10, %c0_11] : memref<18x32x4xf32, #tpu.memory_space<vmem>>, vector<1x32x4xf32>
    tpu.vector_store %arg7[%c17, %c0_10, %c0_11], %12 {strides = array<i32>} : memref<18x32x4xf32, #tpu.memory_space<vmem>>, vector<1x32x4xf32>,
    %cst_12 = arith.constant 0.000000e+00 : f32
    %14 = vector.broadcast %cst_12 : f32 to vector<16x8x4xf32>
    %c1 = arith.constant 1 : index
    %c0_13 = arith.constant 0 : index
    %c0_14 = arith.constant 0 : index
    %15 = vector.load %arg7[%c1, %c0_13, %c0_14] : memref<18x32x4xf32, #tpu.memory_space<vmem>>, vector<16x8x4xf32>
    tpu.vector_store %arg7[%c1, %c0_13, %c0_14], %14 {strides = array<i32>} : memref<18x32x4xf32, #tpu.memory_space<vmem>>, vector<16x8x4xf32>,
    %cst_15 = arith.constant 0.000000e+00 : f32
    %16 = vector.broadcast %cst_15 : f32 to vector<16x8x4xf32>
    %c1_16 = arith.constant 1 : index
    %c24 = arith.constant 24 : index
    %c0_17 = arith.constant 0 : index
    %17 = vector.load %arg7[%c1_16, %c24, %c0_17] : memref<18x32x4xf32, #tpu.memory_space<vmem>>, vector<16x8x4xf32>
    tpu.vector_store %arg7[%c1_16, %c24, %c0_17], %16 {strides = array<i32>} : memref<18x32x4xf32, #tpu.memory_space<vmem>>, vector<16x8x4xf32>,
    %18 = vector.shape_cast %9 : vector<256x4xf32> to vector<16x16x4xf32>
    %c1_18 = arith.constant 1 : index
    %c8 = arith.constant 8 : index
    %c0_19 = arith.constant 0 : index
    %19 = vector.load %arg7[%c1_18, %c8, %c0_19] : memref<18x32x4xf32, #tpu.memory_space<vmem>>, vector<16x16x4xf32>
    tpu.vector_store %arg7[%c1_18, %c8, %c0_19], %18 {strides = array<i32>} : memref<18x32x4xf32, #tpu.memory_space<vmem>>, vector<16x16x4xf32>,
    %c0_20 = arith.constant 0 : index
    %c7 = arith.constant 7 : index
    %c0_21 = arith.constant 0 : index
    %20 = vector.load %arg7[%c0_20, %c7, %c0_21] : memref<18x32x4xf32, #tpu.memory_space<vmem>>, vector<16x16x4xf32>
    %21 = vector.shape_cast %20 : vector<16x16x4xf32> to vector<256x4xf32>
    %c0_22 = arith.constant 0 : index
    %c8_23 = arith.constant 8 : index
    %c0_24 = arith.constant 0 : index
    %22 = vector.load %arg7[%c0_22, %c8_23, %c0_24] : memref<18x32x4xf32, #tpu.memory_space<vmem>>, vector<16x16x4xf32>
    %23 = vector.shape_cast %22 : vector<16x16x4xf32> to vector<256x4xf32>
    %c0_25 = arith.constant 0 : index
    %c9 = arith.constant 9 : index
    %c0_26 = arith.constant 0 : index
    %24 = vector.load %arg7[%c0_25, %c9, %c0_26] : memref<18x32x4xf32, #tpu.memory_space<vmem>>, vector<16x16x4xf32>
    %25 = vector.shape_cast %24 : vector<16x16x4xf32> to vector<256x4xf32>
    %26 = tpu.concatenate %21, %23, %25 in 1 : vector<256x4xf32>, vector<256x4xf32>, vector<256x4xf32> -> vector<256x12xf32>
    %27 = arith.truncf %26 : vector<256x12xf32> to vector<256x12xbf16>
    %c0_27 = arith.constant 0 : index
    %c0_28 = arith.constant 0 : index
    %c0_29 = arith.constant 0 : index
    %28 = vector.load %arg4[%c0_27, %c0_28, %c0_29] : memref<3x12x4xbf16, #tpu.memory_space<vmem>>, vector<1x12x4xbf16>
    %29 = vector.shape_cast %28 : vector<1x12x4xbf16> to vector<12x4xbf16>
    %cst_30 = arith.constant dense<0.000000e+00> : vector<256x4xf32>
    %30 = tpu.matmul %27, %29, %cst_30 {dimension_numbers = #tpu.dot_dimension_numbers<[1], [0], [0], [1], [0, 0, 1, 1], [], []>} : vector<256x12xbf16>, vector<12x4xbf16>, vector<256x4xf32> -> vector<256x4xf32>
    %c1_31 = arith.constant 1 : index
    %c7_32 = arith.constant 7 : index
    %c0_33 = arith.constant 0 : index
    %31 = vector.load %arg7[%c1_31, %c7_32, %c0_33] : memref<18x32x4xf32, #tpu.memory_space<vmem>>, vector<16x16x4xf32>
    %32 = vector.shape_cast %31 : vector<16x16x4xf32> to vector<256x4xf32>
    %c1_34 = arith.constant 1 : index
    %c8_35 = arith.constant 8 : index
    %c0_36 = arith.constant 0 : index
    %33 = vector.load %arg7[%c1_34, %c8_35, %c0_36] : memref<18x32x4xf32, #tpu.memory_space<vmem>>, vector<16x16x4xf32>
    %34 = vector.shape_cast %33 : vector<16x16x4xf32> to vector<256x4xf32>
    %c1_37 = arith.constant 1 : index
    %c9_38 = arith.constant 9 : index
    %c0_39 = arith.constant 0 : index
    %35 = vector.load %arg7[%c1_37, %c9_38, %c0_39] : memref<18x32x4xf32, #tpu.memory_space<vmem>>, vector<16x16x4xf32>
    %36 = vector.shape_cast %35 : vector<16x16x4xf32> to vector<256x4xf32>
    %37 = tpu.concatenate %32, %34, %36 in 1 : vector<256x4xf32>, vector<256x4xf32>, vector<256x4xf32> -> vector<256x12xf32>
    %38 = arith.truncf %37 : vector<256x12xf32> to vector<256x12xbf16>
    %c1_40 = arith.constant 1 : index
    %c0_41 = arith.constant 0 : index
    %c0_42 = arith.constant 0 : index
    %39 = vector.load %arg4[%c1_40, %c0_41, %c0_42] : memref<3x12x4xbf16, #tpu.memory_space<vmem>>, vector<1x12x4xbf16>
    %40 = vector.shape_cast %39 : vector<1x12x4xbf16> to vector<12x4xbf16>
    %cst_43 = arith.constant dense<0.000000e+00> : vector<256x4xf32>
    %41 = tpu.matmul %38, %40, %cst_43 {dimension_numbers = #tpu.dot_dimension_numbers<[1], [0], [0], [1], [0, 0, 1, 1], [], []>} : vector<256x12xbf16>, vector<12x4xbf16>, vector<256x4xf32> -> vector<256x4xf32>
    %42 = arith.addf %30, %41 : vector<256x4xf32>
    %c2 = arith.constant 2 : index
    %c7_44 = arith.constant 7 : index
    %c0_45 = arith.constant 0 : index
    %43 = vector.load %arg7[%c2, %c7_44, %c0_45] : memref<18x32x4xf32, #tpu.memory_space<vmem>>, vector<16x16x4xf32>
    %44 = vector.shape_cast %43 : vector<16x16x4xf32> to vector<256x4xf32>
    %c2_46 = arith.constant 2 : index
    %c8_47 = arith.constant 8 : index
    %c0_48 = arith.constant 0 : index
    %45 = vector.load %arg7[%c2_46, %c8_47, %c0_48] : memref<18x32x4xf32, #tpu.memory_space<vmem>>, vector<16x16x4xf32>
    %46 = vector.shape_cast %45 : vector<16x16x4xf32> to vector<256x4xf32>
    %c2_49 = arith.constant 2 : index
    %c9_50 = arith.constant 9 : index
    %c0_51 = arith.constant 0 : index
    %47 = vector.load %arg7[%c2_49, %c9_50, %c0_51] : memref<18x32x4xf32, #tpu.memory_space<vmem>>, vector<16x16x4xf32>
    %48 = vector.shape_cast %47 : vector<16x16x4xf32> to vector<256x4xf32>
    %49 = tpu.concatenate %44, %46, %48 in 1 : vector<256x4xf32>, vector<256x4xf32>, vector<256x4xf32> -> vector<256x12xf32>
    %50 = arith.truncf %49 : vector<256x12xf32> to vector<256x12xbf16>
    %c2_52 = arith.constant 2 : index
    %c0_53 = arith.constant 0 : index
    %c0_54 = arith.constant 0 : index
    %51 = vector.load %arg4[%c2_52, %c0_53, %c0_54] : memref<3x12x4xbf16, #tpu.memory_space<vmem>>, vector<1x12x4xbf16>
    %52 = vector.shape_cast %51 : vector<1x12x4xbf16> to vector<12x4xbf16>
    %cst_55 = arith.constant dense<0.000000e+00> : vector<256x4xf32>
    %53 = tpu.matmul %50, %52, %cst_55 {dimension_numbers = #tpu.dot_dimension_numbers<[1], [0], [0], [1], [0, 0, 1, 1], [], []>} : vector<256x12xbf16>, vector<12x4xbf16>, vector<256x4xf32> -> vector<256x4xf32>
    %54 = arith.addf %42, %53 : vector<256x4xf32>
    %cst_56 = arith.constant dense<0.000000e+00> : vector<4xf32>
    %55 = vector.multi_reduction <add>, %54, %cst_56 [0] : vector<256x4xf32> to vector<4xf32>
    %56 = vector.shape_cast %55 : vector<4xf32> to vector<1x4xf32>
    %57 = arith.mulf %54, %54 : vector<256x4xf32>
    %cst_57 = arith.constant dense<0.000000e+00> : vector<4xf32>
    %58 = vector.multi_reduction <add>, %57, %cst_57 [0] : vector<256x4xf32> to vector<4xf32>
    %59 = vector.shape_cast %58 : vector<4xf32> to vector<1x4xf32>
    %60 = tpu.concatenate %56, %59 in 0 : vector<1x4xf32>, vector<1x4xf32> -> vector<2x4xf32>
    %61 = vector.shape_cast %60 : vector<2x4xf32> to vector<1x2x4xf32>
    %c0_58 = arith.constant 0 : index
    %c0_59 = arith.constant 0 : index
    %c0_60 = arith.constant 0 : index
    %62 = vector.load %arg6[%c0_58, %c0_59, %c0_60] : memref<1x2x4xf32, #tpu.memory_space<vmem>>, vector<1x2x4xf32>
    tpu.vector_store %arg6[%c0_58, %c0_59, %c0_60], %61 {strides = array<i32>} : memref<1x2x4xf32, #tpu.memory_space<vmem>>, vector<1x2x4xf32>,
    %63 = arith.truncf %54 : vector<256x4xf32> to vector<256x4xbf16>
    %c0_61 = arith.constant 0 : index
    %c0_62 = arith.constant 0 : index
    %64 = vector.load %arg5[%c0_61, %c0_62] : memref<256x4xbf16, #tpu.memory_space<vmem>>, vector<256x4xbf16>
    tpu.vector_store %arg5[%c0_61, %c0_62], %63 {strides = array<i32>} : memref<256x4xbf16, #tpu.memory_space<vmem>>, vector<256x4xbf16>,
    return
  }
  func.func @transform_0(%arg0: i32) -> (i32, i32) {
    %c0_i32 = arith.constant 0 : i32
    %c0_i32_0 = arith.constant 0 : i32
    return %arg0, %c0_i32 : i32, i32
  }
  func.func @transform_1(%arg0: i32) -> (i32, i32) {
    %c0_i32 = arith.constant 0 : i32
    %c0_i32_0 = arith.constant 0 : i32
    %c0_i32_1 = arith.constant 0 : i32
    return %c0_i32, %c0_i32_0 : i32, i32
  }
  func.func @transform_2(%arg0: i32) -> (i32, i32) {
    %c0_i32 = arith.constant 0 : i32
    %c0_i32_0 = arith.constant 0 : i32
    %c0_i32_1 = arith.constant 0 : i32
    return %c0_i32, %c0_i32_0 : i32, i32
  }
  func.func @transform_3(%arg0: i32) -> (i32, i32, i32) {
    %c0_i32 = arith.constant 0 : i32
    %c0_i32_0 = arith.constant 0 : i32
    %c0_i32_1 = arith.constant 0 : i32
    %c0_i32_2 = arith.constant 0 : i32
    return %c0_i32, %c0_i32_0, %c0_i32_1 : i32, i32, i32
  }
  func.func @transform_4(%arg0: i32) -> (i32, i32) {
    %c0_i32 = arith.constant 0 : i32
    %c0_i32_0 = arith.constant 0 : i32
    return %arg0, %c0_i32 : i32, i32
  }
  func.func @transform_5(%arg0: i32) -> (i32, i32, i32) {
    %c0_i32 = arith.constant 0 : i32
    %c0_i32_0 = arith.constant 0 : i32
    %c0_i32_1 = arith.constant 0 : i32
    return %arg0, %c0_i32, %c0_i32_0 : i32, i32, i32
  }
}

module attributes {stable_mosaic.version = 11 : i64} {
  func.func @_bn_residual_relu_kernel(%arg0: i32, %arg1: memref<512x16xbf16, #tpu.memory_space<vmem>>, %arg2: memref<512x16xf32, #tpu.memory_space<vmem>>, %arg3: memref<1x16xf32, #tpu.memory_space<vmem>>, %arg4: memref<1x16xf32, #tpu.memory_space<vmem>>, %arg5: memref<512x16xf32, #tpu.memory_space<vmem>>) attributes {dimension_semantics = [#tpu.dimension_semantics<parallel>], iteration_bounds = array<i64: 1>, scalar_prefetch = 0 : i64, scratch_operands = 0 : i64, tpu.core_type = #tpu.core_type<tc>, window_params = [{transform_indices = @transform_0, window_bounds = array<i64: 512, 16>}, {transform_indices = @transform_1, window_bounds = array<i64: 512, 16>}, {pipeline_mode = #tpu.pipeline_mode<synchronous>, transform_indices = @transform_2, window_bounds = array<i64: 1, 16>}, {pipeline_mode = #tpu.pipeline_mode<synchronous>, transform_indices = @transform_3, window_bounds = array<i64: 1, 16>}, {transform_indices = @transform_4, window_bounds = array<i64: 512, 16>}]} {
    %c0 = arith.constant 0 : index
    %c0_0 = arith.constant 0 : index
    %0 = vector.load %arg1[%c0, %c0_0] : memref<512x16xbf16, #tpu.memory_space<vmem>>, vector<512x16xbf16>
    %1 = arith.extf %0 : vector<512x16xbf16> to vector<512x16xf32>
    %c0_1 = arith.constant 0 : index
    %c0_2 = arith.constant 0 : index
    %2 = vector.load %arg3[%c0_1, %c0_2] : memref<1x16xf32, #tpu.memory_space<vmem>>, vector<1x16xf32>
    %3 = vector.broadcast %2 : vector<1x16xf32> to vector<512x16xf32>
    %4 = arith.mulf %1, %3 : vector<512x16xf32>
    %c0_3 = arith.constant 0 : index
    %c0_4 = arith.constant 0 : index
    %5 = vector.load %arg4[%c0_3, %c0_4] : memref<1x16xf32, #tpu.memory_space<vmem>>, vector<1x16xf32>
    %6 = vector.broadcast %5 : vector<1x16xf32> to vector<512x16xf32>
    %7 = arith.addf %4, %6 : vector<512x16xf32>
    %c0_5 = arith.constant 0 : index
    %c0_6 = arith.constant 0 : index
    %8 = vector.load %arg2[%c0_5, %c0_6] : memref<512x16xf32, #tpu.memory_space<vmem>>, vector<512x16xf32>
    %9 = arith.addf %7, %8 : vector<512x16xf32>
    %cst = arith.constant 0.000000e+00 : f32
    %10 = vector.broadcast %cst : f32 to vector<512x16xf32>
    %11 = arith.maximumf %9, %10 : vector<512x16xf32>
    %c0_7 = arith.constant 0 : index
    %c0_8 = arith.constant 0 : index
    %12 = vector.load %arg5[%c0_7, %c0_8] : memref<512x16xf32, #tpu.memory_space<vmem>>, vector<512x16xf32>
    tpu.vector_store %arg5[%c0_7, %c0_8], %11 {strides = array<i32>} : memref<512x16xf32, #tpu.memory_space<vmem>>, vector<512x16xf32>,
    return
  }
  func.func @transform_0(%arg0: i32) -> (i32, i32) {
    %c0_i32 = arith.constant 0 : i32
    %c0_i32_0 = arith.constant 0 : i32
    return %arg0, %c0_i32 : i32, i32
  }
  func.func @transform_1(%arg0: i32) -> (i32, i32) {
    %c0_i32 = arith.constant 0 : i32
    %c0_i32_0 = arith.constant 0 : i32
    return %arg0, %c0_i32 : i32, i32
  }
  func.func @transform_2(%arg0: i32) -> (i32, i32) {
    %c0_i32 = arith.constant 0 : i32
    %c0_i32_0 = arith.constant 0 : i32
    %c0_i32_1 = arith.constant 0 : i32
    return %c0_i32, %c0_i32_0 : i32, i32
  }
  func.func @transform_3(%arg0: i32) -> (i32, i32) {
    %c0_i32 = arith.constant 0 : i32
    %c0_i32_0 = arith.constant 0 : i32
    %c0_i32_1 = arith.constant 0 : i32
    return %c0_i32, %c0_i32_0 : i32, i32
  }
  func.func @transform_4(%arg0: i32) -> (i32, i32) {
    %c0_i32 = arith.constant 0 : i32
    %c0_i32_0 = arith.constant 0 : i32
    return %arg0, %c0_i32 : i32, i32
  }
}

</mosaic_0001>

<bundles_post_ra>
// kernel: bottleneck_forward.4
= control target key start
LH: loop header
LB: loop body
LE: loop exit
PB: predicated region body
PF: predicated region fallthrough
CT: control target
= control target key end

     0   :  { %vm118_vm0 = vcmask 130048   ;;  %vm783_vm1 = vcmask 27648   ;;  %vm384_vm2 = vcmask 31744   ;;  %vm715_vm3 = vcmask 1040384   ;;  %s1914_s1 = inlined_call_operand.vmem [shape: bf16[16,4], index: 1, kind: input, shape index: {}]   ;;  %s1915_s0 = inlined_call_operand.vmem [shape: f32[512,16], index: 0, kind: input, shape index: {}]   ;;  %s1916_s2 = inlined_call_operand.vmem [shape: bf16[512,4], index: 2, kind: output, shape index: {0}]   ;;  %s1917_s3 = inlined_call_operand.vmem [shape: f32[1,2,4], index: 3, kind: output, shape index: {1}]  }
   0x1   :  { %v892_v0 = vld [vmem:[%s1914_s1] sm:$0xff]  ;;  %v15_v2 = vld [vmem:[%s1915_s0 + $0x8] sm:$0xff]  ;;  %v16_v7 = vld [vmem:[%s1915_s0 + $0x10] sm:$0xff]  ;;  %vm717_vm4 = vcmask 25600  }
   0x2   :  { %v14_v1 = vld [vmem:[%s1915_s0] sm:$0xff]  ;;  %222 = vmatpush.bf16.msra.mxu0 %v892_v0  ;;  %893 = vmatpush.bf16.msra.mxu1 %v892_v0  ;;  %v31_v5 = vld [vmem:[%s1915_s0 + $0x88] sm:$0xff]  ;;  %v17_v8 = vld [vmem:[%s1915_s0 + $0x18] sm:$0xff] }
   0x3   :  { %v78_v3 = vpack.c.bf16 %v15_v2, %v14_v1  ;;  %v30_v4 = vld [vmem:[%s1915_s0 + $0x80] sm:$0xff]  ;;  %894 = vmatpush.bf16.msra.mxu2 %v892_v0  ;;  %895 = vmatpush.bf16.msra.mxu3 %v892_v0  ;;  %v32_v9 = vld [vmem:[%s1915_s0 + $0x90] sm:$0xff]  ;;  %v33_v10 = vld [vmem:[%s1915_s0 + $0x98] sm:$0xff]  ;;  %v79_v11 = vpack.c.bf16 %v17_v8, %v16_v7 }
   0x4   :  { %v86_v6 = vpack.c.bf16 %v31_v5, %v30_v4  ;;  %v87_v12 = vpack.c.bf16 %v33_v10, %v32_v9  ;;  %v46_v13 = vld [vmem:[%s1915_s0 + $0x100] sm:$0xff]  ;;  %v47_v14 = vld [vmem:[%s1915_s0 + $0x108] sm:$0xff]  ;;  %v48_v22 = vld [vmem:[%s1915_s0 + $0x110] sm:$0xff] }
   0x5   :  { %860 = vmatmul.msk.bf16.vlgmr.msra.gmra.mxu0 %vm118_vm0, %v78_v3  ;;  %v94_v15 = vpack.c.bf16 %v47_v14, %v46_v13  ;;  %v18_v16 = vld [vmem:[%s1915_s0 + $0x20] sm:$0xff]  ;;  %v19_v17 = vld [vmem:[%s1915_s0 + $0x28] sm:$0xff]  ;;  %v49_v23 = vld [vmem:[%s1915_s0 + $0x118] sm:$0xff] }
   0x6   :  { %868 = vmatmul.msk.bf16.vlgmr.msra.gmra.mxu1 %vm118_vm0, %v86_v6  ;;  %v34_v18 = vld [vmem:[%s1915_s0 + $0xa0] sm:$0xff]  ;;  %v35_v19 = vld [vmem:[%s1915_s0 + $0xa8] sm:$0xff]  ;;  %v80_v20 = vpack.c.bf16 %v19_v17, %v18_v16  ;;  %v95_v24 = vpack.c.bf16 %v49_v23, %v48_v22  ;;  %v20_v25 = vld [vmem:[%s1915_s0 + $0x30] sm:$0xff] }
   0x7   :  { %876 = vmatmul.msk.bf16.vlgmr.msra.gmra.mxu2 %vm118_vm0, %v94_v15  ;;  %v88_v21 = vpack.c.bf16 %v35_v19, %v34_v18  ;;  %v21_v26 = vld [vmem:[%s1915_s0 + $0x38] sm:$0xff]  ;;  %v36_v27 = vld [vmem:[%s1915_s0 + $0xb0] sm:$0xff]  ;;  %v50_v31 = vld [vmem:[%s1915_s0 + $0x120] sm:$0xff] }
   0x8   :  { %v37_v28 = vld [vmem:[%s1915_s0 + $0xb8] sm:$0xff]  ;;  %v81_v29 = vpack.c.bf16 %v21_v26, %v20_v25  ;;  %v51_v32 = vld [vmem:[%s1915_s0 + $0x128] sm:$0xff]  ;;  %v62_v33 = vld [vmem:[%s1915_s0 + $0x180] sm:$0xff] }
   0x9   :  { %v89_v30 = vpack.c.bf16 %v37_v28, %v36_v27  ;;  %v96_v34 = vpack.c.bf16 %v51_v32, %v50_v31  ;;  %v63_v35 = vld [vmem:[%s1915_s0 + $0x188] sm:$0xff]  ;;  %v22_v37 = vld [vmem:[%s1915_s0 + $0x40] sm:$0xff]  ;;  %v52_v43 = vld [vmem:[%s1915_s0 + $0x130] sm:$0xff] }
   0xa   :  { %v102_v36 = vpack.c.bf16 %v63_v35, %v62_v33  ;;  %v23_v38 = vld [vmem:[%s1915_s0 + $0x48] sm:$0xff]  ;;  %v38_v39 = vld [vmem:[%s1915_s0 + $0xc0] sm:$0xff]  ;;  %v53_v44 = vld [vmem:[%s1915_s0 + $0x138] sm:$0xff] }
   0xb   :  { %v39_v40 = vld [vmem:[%s1915_s0 + $0xc8] sm:$0xff]  ;;  %v82_v41 = vpack.c.bf16 %v23_v38, %v22_v37  ;;  %v64_v45 = vld [vmem:[%s1915_s0 + $0x190] sm:$0xff]  ;;  %v97_v46 = vpack.c.bf16 %v53_v44, %v52_v43  ;;  %v65_v47 = vld [vmem:[%s1915_s0 + $0x198] sm:$0xff] }
   0xc   :  { %884 = vmatmul.msk.bf16.vlgmr.msra.gmra.mxu3 %vm118_vm0, %v102_v36  ;;  %v90_v42 = vpack.c.bf16 %v39_v40, %v38_v39  ;;  %v103_v48 = vpack.c.bf16 %v65_v47, %v64_v45  ;;  %v24_v49 = vld [vmem:[%s1915_s0 + $0x50] sm:$0xff]  ;;  %v25_v50 = vld [vmem:[%s1915_s0 + $0x58] sm:$0xff]  ;;  %v54_v55 = vld [vmem:[%s1915_s0 + $0x140] sm:$0xff] }
   0xd   :  { %v40_v51 = vld [vmem:[%s1915_s0 + $0xd0] sm:$0xff]  ;;  %v41_v52 = vld [vmem:[%s1915_s0 + $0xd8] sm:$0xff]  ;;  %v83_v53 = vpack.c.bf16 %v25_v50, %v24_v49  ;;  %v55_v56 = vld [vmem:[%s1915_s0 + $0x148] sm:$0xff] }
   0xe   :  { %v91_v54 = vpack.c.bf16 %v41_v52, %v40_v51  ;;  %v66_v57 = vld [vmem:[%s1915_s0 + $0x1a0] sm:$0xff]  ;;  %v98_v58 = vpack.c.bf16 %v55_v56, %v54_v55  ;;  %v67_v59 = vld [vmem:[%s1915_s0 + $0x1a8] sm:$0xff]  ;;  %v56_v3 = vld [vmem:[%s1915_s0 + $0x150] sm:$0xff] }
   0xf   :  { %v104_v60 = vpack.c.bf16 %v67_v59, %v66_v57  ;;  %v26_v61 = vld [vmem:[%s1915_s0 + $0x60] sm:$0xff]  ;;  %v27_v62 = vld [vmem:[%s1915_s0 + $0x68] sm:$0xff]  ;;  %v57_v4 = vld [vmem:[%s1915_s0 + $0x158] sm:$0xff] }
  0x10   :  { %v42_v63 = vld [vmem:[%s1915_s0 + $0xe0] sm:$0xff]  ;;  %v43_v0 = vld [vmem:[%s1915_s0 + $0xe8] sm:$0xff]  ;;  %v84_v1 = vpack.c.bf16 %v27_v62, %v26_v61  ;;  %v68_v5 = vld [vmem:[%s1915_s0 + $0x1b0] sm:$0xff]  ;;  %v99_v6 = vpack.c.bf16 %v57_v4, %v56_v3 }
  0x11   :  { %v92_v2 = vpack.c.bf16 %v43_v0, %v42_v63  ;;  %v69_v7 = vld [vmem:[%s1915_s0 + $0x1b8] sm:$0xff]  ;;  %v28_v9 = vld [vmem:[%s1915_s0 + $0x70] sm:$0xff]  ;;  %v58_v15 = vld [vmem:[%s1915_s0 + $0x160] sm:$0xff] }
  0x12   :  { %v105_v8 = vpack.c.bf16 %v69_v7, %v68_v5  ;;  %v29_v10 = vld [vmem:[%s1915_s0 + $0x78] sm:$0xff]  ;;  %v59_v16 = vld [vmem:[%s1915_s0 + $0x168] sm:$0xff]  ;;  %v70_v17 = vld [vmem:[%s1915_s0 + $0x1c0] sm:$0xff] }
  0x13   :  { %v85_v13 = vpack.c.bf16 %v29_v10, %v28_v9  ;;  %v100_v18 = vpack.c.bf16 %v59_v16, %v58_v15  ;;  %v71_v19 = vld [vmem:[%s1915_s0 + $0x1c8] sm:$0xff]  ;;  %v60_v25 = vld [vmem:[%s1915_s0 + $0x170] sm:$0xff]  ;;  %v61_v26 = vld [vmem:[%s1915_s0 + $0x178] sm:$0xff] }
  0x14   :  { %v72_v27 = vld [vmem:[%s1915_s0 + $0x1d0] sm:$0xff]  ;;  %v101_v28 = vpack.c.bf16 %v61_v26, %v60_v25  ;;  %v74_v50 = vld [vmem:[%s1915_s0 + $0x1e0] sm:$0xff]  ;;  %v75_v51 = vld [vmem:[%s1915_s0 + $0x1e8] sm:$0xff] }
  0x15   :  { %861 = vmatmul.msk.bf16.gmra.mxu0 %vm118_vm0, %v79_v11  ;;  %v44_v11 = vld [vmem:[%s1915_s0 + $0xf0] sm:$0xff] }
  0x16   :  { %869 = vmatmul.msk.bf16.gmra.mxu1 %vm118_vm0, %v87_v12  ;;  %v45_v12 = vld [vmem:[%s1915_s0 + $0xf8] sm:$0xff]  ;;  %v76_v10 = vld [vmem:[%s1915_s0 + $0x1f0] sm:$0xff] }
  0x17   :  { %877 = vmatmul.msk.bf16.gmra.mxu2 %vm118_vm0, %v95_v24  ;;  %v93_v14 = vpack.c.bf16 %v45_v12, %v44_v11  ;;  %v77_v11 = vld [vmem:[%s1915_s0 + $0x1f8] sm:$0xff] }
  0x1c   :  { %885 = vmatmul.msk.bf16.gmra.mxu3 %vm118_vm0, %v103_v48 }
  0x25   :  { %862 = vmatmul.msk.bf16.gmra.mxu0 %vm118_vm0, %v80_v20  ;;  %v106_v20 = vpack.c.bf16 %v71_v19, %v70_v17 }
  0x26   :  { %870 = vmatmul.msk.bf16.gmra.mxu1 %vm118_vm0, %v88_v21 }
  0x27   :  { %878 = vmatmul.msk.bf16.gmra.mxu2 %vm118_vm0, %v96_v34 }
  0x2c   :  { %886 = vmatmul.msk.bf16.gmra.mxu3 %vm118_vm0, %v104_v60 }
  0x35   :  { %863 = vmatmul.msk.bf16.gmra.mxu0 %vm118_vm0, %v81_v29  ;;  %v73_v29 = vld [vmem:[%s1915_s0 + $0x1d8] sm:$0xff] }
  0x36   :  { %871 = vmatmul.msk.bf16.gmra.mxu1 %vm118_vm0, %v89_v30  ;;  %v107_v30 = vpack.c.bf16 %v73_v29, %v72_v27 }
  0x37   :  { %879 = vmatmul.msk.bf16.gmra.mxu2 %vm118_vm0, %v97_v46 }
  0x3c   :  { %887 = vmatmul.msk.bf16.gmra.mxu3 %vm118_vm0, %v105_v8 }
  0x45   :  { %864 = vmatmul.msk.bf16.gmra.mxu0 %vm118_vm0, %v82_v41 }
  0x46   :  { %872 = vmatmul.msk.bf16.gmra.mxu1 %vm118_vm0, %v90_v42 }
  0x47   :  { %880 = vmatmul.msk.bf16.gmra.mxu2 %vm118_vm0, %v98_v58 }
  0x4c   :  { %888 = vmatmul.msk.bf16.gmra.mxu3 %vm118_vm0, %v106_v20 }
  0x55   :  { %865 = vmatmul.msk.bf16.gmra.mxu0 %vm118_vm0, %v83_v53  ;;  %v108_v53 = vpack.c.bf16 %v75_v51, %v74_v50 }
  0x56   :  { %873 = vmatmul.msk.bf16.gmra.mxu1 %vm118_vm0, %v91_v54 }
  0x57   :  { %881 = vmatmul.msk.bf16.gmra.mxu2 %vm118_vm0, %v99_v6 }
  0x5c   :  { %889 = vmatmul.msk.bf16.gmra.mxu3 %vm118_vm0, %v107_v30 }
  0x65   :  { %866 = vmatmul.msk.bf16.gmra.mxu0 %vm118_vm0, %v84_v1 }
  0x66   :  { %874 = vmatmul.msk.bf16.gmra.mxu1 %vm118_vm0, %v92_v2 }
  0x67   :  { %882 = vmatmul.msk.bf16.gmra.mxu2 %vm118_vm0, %v100_v18 }
  0x6c   :  { %890 = vmatmul.msk.bf16.gmra.mxu3 %vm118_vm0, %v108_v53 }
  0x75   :  { %867 = vmatmul.msk.bf16.gmra.mxu0 %vm118_vm0, %v85_v13 }
  0x76   :  { %875 = vmatmul.msk.bf16.gmra.mxu1 %vm118_vm0, %v93_v14  ;;  %v109_v14 = vpack.c.bf16 %v77_v11, %v76_v10 }
  0x77   :  { %883 = vmatmul.msk.bf16.gmra.mxu2 %vm118_vm0, %v101_v28 }
  0x7c   :  { %891 = vmatmul.msk.bf16.gmra.mxu3 %vm118_vm0, %v109_v14 }
  0x82   :  { %v224_v21 = vpop.f32.mrf.mxu0 }
  0x83   :  { %v1115_v22 = vpop.f32.mrf.mxu1  ;;  %v719_v23 = vpack.c.bf16 %v224_v21, %v224_v21  ;;  %v518_v31 = vmul.f32 %v224_v21, %v224_v21  ;;  %v385_v34 = vsel %vm384_vm2, %v224_v21, 0.0 }
  0x84   :  { %v735_v24 = vpack.c.bf16 %v1115_v22, %v1115_v22 }
  0x85   :  { %784 = vst.msk [vmem:[%s1916_s2] sm:$0xf] %vm783_vm1, %v719_v23  ;;  %v582_v40 = vsel %vm384_vm2, %v518_v31, 0.0 }
  0x86   :  { %800 = vst.msk [vmem:[%s1916_s2 + $0x40] sm:$0xf] %vm783_vm1, %v735_v24 }
  0x8a   :  { %v226_v32 = vpop.f32.mrf.mxu0  ;;  %v1181_v60 = vpop.f32.mrf.mxu2 }
  0x8b   :  { %v1141_v33 = vpop.f32.mrf.mxu1  ;;  %v386_v35 = vsel %vm384_vm2, %v226_v32, 0.0  ;;  %v519_v36 = vmul.f32 %v226_v32, %v226_v32  ;;  %v720_v37 = vpack.c.bf16 %v226_v32, %v226_v32  ;;  %v751_v1 = vpack.c.bf16 %v1181_v60, %v1181_v60 }
  0x8c   :  { %v387_v38 = vadd.f32 %v386_v35, %v385_v34  ;;  %v736_v39 = vpack.c.bf16 %v1141_v33, %v1141_v33 }
  0x8d   :  { %v583_v41 = vsel %vm384_vm2, %v519_v36, 0.0  ;;  %785 = vst.msk [vmem:[%s1916_s2 + $0x4] sm:$0xf] %vm783_vm1, %v720_v37 }
  0x8e   :  { %v584_v42 = vadd.f32 %v583_v41, %v582_v40  ;;  %801 = vst.msk [vmem:[%s1916_s2 + $0x44] sm:$0xf] %vm783_vm1, %v736_v39 }
  0x8f   :  { %816 = vst.msk [vmem:[%s1916_s2 + $0x80] sm:$0xf] %vm783_vm1, %v751_v1  ;;  %v1289_v34 = vpop.f32.mrf.mxu3 }
  0x90   :  { %v767_v37 = vpack.c.bf16 %v1289_v34, %v1289_v34 }
  0x92   :  { %v229_v43 = vpop.f32.mrf.mxu0  ;;  %v1203_v7 = vpop.f32.mrf.mxu2  ;;  %832 = vst.msk [vmem:[%s1916_s2 + $0xc0] sm:$0xf] %vm783_vm1, %v767_v37 }
  0x93   :  { %v1157_v44 = vpop.f32.mrf.mxu1  ;;  %v388_v45 = vsel %vm384_vm2, %v229_v43, 0.0  ;;  %v520_v46 = vmul.f32 %v229_v43, %v229_v43  ;;  %v721_v47 = vpack.c.bf16 %v229_v43, %v229_v43  ;;  %v752_v13 = vpack.c.bf16 %v1203_v7, %v1203_v7 }
  0x94   :  { %v389_v48 = vadd.f32 %v388_v45, %v387_v38  ;;  %v737_v49 = vpack.c.bf16 %v1157_v44, %v1157_v44 }
  0x95   :  { %v585_v52 = vsel %vm384_vm2, %v520_v46, 0.0  ;;  %786 = vst.msk [vmem:[%s1916_s2 + $0x8] sm:$0xf] %vm783_vm1, %v721_v47 }
  0x96   :  { %v586_v54 = vadd.f32 %v585_v52, %v584_v42  ;;  %802 = vst.msk [vmem:[%s1916_s2 + $0x48] sm:$0xf] %vm783_vm1, %v737_v49 }
  0x97   :  { %817 = vst.msk [vmem:[%s1916_s2 + $0x84] sm:$0xf] %vm783_vm1, %v752_v13  ;;  %v1321_v42 = vpop.f32.mrf.mxu3 }
  0x98   :  { %v768_v46 = vpack.c.bf16 %v1321_v42, %v1321_v42 }
  0x9a   :  { %v231_v55 = vpop.f32.mrf.mxu0  ;;  %v1239_v19 = vpop.f32.mrf.mxu2  ;;  %833 = vst.msk [vmem:[%s1916_s2 + $0xc4] sm:$0xf] %vm783_vm1, %v768_v46 }
  0x9b   :  { %v1178_v56 = vpop.f32.mrf.mxu1  ;;  %v390_v57 = vsel %vm384_vm2, %v231_v55, 0.0  ;;  %v521_v58 = vmul.f32 %v231_v55, %v231_v55  ;;  %v722_v59 = vpack.c.bf16 %v231_v55, %v231_v55  ;;  %v753_v21 = vpack.c.bf16 %v1239_v19, %v1239_v19 }
  0x9c   :  { %v391_v61 = vadd.f32 %v390_v57, %v389_v48  ;;  %v738_v62 = vpack.c.bf16 %v1178_v56, %v1178_v56 }
  0x9d   :  { %v587_v63 = vsel %vm384_vm2, %v521_v58, 0.0  ;;  %787 = vst.msk [vmem:[%s1916_s2 + $0xc] sm:$0xf] %vm783_vm1, %v722_v59 }
  0x9e   :  { %v588_v0 = vadd.f32 %v587_v63, %v586_v54  ;;  %803 = vst.msk [vmem:[%s1916_s2 + $0x4c] sm:$0xf] %vm783_vm1, %v738_v62 }
  0x9f   :  { %818 = vst.msk [vmem:[%s1916_s2 + $0x88] sm:$0xf] %vm783_vm1, %v753_v21  ;;  %v1353_v51 = vpop.f32.mrf.mxu3 }
  0xa0   :  { %v769_v54 = vpack.c.bf16 %v1353_v51, %v1353_v51 }
  0xa2   :  { %v234_v2 = vpop.f32.mrf.mxu0  ;;  %v1263_v26 = vpop.f32.mrf.mxu2  ;;  %834 = vst.msk [vmem:[%s1916_s2 + $0xc8] sm:$0xf] %vm783_vm1, %v769_v54 }
  0xa3   :  { %v1200_v3 = vpop.f32.mrf.mxu1  ;;  %v392_v4 = vsel %vm384_vm2, %v234_v2, 0.0  ;;  %v522_v5 = vmul.f32 %v234_v2, %v234_v2  ;;  %v723_v6 = vpack.c.bf16 %v234_v2, %v234_v2  ;;  %v754_v28 = vpack.c.bf16 %v1263_v26, %v1263_v26 }
  0xa4   :  { %v1205_v8 = vadd.f32 %v392_v4, %v391_v61  ;;  %v739_v9 = vpack.c.bf16 %v1200_v3, %v1200_v3 }
  0xa5   :  { %v589_v12 = vsel %vm384_vm2, %v522_v5, 0.0  ;;  %788 = vst.msk [vmem:[%s1916_s2 + $0x10] sm:$0xf] %vm783_vm1, %v723_v6 }
  0xa6   :  { %v1222_v15 = vadd.f32 %v589_v12, %v588_v0  ;;  %804 = vst.msk [vmem:[%s1916_s2 + $0x50] sm:$0xf] %vm783_vm1, %v739_v9 }
  0xa7   :  { %819 = vst.msk [vmem:[%s1916_s2 + $0x8c] sm:$0xf] %vm783_vm1, %v754_v28  ;;  %v1385_v61 = vpop.f32.mrf.mxu3 }
  0xa8   :  { %v770_v0 = vpack.c.bf16 %v1385_v61, %v1385_v61 }
  0xaa   :  { %v1233_v16 = vpop.f32.mrf.mxu0  ;;  %v1287_v32 = vpop.f32.mrf.mxu2  ;;  %835 = vst.msk [vmem:[%s1916_s2 + $0xcc] sm:$0xf] %vm783_vm1, %v770_v0 }
  0xab   :  { %v1235_v17 = vpop.f32.mrf.mxu1  ;;  %v724_v18 = vpack.c.bf16 %v1233_v16, %v1233_v16  ;;  %v755_v36 = vpack.c.bf16 %v1287_v32, %v1287_v32  ;;  %v523_v12 = vmul.f32 %v1233_v16, %v1233_v16  ;;  %v394_v21 = vsel %vm384_vm2, %v1233_v16, 0.0 }
  0xac   :  { %v740_v20 = vpack.c.bf16 %v1235_v17, %v1235_v17  ;;  %v395_v37 = vadd.f32 %v394_v21, %v1205_v8 }
  0xad   :  { %789 = vst.msk [vmem:[%s1916_s2 + $0x14] sm:$0xf] %vm783_vm1, %v724_v18  ;;  %v591_v16 = vsel %vm384_vm2, %v523_v12, 0.0 }
  0xae   :  { %805 = vst.msk [vmem:[%s1916_s2 + $0x54] sm:$0xf] %vm783_vm1, %v740_v20  ;;  %v592_v8 = vadd.f32 %v591_v16, %v1222_v15 }
  0xaf   :  { %820 = vst.msk [vmem:[%s1916_s2 + $0x90] sm:$0xf] %vm783_vm1, %v755_v36  ;;  %v1413_v6 = vpop.f32.mrf.mxu3 }
  0xb0   :  { %v771_v28 = vpack.c.bf16 %v1413_v6, %v1413_v6 }
  0xb2   :  { %v1257_v23 = vpop.f32.mrf.mxu0  ;;  %v1319_v41 = vpop.f32.mrf.mxu2  ;;  %836 = vst.msk [vmem:[%s1916_s2 + $0xd0] sm:$0xf] %vm783_vm1, %v771_v28 }
  0xb3   :  { %v1259_v24 = vpop.f32.mrf.mxu1  ;;  %v725_v25 = vpack.c.bf16 %v1257_v23, %v1257_v23  ;;  %v756_v45 = vpack.c.bf16 %v1319_v41, %v1319_v41 }
  0xb4   :  { %v741_v27 = vpack.c.bf16 %v1259_v24, %v1259_v24 }
  0xb5   :  { %790 = vst.msk [vmem:[%s1916_s2 + $0x18] sm:$0xf] %vm783_vm1, %v725_v25  ;;  %v524_v25 = vmul.f32 %v1257_v23, %v1257_v23 }
  0xb6   :  { %806 = vst.msk [vmem:[%s1916_s2 + $0x58] sm:$0xf] %vm783_vm1, %v741_v27 }
  0xb7   :  { %821 = vst.msk [vmem:[%s1916_s2 + $0x94] sm:$0xf] %vm783_vm1, %v756_v45  ;;  %v1431_v18 = vpop.f32.mrf.mxu3 }
  0xba   :  { %v1281_v29 = vpop.f32.mrf.mxu0  ;;  %v1351_v50 = vpop.f32.mrf.mxu2 }
  0xbb   :  { %v1283_v30 = vpop.f32.mrf.mxu1  ;;  %v726_v31 = vpack.c.bf16 %v1281_v29, %v1281_v29  ;;  %v757_v53 = vpack.c.bf16 %v1351_v50, %v1351_v50 }
  0xbc   :  { %v742_v35 = vpack.c.bf16 %v1283_v30, %v1283_v30 }
  0xbd   :  { %791 = vst.msk [vmem:[%s1916_s2 + $0x1c] sm:$0xf] %vm783_vm1, %v726_v31  ;;  %v396_v31 = vsel %vm384_vm2, %v1257_v23, 0.0  ;;  %v772_v23 = vpack.c.bf16 %v1431_v18, %v1431_v18 }
  0xbe   :  { %807 = vst.msk [vmem:[%s1916_s2 + $0x5c] sm:$0xf] %vm783_vm1, %v742_v35  ;;  %v525_v35 = vmul.f32 %v1281_v29, %v1281_v29  ;;  %v397_v46 = vadd.f32 %v396_v31, %v395_v37 }
  0xbf   :  { %822 = vst.msk [vmem:[%s1916_s2 + $0x98] sm:$0xf] %vm783_vm1, %v757_v53  ;;  %v1492_v15 = vpop.f32.mrf.mxu3 }
  0xc0   :  { %837 = vst.msk [vmem:[%s1916_s2 + $0xd4] sm:$0xf] %vm783_vm1, %v772_v23 }
  0xc2   :  { %v1309_v38 = vpop.f32.mrf.mxu0  ;;  %v1383_v59 = vpop.f32.mrf.mxu2 }
  0xc3   :  { %v1311_v39 = vpop.f32.mrf.mxu1  ;;  %v727_v40 = vpack.c.bf16 %v1309_v38, %v1309_v38  ;;  %v758_v63 = vpack.c.bf16 %v1383_v59, %v1383_v59  ;;  %v526_v45 = vmul.f32 %v1309_v38, %v1309_v38  ;;  %v400_v53 = vsel %vm384_vm2, %v1309_v38, 0.0 }
  0xc4   :  { %v743_v43 = vpack.c.bf16 %v1311_v39, %v1311_v39 }
  0xc5   :  { %792 = vst.msk [vmem:[%s1916_s2 + $0x20] sm:$0xf] %vm783_vm1, %v727_v40  ;;  %v593_v40 = vsel %vm384_vm2, %v524_v25, 0.0 }
  0xc6   :  { %808 = vst.msk [vmem:[%s1916_s2 + $0x60] sm:$0xf] %vm783_vm1, %v743_v43  ;;  %v398_v43 = vsel %vm384_vm2, %v1281_v29, 0.0  ;;  %v595_v29 = vsel %vm384_vm2, %v525_v35, 0.0 }
  0xc7   :  { %823 = vst.msk [vmem:[%s1916_s2 + $0x9c] sm:$0xf] %vm783_vm1, %v758_v63  ;;  %v594_v63 = vadd.f32 %v593_v40, %v592_v8  ;;  %v399_v0 = vadd.f32 %v398_v43, %v397_v46 }
  0xca   :  { %v1345_v47 = vpop.f32.mrf.mxu0  ;;  %v1411_v5 = vpop.f32.mrf.mxu2 }
  0xcb   :  { %v1347_v48 = vpop.f32.mrf.mxu1  ;;  %v728_v49 = vpack.c.bf16 %v1345_v47, %v1345_v47  ;;  %v759_v27 = vpack.c.bf16 %v1411_v5, %v1411_v5  ;;  %v527_v54 = vmul.f32 %v1345_v47, %v1345_v47  ;;  %v402_v12 = vsel %vm384_vm2, %v1345_v47, 0.0 }
  0xcc   :  { %v744_v52 = vpack.c.bf16 %v1347_v48, %v1347_v48 }
  0xcd   :  { %793 = vst.msk [vmem:[%s1916_s2 + $0x24] sm:$0xf] %vm783_vm1, %v728_v49  ;;  %v599_v21 = vsel %vm384_vm2, %v527_v54, 0.0 }
  0xce   :  { %809 = vst.msk [vmem:[%s1916_s2 + $0x64] sm:$0xf] %vm783_vm1, %v744_v52 }
  0xcf   :  { %824 = vst.msk [vmem:[%s1916_s2 + $0xa0] sm:$0xf] %vm783_vm1, %v759_v27 }
  0xd2   :  { %v1373_v55 = vpop.f32.mrf.mxu0  ;;  %v1429_v14 = vpop.f32.mrf.mxu2 }
  0xd3   :  { %v1375_v57 = vpop.f32.mrf.mxu1  ;;  %v729_v58 = vpack.c.bf16 %v1373_v55, %v1373_v55  ;;  %v760_v36 = vpack.c.bf16 %v1429_v14, %v1429_v14  ;;  %v528_v38 = vmul.f32 %v1373_v55, %v1373_v55  ;;  %v404_v47 = vsel %vm384_vm2, %v1373_v55, 0.0 }
  0xd4   :  { %v745_v62 = vpack.c.bf16 %v1375_v57, %v1375_v57 }
  0xd5   :  { %794 = vst.msk [vmem:[%s1916_s2 + $0x28] sm:$0xf] %vm783_vm1, %v729_v58  ;;  %v601_v16 = vsel %vm384_vm2, %v528_v38, 0.0 }
  0xd6   :  { %810 = vst.msk [vmem:[%s1916_s2 + $0x68] sm:$0xf] %vm783_vm1, %v745_v62 }
  0xd7   :  { %825 = vst.msk [vmem:[%s1916_s2 + $0xa4] sm:$0xf] %vm783_vm1, %v760_v36 }
  0xda   :  { %v251_v1 = vpop.f32.mrf.mxu0  ;;  %v1490_v62 = vpop.f32.mrf.mxu2 }
  0xdb   :  { %v1409_v2 = vpop.f32.mrf.mxu1  ;;  %v730_v4 = vpack.c.bf16 %v251_v1, %v251_v1  ;;  %v529_v25 = vmul.f32 %v251_v1, %v251_v1  ;;  %v406_v31 = vsel %vm384_vm2, %v251_v1, 0.0 }
  0xdc   :  { %v746_v9 = vpack.c.bf16 %v1409_v2, %v1409_v2 }
  0xdd   :  { %795 = vst.msk [vmem:[%s1916_s2 + $0x2c] sm:$0xf] %vm783_vm1, %v730_v4  ;;  %v603_v43 = vsel %vm384_vm2, %v529_v25, 0.0 }
  0xde   :  { %811 = vst.msk [vmem:[%s1916_s2 + $0x6c] sm:$0xf] %vm783_vm1, %v746_v9  ;;  %v597_v9 = vsel %vm384_vm2, %v526_v45, 0.0 }
  0xe2   :  { %v254_v10 = vpop.f32.mrf.mxu0  ;;  %v1518_v55 = vpop.f32.mrf.mxu2 }
  0xe3   :  { %v1425_v11 = vpop.f32.mrf.mxu1  ;;  %v731_v13 = vpack.c.bf16 %v254_v10, %v254_v10  ;;  %v530_v35 = vmul.f32 %v254_v10, %v254_v10  ;;  %v408_v45 = vsel %vm384_vm2, %v254_v10, 0.0  ;;  %v761_v10 = vpack.c.bf16 %v1490_v62, %v1490_v62 }
  0xe4   :  { %v747_v20 = vpack.c.bf16 %v1425_v11, %v1425_v11 }
  0xe5   :  { %796 = vst.msk [vmem:[%s1916_s2 + $0x30] sm:$0xf] %vm783_vm1, %v731_v13  ;;  %v596_v13 = vadd.f32 %v595_v29, %v594_v63  ;;  %v1520_v29 = vpop.f32.mrf.mxu3 }
  0xe6   :  { %812 = vst.msk [vmem:[%s1916_s2 + $0x70] sm:$0xf] %vm783_vm1, %v747_v20  ;;  %v401_v20 = vadd.f32 %v400_v53, %v399_v0 }
  0xe7   :  { %v598_v27 = vadd.f32 %v597_v9, %v596_v13  ;;  %826 = vst.msk [vmem:[%s1916_s2 + $0xa8] sm:$0xf] %vm783_vm1, %v761_v10  ;;  %v762_v13 = vpack.c.bf16 %v1518_v55, %v1518_v55 }
  0xe8   :  { %v403_v28 = vadd.f32 %v402_v12, %v401_v20  ;;  %v773_v12 = vpack.c.bf16 %v1492_v15, %v1492_v15 }
  0xe9   :  { %v600_v36 = vadd.f32 %v599_v21, %v598_v27  ;;  %827 = vst.msk [vmem:[%s1916_s2 + $0xac] sm:$0xf] %vm783_vm1, %v762_v13  ;;  %v537_v13 = vmul.f32 %v1178_v56, %v1178_v56 }
  0xea   :  { %v256_v49 = vpop.f32.mrf.mxu0  ;;  %v405_v37 = vadd.f32 %v404_v47, %v403_v28  ;;  %838 = vst.msk [vmem:[%s1916_s2 + $0xd8] sm:$0xf] %vm783_vm1, %v773_v12  ;;  %v774_v47 = vpack.c.bf16 %v1520_v29, %v1520_v29 }
  0xeb   :  { %v1479_v52 = vpop.f32.mrf.mxu1  ;;  %v732_v58 = vpack.c.bf16 %v256_v49, %v256_v49  ;;  %v531_v8 = vmul.f32 %v256_v49, %v256_v49  ;;  %v602_v53 = vadd.f32 %v601_v16, %v600_v36  ;;  %v410_v63 = vsel %vm384_vm2, %v256_v49, 0.0 }
  0xec   :  { %v748_v4 = vpack.c.bf16 %v1479_v52, %v1479_v52  ;;  %v407_v54 = vadd.f32 %v406_v31, %v405_v37  ;;  %839 = vst.msk [vmem:[%s1916_s2 + $0xdc] sm:$0xf] %vm783_vm1, %v774_v47 }
  0xed   :  { %797 = vst.msk [vmem:[%s1916_s2 + $0x34] sm:$0xf] %vm783_vm1, %v732_v58  ;;  %v605_v58 = vsel %vm384_vm2, %v530_v35, 0.0  ;;  %v607_v49 = vsel %vm384_vm2, %v531_v8, 0.0  ;;  %v534_v35 = vmul.f32 %v1115_v22, %v1115_v22 }
  0xee   :  { %813 = vst.msk [vmem:[%s1916_s2 + $0x74] sm:$0xf] %vm783_vm1, %v748_v4  ;;  %v604_v4 = vadd.f32 %v603_v43, %v602_v53  ;;  %v409_v9 = vadd.f32 %v408_v45, %v407_v54  ;;  %v1566_v43 = vpop.f32.mrf.mxu2  ;;  %v1568_v45 = vpop.f32.mrf.mxu3  ;;  %v416_v54 = vsel %vm384_vm2, %v1115_v22, 0.0  ;;  %v418_v22 = vsel %vm384_vm2, %v1141_v33, 0.0 }
  0xef   :  { %v613_v10 = vsel %vm384_vm2, %v534_v35, 0.0 }
  0xf0   :  { %v606_v20 = vadd.f32 %v605_v58, %v604_v4  ;;  %v411_v21 = vadd.f32 %v410_v63, %v409_v9  ;;  %v536_v4 = vmul.f32 %v1157_v44, %v1157_v44 }
  0xf2   :  { %v259_v23 = vpop.f32.mrf.mxu0  ;;  %v608_v27 = vadd.f32 %v607_v49, %v606_v20  ;;  %v617_v47 = vsel %vm384_vm2, %v536_v4, 0.0 }
  0xf3   :  { %v1514_v40 = vpop.f32.mrf.mxu1  ;;  %v733_v46 = vpack.c.bf16 %v259_v23, %v259_v23  ;;  %v532_v0 = vmul.f32 %v259_v23, %v259_v23  ;;  %v412_v38 = vsel %vm384_vm2, %v259_v23, 0.0 }
  0xf4   :  { %v749_v1 = vpack.c.bf16 %v1514_v40, %v1514_v40  ;;  %v413_v28 = vadd.f32 %v412_v38, %v411_v21  ;;  %v420_v38 = vsel %vm384_vm2, %v1157_v44, 0.0 }
  0xf5   :  { %798 = vst.msk [vmem:[%s1916_s2 + $0x38] sm:$0xf] %vm783_vm1, %v733_v46  ;;  %v609_v25 = vsel %vm384_vm2, %v532_v0, 0.0 }
  0xf6   :  { %814 = vst.msk [vmem:[%s1916_s2 + $0x78] sm:$0xf] %vm783_vm1, %v749_v1  ;;  %v610_v8 = vadd.f32 %v609_v25, %v608_v27  ;;  %v535_v1 = vmul.f32 %v1141_v33, %v1141_v33  ;;  %v422_v33 = vsel %vm384_vm2, %v1178_v56, 0.0  ;;  %v538_v25 = vmul.f32 %v1200_v3, %v1200_v3 }
  0xf7   :  { %v763_v27 = vpack.c.bf16 %v1566_v43, %v1566_v43  ;;  %v424_v56 = vsel %vm384_vm2, %v1200_v3, 0.0 }
  0xf8   :  { %v615_v49 = vsel %vm384_vm2, %v535_v1, 0.0  ;;  %v621_v3 = vsel %vm384_vm2, %v538_v25, 0.0  ;;  %v540_v1 = vmul.f32 %v1259_v24, %v1259_v24  ;;  %v543_v25 = vmul.f32 %v1347_v48, %v1347_v48 }
  0xf9   :  { %828 = vst.msk [vmem:[%s1916_s2 + $0xb0] sm:$0xf] %vm783_vm1, %v763_v27 }
  0xfa   :  { %v261_v16 = vpop.f32.mrf.mxu0 }
  0xfb   :  { %v1557_v31 = vpop.f32.mrf.mxu1  ;;  %v414_v36 = vsel %vm384_vm2, %v261_v16, 0.0  ;;  %v533_v37 = vmul.f32 %v261_v16, %v261_v16  ;;  %v734_v23 = vpack.c.bf16 %v261_v16, %v261_v16  ;;  %v1604_v16 = vpop.f32.mrf.mxu3 }
  0xfc   :  { %v415_v46 = vadd.f32 %v414_v36, %v413_v28  ;;  %v750_v53 = vpack.c.bf16 %v1557_v31, %v1557_v31  ;;  %v1602_v28 = vpop.f32.mrf.mxu2  ;;  %v775_v36 = vpack.c.bf16 %v1568_v45, %v1568_v45 }
  0xfd   :  { %v611_v58 = vsel %vm384_vm2, %v533_v37, 0.0  ;;  %799 = vst.msk [vmem:[%s1916_s2 + $0x3c] sm:$0xf] %vm783_vm1, %v734_v23  ;;  %v619_v37 = vsel %vm384_vm2, %v537_v13, 0.0  ;;  %v539_v23 = vmul.f32 %v1235_v17, %v1235_v17 }
  0xfe   :  { %v417_v63 = vadd.f32 %v416_v54, %v415_v46  ;;  %v612_v0 = vadd.f32 %v611_v58, %v610_v8  ;;  %815 = vst.msk [vmem:[%s1916_s2 + $0x7c] sm:$0xf] %vm783_vm1, %v750_v53  ;;  %v764_v8 = vpack.c.bf16 %v1602_v28, %v1602_v28  ;;  %v426_v54 = vsel %vm384_vm2, %v1235_v17, 0.0 }
  0xff   :  { %840 = vst.msk [vmem:[%s1916_s2 + $0xe0] sm:$0xf] %vm783_vm1, %v775_v36  ;;  %v776_v58 = vpack.c.bf16 %v1604_v16, %v1604_v16  ;;  %v541_v17 = vmul.f32 %v1283_v30, %v1283_v30  ;;  %v544_v36 = vmul.f32 %v1375_v57, %v1375_v57 }
 0x100   :  { %v419_v9 = vadd.f32 %v418_v22, %v417_v63  ;;  %v614_v12 = vadd.f32 %v613_v10, %v612_v0  ;;  %829 = vst.msk [vmem:[%s1916_s2 + $0xb4] sm:$0xf] %vm783_vm1, %v764_v8  ;;  %v623_v10 = vsel %vm384_vm2, %v539_v23, 0.0  ;;  %v428_v22 = vsel %vm384_vm2, %v1259_v24, 0.0 }
 0x101   :  { %841 = vst.msk [vmem:[%s1916_s2 + $0xe4] sm:$0xf] %vm783_vm1, %v776_v58  ;;  %v631_v23 = vsel %vm384_vm2, %v543_v25, 0.0  ;;  %v545_v8 = vmul.f32 %v1409_v2, %v1409_v2  ;;  %v444_v25 = vsel %vm384_vm2, %v1514_v40, 0.0 }
 0x102   :  { %v421_v20 = vadd.f32 %v420_v38, %v419_v9  ;;  %v616_v21 = vadd.f32 %v615_v49, %v614_v12  ;;  %v625_v12 = vsel %vm384_vm2, %v540_v1, 0.0  ;;  %v430_v49 = vsel %vm384_vm2, %v1283_v30, 0.0 }
 0x103   :  { %v542_v38 = vmul.f32 %v1311_v39, %v1311_v39  ;;  %v1650_v24 = vpop.f32.mrf.mxu3 }
 0x104   :  { %v423_v44 = vadd.f32 %v422_v33, %v421_v20  ;;  %v618_v35 = vadd.f32 %v617_v47, %v616_v21  ;;  %v1648_v13 = vpop.f32.mrf.mxu2  ;;  %v627_v47 = vsel %vm384_vm2, %v541_v17, 0.0  ;;  %v432_v33 = vsel %vm384_vm2, %v1311_v39, 0.0 }
 0x105   :  { %v629_v30 = vsel %vm384_vm2, %v542_v38, 0.0  ;;  %v436_v39 = vsel %vm384_vm2, %v1375_v57, 0.0  ;;  %v765_v1 = vpack.c.bf16 %v1648_v13, %v1648_v13  ;;  %v547_v17 = vmul.f32 %v1479_v52, %v1479_v52 }
 0x106   :  { %v425_v46 = vadd.f32 %v424_v56, %v423_v44  ;;  %v620_v53 = vadd.f32 %v619_v37, %v618_v35  ;;  %v434_v35 = vsel %vm384_vm2, %v1347_v48, 0.0  ;;  %v438_v48 = vsel %vm384_vm2, %v1409_v2, 0.0 }
 0x107   :  { %v440_v2 = vsel %vm384_vm2, %v1425_v11, 0.0  ;;  %830 = vst.msk [vmem:[%s1916_s2 + $0xb8] sm:$0xf] %vm783_vm1, %v765_v1  ;;  %v548_v38 = vmul.f32 %v1514_v40, %v1514_v40 }
 0x108   :  { %v427_v63 = vadd.f32 %v426_v54, %v425_v46  ;;  %v622_v0 = vadd.f32 %v621_v3, %v620_v53  ;;  %v633_v3 = vsel %vm384_vm2, %v544_v36, 0.0  ;;  %v546_v54 = vmul.f32 %v1425_v11, %v1425_v11 }
 0x109   :  { %v446_v36 = vsel %vm384_vm2, %v1557_v31, 0.0 }
 0x10a   :  { %v624_v4 = vadd.f32 %v623_v10, %v622_v0  ;;  %v429_v9 = vadd.f32 %v428_v22, %v427_v63  ;;  %v777_v10 = vpack.c.bf16 %v1650_v24, %v1650_v24  ;;  %v635_v22 = vsel %vm384_vm2, %v545_v8, 0.0 }
 0x10b   :  { %v1676_v63 = vpop.f32.mrf.mxu3  ;;  %v637_v11 = vsel %vm384_vm2, %v546_v54, 0.0 }
 0x10c   :  { %v431_v20 = vadd.f32 %v430_v49, %v429_v9  ;;  %v626_v21 = vadd.f32 %v625_v12, %v624_v4  ;;  %v1674_v58 = vpop.f32.mrf.mxu2  ;;  %842 = vst.msk [vmem:[%s1916_s2 + $0xe8] sm:$0xf] %vm783_vm1, %v777_v10  ;;  %v442_v49 = vsel %vm384_vm2, %v1479_v52, 0.0  ;;  %v549_v52 = vmul.f32 %v1557_v31, %v1557_v31 }
 0x10d   :  { %v766_v4 = vpack.c.bf16 %v1674_v58, %v1674_v58  ;;  %v552_v31 = vmul.f32 %v1239_v19, %v1239_v19 }
 0x10e   :  { %v433_v27 = vadd.f32 %v432_v33, %v431_v20  ;;  %v628_v44 = vadd.f32 %v627_v47, %v626_v21  ;;  %v778_v20 = vpack.c.bf16 %v1676_v63, %v1676_v63  ;;  %v639_v33 = vsel %vm384_vm2, %v547_v17, 0.0 }
 0x10f   :  { %831 = vst.msk [vmem:[%s1916_s2 + $0xbc] sm:$0xf] %vm783_vm1, %v766_v4  ;;  %v643_v8 = vsel %vm384_vm2, %v549_v52, 0.0  ;;  %v554_v17 = vmul.f32 %v1287_v32, %v1287_v32 }
 0x110   :  { %v435_v37 = vadd.f32 %v434_v35, %v433_v27  ;;  %v630_v56 = vadd.f32 %v629_v30, %v628_v44  ;;  %843 = vst.msk [vmem:[%s1916_s2 + $0xec] sm:$0xf] %vm783_vm1, %v778_v20  ;;  %v550_v30 = vmul.f32 %v1181_v60, %v1181_v60  ;;  %v641_v35 = vsel %vm384_vm2, %v548_v38, 0.0 }
 0x111   :  { %v555_v38 = vmul.f32 %v1319_v41, %v1319_v41 }
 0x112   :  { %v437_v46 = vadd.f32 %v436_v39, %v435_v37  ;;  %v632_v53 = vadd.f32 %v631_v23, %v630_v56  ;;  %v448_v23 = vsel %vm384_vm2, %v1181_v60, 0.0  ;;  %v551_v39 = vmul.f32 %v1203_v7, %v1203_v7 }
 0x113   :  { %v1720_v37 = vpop.f32.mrf.mxu3  ;;  %v452_v60 = vsel %vm384_vm2, %v1239_v19, 0.0 }
 0x114   :  { %v439_v57 = vadd.f32 %v438_v48, %v437_v46  ;;  %v634_v0 = vadd.f32 %v633_v3, %v632_v53  ;;  %v645_v3 = vsel %vm384_vm2, %v550_v30, 0.0  ;;  %v450_v48 = vsel %vm384_vm2, %v1203_v7, 0.0 }
 0x115   :  { %v454_v7 = vsel %vm384_vm2, %v1263_v26, 0.0  ;;  %v779_v4 = vpack.c.bf16 %v1720_v37, %v1720_v37  ;;  %v557_v30 = vmul.f32 %v1383_v59, %v1383_v59 }
 0x116   :  { %v441_v9 = vadd.f32 %v440_v2, %v439_v57  ;;  %v636_v12 = vadd.f32 %v635_v22, %v634_v0  ;;  %v647_v57 = vsel %vm384_vm2, %v551_v39, 0.0  ;;  %v553_v0 = vmul.f32 %v1263_v26, %v1263_v26 }
 0x117   :  { %v649_v2 = vsel %vm384_vm2, %v552_v31, 0.0  ;;  %844 = vst.msk [vmem:[%s1916_s2 + $0xf0] sm:$0xf] %vm783_vm1, %v779_v4 }
 0x118   :  { %v638_v21 = vadd.f32 %v637_v11, %v636_v12  ;;  %v443_v47 = vadd.f32 %v442_v49, %v441_v9  ;;  %v651_v11 = vsel %vm384_vm2, %v553_v0, 0.0  ;;  %v456_v49 = vsel %vm384_vm2, %v1287_v32, 0.0 }
 0x119   :  { %v556_v32 = vmul.f32 %v1351_v50, %v1351_v50  ;;  %v561_v0 = vmul.f32 %v1518_v55, %v1518_v55 }
 0x11a   :  { %v640_v27 = vadd.f32 %v639_v33, %v638_v21  ;;  %v445_v44 = vadd.f32 %v444_v25, %v443_v47  ;;  %v653_v47 = vsel %vm384_vm2, %v554_v17, 0.0  ;;  %v458_v33 = vsel %vm384_vm2, %v1319_v41, 0.0 }
 0x11b   :  { %v1744_v9 = vpop.f32.mrf.mxu3 }
 0x11c   :  { %v642_v40 = vadd.f32 %v641_v35, %v640_v27  ;;  %v447_v56 = vadd.f32 %v446_v36, %v445_v44  ;;  %v780_v26 = vpack.c.bf16 %v1744_v9, %v1744_v9  ;;  %v655_v27 = vsel %vm384_vm2, %v555_v38, 0.0 }
 0x11d   :  { %v460_v44 = vsel %vm384_vm2, %v1351_v50, 0.0  ;;  %v657_v36 = vsel %vm384_vm2, %v556_v32, 0.0  ;;  %v464_v50 = vsel %vm384_vm2, %v1411_v5, 0.0 }
 0x11e   :  { %v449_v46 = vadd.f32 %v448_v23, %v447_v56  ;;  %v644_v53 = vadd.f32 %v643_v8, %v642_v40  ;;  %845 = vst.msk [vmem:[%s1916_s2 + $0xf4] sm:$0xf] %vm783_vm1, %v780_v26  ;;  %v462_v40 = vsel %vm384_vm2, %v1383_v59, 0.0  ;;  %v558_v56 = vmul.f32 %v1411_v5, %v1411_v5 }
 0x11f   :  { %v466_v59 = vsel %vm384_vm2, %v1429_v14, 0.0  ;;  %v468_v5 = vsel %vm384_vm2, %v1490_v62, 0.0 }
 0x120   :  { %v451_v54 = vadd.f32 %v450_v48, %v449_v46  ;;  %v646_v1 = vadd.f32 %v645_v3, %v644_v53  ;;  %v659_v46 = vsel %vm384_vm2, %v557_v30, 0.0  ;;  %v559_v53 = vmul.f32 %v1429_v14, %v1429_v14 }
 0x121   :  { %v661_v31 = vsel %vm384_vm2, %v558_v56, 0.0  ;;  %v470_v14 = vsel %vm384_vm2, %v1518_v55, 0.0 }
 0x122   :  { %v453_v10 = vadd.f32 %v452_v60, %v451_v54  ;;  %v648_v22 = vadd.f32 %v647_v57, %v646_v1  ;;  %v560_v54 = vmul.f32 %v1490_v62, %v1490_v62  ;;  %v663_v60 = vsel %vm384_vm2, %v559_v53, 0.0 }
 0x123   :  { %v1776_v23 = vpop.f32.mrf.mxu3 }
 0x124   :  { %v455_v12 = vadd.f32 %v454_v7, %v453_v10  ;;  %v650_v19 = vadd.f32 %v649_v2, %v648_v22  ;;  %v665_v2 = vsel %vm384_vm2, %v560_v54, 0.0  ;;  %v562_v7 = vmul.f32 %v1566_v43, %v1566_v43 }
 0x125   :  { %v781_v17 = vpack.c.bf16 %v1776_v23, %v1776_v23 }
 0x126   :  { %v457_v20 = vadd.f32 %v456_v49, %v455_v12  ;;  %v652_v21 = vadd.f32 %v651_v11, %v650_v19  ;;  %v667_v19 = vsel %vm384_vm2, %v561_v0, 0.0  ;;  %v472_v11 = vsel %vm384_vm2, %v1566_v43, 0.0 }
 0x127   :  { %v563_v49 = vmul.f32 %v1602_v28, %v1602_v28  ;;  %846 = vst.msk [vmem:[%s1916_s2 + $0xf8] sm:$0xf] %vm783_vm1, %v781_v17  ;;  %v564_v43 = vmul.f32 %v1648_v13, %v1648_v13 }
 0x128   :  { %v459_v25 = vadd.f32 %v458_v33, %v457_v20  ;;  %v654_v52 = vadd.f32 %v653_v47, %v652_v21  ;;  %v669_v20 = vsel %vm384_vm2, %v562_v7, 0.0  ;;  %v474_v21 = vsel %vm384_vm2, %v1602_v28, 0.0 }
 0x129   :  { %v671_v32 = vsel %vm384_vm2, %v563_v49, 0.0  ;;  %v673_v30 = vsel %vm384_vm2, %v564_v43, 0.0  ;;  %v572_v7 = vmul.f32 %v1492_v15, %v1492_v15  ;;  %v575_v43 = vmul.f32 %v1604_v16, %v1604_v16 }
 0x12a   :  { %v656_v35 = vadd.f32 %v655_v27, %v654_v52  ;;  %v461_v41 = vadd.f32 %v460_v44, %v459_v25  ;;  %v476_v25 = vsel %vm384_vm2, %v1648_v13, 0.0  ;;  %v565_v52 = vmul.f32 %v1674_v58, %v1674_v58 }
 0x12b   :  { %v1800_v4 = vpop.f32.mrf.mxu3  ;;  %v566_v44 = vmul.f32 %v1289_v34, %v1289_v34  ;;  %v567_v13 = vmul.f32 %v1321_v42, %v1321_v42 }
 0x12c   :  { %v463_v39 = vadd.f32 %v462_v40, %v461_v41  ;;  %v658_v8 = vadd.f32 %v657_v36, %v656_v35  ;;  %v782_v55 = vpack.c.bf16 %v1800_v4, %v1800_v4  ;;  %v478_v35 = vsel %vm384_vm2, %v1674_v58, 0.0 }
 0x12d   :  { %v480_v40 = vsel %vm384_vm2, %v1289_v34, 0.0  ;;  %v675_v56 = vsel %vm384_vm2, %v565_v52, 0.0  ;;  %v568_v58 = vmul.f32 %v1353_v51, %v1353_v51  ;;  %v484_v34 = vsel %vm384_vm2, %v1353_v51, 0.0 }
 0x12e   :  { %v465_v3 = vadd.f32 %v464_v50, %v463_v39  ;;  %v660_v48 = vadd.f32 %v659_v46, %v658_v8  ;;  %847 = vst.msk [vmem:[%s1916_s2 + $0xfc] sm:$0xf] %vm783_vm1, %v782_v55  ;;  %v677_v46 = vsel %vm384_vm2, %v566_v44, 0.0  ;;  %v482_v50 = vsel %vm384_vm2, %v1321_v42, 0.0 }
 0x12f   :  { %v486_v42 = vsel %vm384_vm2, %v1385_v61, 0.0  ;;  %v488_v51 = vsel %vm384_vm2, %v1413_v6, 0.0  ;;  %v689_v55 = vsel %vm384_vm2, %v572_v7, 0.0  ;;  %v577_v44 = vmul.f32 %v1676_v63, %v1676_v63 }
 0x130   :  { %v467_v1 = vadd.f32 %v466_v59, %v465_v3  ;;  %v662_v57 = vadd.f32 %v661_v31, %v660_v48  ;;  %v679_v48 = vsel %vm384_vm2, %v567_v13, 0.0  ;;  %v569_v31 = vmul.f32 %v1385_v61, %v1385_v61 }
 0x131   :  { %v490_v61 = vsel %vm384_vm2, %v1431_v18, 0.0 }
 0x132   :  { %v469_v10 = vadd.f32 %v468_v5, %v467_v1  ;;  %v664_v22 = vadd.f32 %v663_v60, %v662_v57  ;;  %v681_v1 = vsel %vm384_vm2, %v568_v58, 0.0  ;;  %v570_v57 = vmul.f32 %v1413_v6, %v1413_v6 }
 0x133   :  { %v683_v0 = vsel %vm384_vm2, %v569_v31, 0.0  ;;  %v492_v6 = vsel %vm384_vm2, %v1492_v15, 0.0  ;;  %v496_v15 = vsel %vm384_vm2, %v1568_v45, 0.0  ;;  %v580_v58 = vmul.f32 %v1776_v23, %v1776_v23 }
 0x134   :  { %v471_v12 = vadd.f32 %v470_v14, %v469_v10  ;;  %v666_v62 = vadd.f32 %v665_v2, %v664_v22  ;;  %v571_v10 = vmul.f32 %v1431_v18, %v1431_v18  ;;  %v685_v14 = vsel %vm384_vm2, %v570_v57, 0.0 }
 0x135   :  { %v494_v18 = vsel %vm384_vm2, %v1520_v29, 0.0 }
 0x136   :  { %v668_v38 = vadd.f32 %v667_v19, %v666_v62  ;;  %v473_v26 = vadd.f32 %v472_v11, %v471_v12  ;;  %v687_v62 = vsel %vm384_vm2, %v571_v10, 0.0  ;;  %v573_v19 = vmul.f32 %v1520_v29, %v1520_v29 }
 0x137   :  { %v498_v29 = vsel %vm384_vm2, %v1604_v16, 0.0  ;;  %v502_v16 = vsel %vm384_vm2, %v1676_v63, 0.0  ;;  %v506_v63 = vsel %vm384_vm2, %v1744_v9, 0.0 }
 0x138   :  { %v670_v47 = vadd.f32 %v669_v20, %v668_v38  ;;  %v475_v33 = vadd.f32 %v474_v21, %v473_v26  ;;  %v574_v38 = vmul.f32 %v1568_v45, %v1568_v45  ;;  %v691_v21 = vsel %vm384_vm2, %v573_v19, 0.0 }
 0x139   :  { %v500_v45 = vsel %vm384_vm2, %v1650_v24, 0.0 }
 0x13a   :  { %v672_v27 = vadd.f32 %v671_v32, %v670_v47  ;;  %v477_v28 = vadd.f32 %v476_v25, %v475_v33  ;;  %v693_v32 = vsel %vm384_vm2, %v574_v38, 0.0  ;;  %v576_v25 = vmul.f32 %v1650_v24, %v1650_v24 }
 0x13b   :  { %v504_v24 = vsel %vm384_vm2, %v1720_v37, 0.0 }
 0x13c   :  { %v674_v41 = vadd.f32 %v673_v30, %v672_v27  ;;  %v479_v36 = vadd.f32 %v478_v35, %v477_v28  ;;  %v695_v28 = vsel %vm384_vm2, %v575_v43, 0.0 }
 0x13e   :  { %v481_v39 = vadd.f32 %v480_v40, %v479_v36  ;;  %v676_v8 = vadd.f32 %v675_v56, %v674_v41  ;;  %v697_v41 = vsel %vm384_vm2, %v576_v25, 0.0  ;;  %v578_v36 = vmul.f32 %v1720_v37, %v1720_v37 }
 0x13f   :  { %v699_v56 = vsel %vm384_vm2, %v577_v44, 0.0  ;;  %v508_v37 = vsel %vm384_vm2, %v1776_v23, 0.0 }
 0x140   :  { %v483_v53 = vadd.f32 %v482_v50, %v481_v39  ;;  %v678_v3 = vadd.f32 %v677_v46, %v676_v8  ;;  %v579_v39 = vmul.f32 %v1744_v9, %v1744_v9  ;;  %v701_v50 = vsel %vm384_vm2, %v578_v36, 0.0 }
 0x141   :  { %v510_v9 = vsel %vm384_vm2, %v1800_v4, 0.0 }
 0x142   :  { %v485_v59 = vadd.f32 %v484_v34, %v483_v53  ;;  %v680_v54 = vadd.f32 %v679_v48, %v678_v3  ;;  %v703_v48 = vsel %vm384_vm2, %v579_v39, 0.0  ;;  %v581_v34 = vmul.f32 %v1800_v4, %v1800_v4 }
 0x144   :  { %v487_v60 = vadd.f32 %v486_v42, %v485_v59  ;;  %v682_v5 = vadd.f32 %v681_v1, %v680_v54  ;;  %v705_v54 = vsel %vm384_vm2, %v580_v58, 0.0  ;;  %v707_v57 = vsel %vm384_vm2, %v581_v34, 0.0 }
 0x146   :  { %v489_v22 = vadd.f32 %v488_v51, %v487_v60  ;;  %v684_v2 = vadd.f32 %v683_v0, %v682_v5 }
 0x148   :  { %v491_v17 = vadd.f32 %v490_v61, %v489_v22  ;;  %v686_v12 = vadd.f32 %v685_v14, %v684_v2 }
 0x14a   :  { %v688_v11 = vadd.f32 %v687_v62, %v686_v12  ;;  %v493_v49 = vadd.f32 %v492_v6, %v491_v17 }
 0x14c   :  { %v495_v26 = vadd.f32 %v494_v18, %v493_v49  ;;  %v690_v20 = vadd.f32 %v689_v55, %v688_v11 }
 0x14e   :  { %v497_v47 = vadd.f32 %v496_v15, %v495_v26  ;;  %v692_v33 = vadd.f32 %v691_v21, %v690_v20 }
 0x150   :  { %v499_v52 = vadd.f32 %v498_v29, %v497_v47  ;;  %v694_v27 = vadd.f32 %v693_v32, %v692_v33 }
 0x152   :  { %v501_v30 = vadd.f32 %v500_v45, %v499_v52  ;;  %v696_v35 = vadd.f32 %v695_v28, %v694_v27 }
 0x154   :  { %v503_v40 = vadd.f32 %v502_v16, %v501_v30  ;;  %v698_v13 = vadd.f32 %v697_v41, %v696_v35 }
 0x156   :  { %v700_v8 = vadd.f32 %v699_v56, %v698_v13  ;;  %v505_v46 = vadd.f32 %v504_v24, %v503_v40 }
 0x158   :  { %v702_v53 = vadd.f32 %v701_v50, %v700_v8  ;;  %v507_v3 = vadd.f32 %v506_v63, %v505_v46 }
 0x15a   :  { %v704_v31 = vadd.f32 %v703_v48, %v702_v53  ;;  %v509_v59 = vadd.f32 %v508_v37, %v507_v3 }
 0x15c   :  { %v706_v1 = vadd.f32 %v705_v54, %v704_v31  ;;  %v511_v42 = vadd.f32 %v510_v9, %v509_v59 }
 0x15e   :  { %v512_v60 = vrot.slane %v511_v42, 4  ;;  %v708_v5 = vadd.f32 %v707_v57, %v706_v1 }
 0x160   :  { %v513_v0 = vadd.f32 %v512_v60, %v511_v42  ;;  %v709_v51 = vrot.slane %v708_v5, 4 }
 0x162   :  { %v514_v10 = vrot.slane %v513_v0, 2  ;;  %v710_v23 = vadd.f32 %v709_v51, %v708_v5 }
 0x164   :  { %v515_v22 = vadd.f32 %v514_v10, %v513_v0  ;;  %v711_v2 = vrot.slane %v710_v23, 2 }
 0x166   :  { %v516_v14 = vrot.slane %v515_v22, 1  ;;  %v712_v61 = vadd.f32 %v711_v2, %v710_v23 }
 0x168   :  { %v713_v7 = vrot.slane %v712_v61, 1  ;;  %v517_v17 = vadd.f32 %v516_v14, %v515_v22 }
 0x16a   :  { %v714_v12 = vadd.f32 %v713_v7, %v712_v61 }
 0x16c   :  { %v716_v4 = vsel %vm715_vm3, %v517_v17, %v714_v12 }
 0x16d   :  { %718 = vst.msk [vmem:[%s1917_s3] sm:$0x3] %vm717_vm4, %v716_v4 }

// kernel: bottleneck_forward.6
= control target key start
LH: loop header
LB: loop body
LE: loop exit
PB: predicated region body
PF: predicated region fallthrough
CT: control target
= control target key end

     0   :  { %vm478_vm0 = vcmask 1041408   ;;  %vm381_vm1 = vcmask 31744   ;;  %vm1050_vm2 = vcmask 125952   ;;  %vm651_vm3 = vcmask 130048   ;;  %s2389_s3 = inlined_call_operand.vmem [shape: bf16[4,16], index: 3, kind: input, shape index: {}]   ;;  %s2390_s0 = inlined_call_operand.vmem [shape: bf16[512,4], index: 0, kind: input, shape index: {}]   ;;  %s2391_s1 = inlined_call_operand.vmem [shape: f32[1,4], index: 1, kind: input, shape index: {}]   ;;  %s2392_s2 = inlined_call_operand.vmem [shape: f32[1,4], index: 2, kind: input, shape index: {}]   ;;  %s2393_s4 = inlined_call_operand.vmem [shape: bf16[512,16], index: 4, kind: output, shape index: {0}]   ;;  %s2394_s5 = inlined_call_operand.vmem [shape: f32[1,2,16], index: 5, kind: output, shape index: {1}]  }
   0x1   :  { %v380_v0 = vld [vmem:[%s2389_s3] sm:$0x3]  ;;  %v1283_v10 = vld [vmem:[%s2390_s0 + $0x8] sm:$0xff]   ;;  %v1284_v41 = vld [vmem:[%s2390_s0 + $0x10] sm:$0xff]   ;;  %vm982_vm4 = vcmask 1040384   ;;  %vm984_vm5 = vcmask 123904  }
   0x2   :  { %v1156_v1 = vld [vmem:[%s2390_s0] sm:$0xff]   ;;  %v480_v2 = vsel %vm478_vm0, %v380_v0, 0  ;;  %v1161_v17 = vunpack.c.l.bf16 %v1283_v10  ;;  %v1162_v18 = vunpack.c.h.bf16 %v1283_v10  ;;  %v1291_v23 = vld [vmem:[%s2390_s0 + $0x48] sm:$0xff]   ;;  %v1165_v48 = vunpack.c.l.bf16 %v1284_v41  ;;  %v1292_v54 = vld [vmem:[%s2390_s0 + $0x50] sm:$0xff]  }
   0x3   :  { %v1157_v3 = vunpack.c.l.bf16 %v1156_v1  ;;  %v1158_v4 = vunpack.c.h.bf16 %v1156_v1  ;;  %v1358_v5 = vld [vmem:[%s2391_s1] ss:$0 sm:$0xff]  ;;  %489 = vmatpush.bf16.msra.mxu0 %v480_v2  ;;  %1314 = vmatpush.bf16.msra.mxu1 %v480_v2  ;;  %v1193_v27 = vunpack.c.l.bf16 %v1291_v23  ;;  %v1194_v28 = vunpack.c.h.bf16 %v1291_v23 }
   0x4   :  { %v1363_v6 = vld [vmem:[%s2392_s2] ss:$0 sm:$0xff]  ;;  %1315 = vmatpush.bf16.msra.mxu2 %v480_v2  ;;  %1316 = vmatpush.bf16.msra.mxu3 %v480_v2  ;;  %v154_v29 = vmul.f32 %v1358_v5, %v1161_v17  ;;  %v155_v30 = vmul.f32 %v1358_v5, %v1162_v18  ;;  %v1166_v50 = vunpack.c.h.bf16 %v1284_v41  ;;  %v1197_v57 = vunpack.c.l.bf16 %v1292_v54 }
   0x5   :  { %v1290_v7 = vld [vmem:[%s2390_s0 + $0x40] sm:$0xff]   ;;  %v152_v8 = vmul.f32 %v1358_v5, %v1157_v3  ;;  %v153_v9 = vmul.f32 %v1358_v5, %v1158_v4  ;;  %v170_v32 = vmul.f32 %v1358_v5, %v1193_v27  ;;  %v171_v33 = vmul.f32 %v1358_v5, %v1194_v28  ;;  %v1299_v4 = vld [vmem:[%s2390_s0 + $0x88] sm:$0xff]  }
   0x6   :  { %v1189_v11 = vunpack.c.l.bf16 %v1290_v7  ;;  %v1190_v12 = vunpack.c.h.bf16 %v1290_v7  ;;  %v222_v34 = vadd.f32 %v1363_v6, %v154_v29  ;;  %v223_v35 = vadd.f32 %v1363_v6, %v155_v30  ;;  %v1298_v38 = vld [vmem:[%s2390_s0 + $0x80] sm:$0xff]  }
   0x7   :  { %v220_v13 = vadd.f32 %v1363_v6, %v152_v8  ;;  %v221_v14 = vadd.f32 %v1363_v6, %v153_v9  ;;  %v238_v36 = vadd.f32 %v1363_v6, %v170_v32  ;;  %v239_v37 = vadd.f32 %v1363_v6, %v171_v33  ;;  %v1285_v9 = vld [vmem:[%s2390_s0 + $0x18] sm:$0xff]  }
   0x8   :  { %v168_v15 = vmul.f32 %v1358_v5, %v1189_v11  ;;  %v169_v16 = vmul.f32 %v1358_v5, %v1190_v12  ;;  %v286_v39 = vmax.f32 %v222_v34, 0.0  ;;  %v287_v40 = vmax.f32 %v223_v35, 0.0 }
   0x9   :  { %v284_v19 = vmax.f32 %v220_v13, 0.0  ;;  %v285_v20 = vmax.f32 %v221_v14, 0.0  ;;  %v1221_v42 = vunpack.c.l.bf16 %v1298_v38  ;;  %v1222_v43 = vunpack.c.h.bf16 %v1298_v38  ;;  %v1300_v38 = vld [vmem:[%s2390_s0 + $0x90] sm:$0xff]  }
   0xa   :  { %v236_v21 = vadd.f32 %v1363_v6, %v168_v15  ;;  %v237_v22 = vadd.f32 %v1363_v6, %v169_v16  ;;  %v302_v44 = vmax.f32 %v238_v36, 0.0  ;;  %v303_v45 = vmax.f32 %v239_v37, 0.0 }
   0xb   :  { %v348_v24 = vpack.c.bf16 %v285_v20, %v284_v19  ;;  %v184_v46 = vmul.f32 %v1358_v5, %v1221_v42  ;;  %v185_v47 = vmul.f32 %v1358_v5, %v1222_v43  ;;  %v349_v49 = vpack.c.bf16 %v287_v40, %v286_v39  ;;  %v1306_v39 = vld [vmem:[%s2390_s0 + $0xc0] sm:$0xff]  }
   0xc   :  { %v300_v25 = vmax.f32 %v236_v21, 0.0  ;;  %v301_v26 = vmax.f32 %v237_v22, 0.0  ;;  %v357_v53 = vpack.c.bf16 %v303_v45, %v302_v44  ;;  %v1198_v58 = vunpack.c.h.bf16 %v1292_v54  ;;  %v1293_v22 = vld [vmem:[%s2390_s0 + $0x58] sm:$0xff]   ;;  %v1286_v40 = vld [vmem:[%s2390_s0 + $0x20] sm:$0xff]  }
   0xd   :  { %1123 = vmatmul.msk.bf16.vlgmr.msra.gmra.mxu0 %vm381_vm1, %v348_v24  ;;  %v252_v51 = vadd.f32 %v1363_v6, %v184_v46  ;;  %v253_v52 = vadd.f32 %v1363_v6, %v185_v47  ;;  %v156_v59 = vmul.f32 %v1358_v5, %v1165_v48  ;;  %v157_v60 = vmul.f32 %v1358_v5, %v1166_v50 }
   0xe   :  { %v356_v31 = vpack.c.bf16 %v301_v26, %v300_v25  ;;  %v172_v62 = vmul.f32 %v1358_v5, %v1197_v57  ;;  %v173_v63 = vmul.f32 %v1358_v5, %v1198_v58  ;;  %v1225_v10 = vunpack.c.l.bf16 %v1299_v4 }
   0xf   :  { %v316_v55 = vmax.f32 %v252_v51, 0.0  ;;  %v317_v56 = vmax.f32 %v253_v52, 0.0  ;;  %v224_v0 = vadd.f32 %v1363_v6, %v156_v59  ;;  %v225_v1 = vadd.f32 %v1363_v6, %v157_v60  ;;  %v1294_v59 = vld [vmem:[%s2390_s0 + $0x60] sm:$0xff]  }
  0x10   :  { %1131 = vmatmul.msk.bf16.vlgmr.msra.gmra.mxu1 %vm381_vm1, %v356_v31  ;;  %v240_v2 = vadd.f32 %v1363_v6, %v172_v62  ;;  %v241_v3 = vadd.f32 %v1363_v6, %v173_v63  ;;  %v1226_v11 = vunpack.c.h.bf16 %v1299_v4  ;;  %v186_v14 = vmul.f32 %v1358_v5, %v1225_v10 }
  0x11   :  { %v364_v61 = vpack.c.bf16 %v317_v56, %v316_v55  ;;  %v288_v7 = vmax.f32 %v224_v0, 0.0  ;;  %v289_v8 = vmax.f32 %v225_v1, 0.0  ;;  %v1169_v16 = vunpack.c.l.bf16 %v1285_v9 }
  0x12   :  { %v304_v12 = vmax.f32 %v240_v2, 0.0  ;;  %v305_v13 = vmax.f32 %v241_v3, 0.0  ;;  %v187_v15 = vmul.f32 %v1358_v5, %v1226_v11  ;;  %v1170_v17 = vunpack.c.h.bf16 %v1285_v9 }
  0x13   :  { %1139 = vmatmul.msk.bf16.vlgmr.msra.gmra.mxu2 %vm381_vm1, %v364_v61  ;;  %v350_v18 = vpack.c.bf16 %v289_v8, %v288_v7  ;;  %v254_v19 = vadd.f32 %v1363_v6, %v186_v14  ;;  %v1201_v25 = vunpack.c.l.bf16 %v1293_v22  ;;  %v1202_v26 = vunpack.c.h.bf16 %v1293_v22 }
  0x14   :  { %v255_v20 = vadd.f32 %v1363_v6, %v187_v15  ;;  %v358_v21 = vpack.c.bf16 %v305_v13, %v304_v12  ;;  %v158_v27 = vmul.f32 %v1358_v5, %v1169_v16  ;;  %v159_v28 = vmul.f32 %v1358_v5, %v1170_v17  ;;  %v1301_v16 = vld [vmem:[%s2390_s0 + $0x98] sm:$0xff]   ;;  %v1307_v17 = vld [vmem:[%s2390_s0 + $0xc8] sm:$0xff]  }
  0x15   :  { %v318_v23 = vmax.f32 %v254_v19, 0.0  ;;  %v174_v30 = vmul.f32 %v1358_v5, %v1201_v25  ;;  %v175_v31 = vmul.f32 %v1358_v5, %v1202_v26  ;;  %v1229_v41 = vunpack.c.l.bf16 %v1300_v38 }
  0x16   :  { %v319_v24 = vmax.f32 %v255_v20, 0.0  ;;  %v226_v32 = vadd.f32 %v1363_v6, %v158_v27  ;;  %v227_v33 = vadd.f32 %v1363_v6, %v159_v28  ;;  %v1230_v42 = vunpack.c.h.bf16 %v1300_v38 }
  0x17   :  { %v242_v34 = vadd.f32 %v1363_v6, %v174_v30  ;;  %v243_v35 = vadd.f32 %v1363_v6, %v175_v31  ;;  %v1253_v43 = vunpack.c.l.bf16 %v1306_v39  ;;  %v1254_v44 = vunpack.c.h.bf16 %v1306_v39 }
  0x18   :  { %v365_v29 = vpack.c.bf16 %v319_v24, %v318_v23  ;;  %v290_v36 = vmax.f32 %v226_v32, 0.0  ;;  %v291_v37 = vmax.f32 %v227_v33, 0.0  ;;  %v188_v47 = vmul.f32 %v1358_v5, %v1229_v41 }
  0x19   :  { %v306_v45 = vmax.f32 %v242_v34, 0.0  ;;  %v307_v46 = vmax.f32 %v243_v35, 0.0  ;;  %v189_v48 = vmul.f32 %v1358_v5, %v1230_v42  ;;  %v201_v50 = vmul.f32 %v1358_v5, %v1254_v44 }
  0x1a   :  { %v351_v51 = vpack.c.bf16 %v291_v37, %v290_v36  ;;  %v1173_v52 = vunpack.c.l.bf16 %v1286_v40  ;;  %v256_v54 = vadd.f32 %v1363_v6, %v188_v47  ;;  %v1205_v2 = vunpack.c.l.bf16 %v1294_v59  ;;  %v1295_v37 = vld [vmem:[%s2390_s0 + $0x68] sm:$0xff]  }
  0x1b   :  { %v257_v55 = vadd.f32 %v1363_v6, %v189_v48  ;;  %v269_v57 = vadd.f32 %v1363_v6, %v201_v50  ;;  %v359_v58 = vpack.c.bf16 %v307_v46, %v306_v45  ;;  %v1206_v3 = vunpack.c.h.bf16 %v1294_v59 }
  0x1c   :  { %v320_v60 = vmax.f32 %v256_v54, 0.0  ;;  %v160_v0 = vmul.f32 %v1358_v5, %v1173_v52  ;;  %v176_v8 = vmul.f32 %v1358_v5, %v1205_v2  ;;  %v1233_v19 = vunpack.c.l.bf16 %v1301_v16 }
  0x1d   :  { %1124 = vmatmul.msk.bf16.gmra.mxu0 %vm381_vm1, %v349_v49  ;;  %v200_v49 = vmul.f32 %v1358_v5, %v1253_v43  ;;  %v321_v61 = vmax.f32 %v257_v55, 0.0  ;;  %v333_v63 = vmax.f32 %v269_v57, 0.0  ;;  %v177_v9 = vmul.f32 %v1358_v5, %v1206_v3  ;;  %v1308_v57 = vld [vmem:[%s2390_s0 + $0xd0] sm:$0xff]  }
  0x1e   :  { %v228_v10 = vadd.f32 %v1363_v6, %v160_v0  ;;  %v244_v12 = vadd.f32 %v1363_v6, %v176_v8  ;;  %v1234_v20 = vunpack.c.h.bf16 %v1301_v16  ;;  %v1258_v22 = vunpack.c.h.bf16 %v1307_v17 }
  0x1f   :  { %v268_v56 = vadd.f32 %v1363_v6, %v200_v49  ;;  %v366_v4 = vpack.c.bf16 %v321_v61, %v320_v60  ;;  %v245_v13 = vadd.f32 %v1363_v6, %v177_v9  ;;  %v190_v25 = vmul.f32 %v1358_v5, %v1233_v19 }
  0x20   :  { %1132 = vmatmul.msk.bf16.gmra.mxu1 %vm381_vm1, %v357_v53  ;;  %v1174_v53 = vunpack.c.h.bf16 %v1286_v40  ;;  %v292_v14 = vmax.f32 %v228_v10, 0.0  ;;  %v308_v23 = vmax.f32 %v244_v12, 0.0  ;;  %v191_v26 = vmul.f32 %v1358_v5, %v1234_v20 }
  0x21   :  { %v332_v62 = vmax.f32 %v268_v56, 0.0  ;;  %v309_v24 = vmax.f32 %v245_v13, 0.0  ;;  %v203_v28 = vmul.f32 %v1358_v5, %v1258_v22  ;;  %v258_v32 = vadd.f32 %v1363_v6, %v190_v25  ;;  %v1302_v56 = vld [vmem:[%s2390_s0 + $0xa0] sm:$0xff]  }
  0x22   :  { %v161_v1 = vmul.f32 %v1358_v5, %v1174_v53  ;;  %v259_v33 = vadd.f32 %v1363_v6, %v191_v26  ;;  %v1209_v44 = vunpack.c.l.bf16 %v1295_v37  ;;  %v1210_v45 = vunpack.c.h.bf16 %v1295_v37 }
  0x23   :  { %1140 = vmatmul.msk.bf16.gmra.mxu2 %vm381_vm1, %v365_v29  ;;  %v372_v7 = vpack.c.bf16 %v333_v63, %v332_v62  ;;  %v271_v35 = vadd.f32 %v1363_v6, %v203_v28  ;;  %v360_v36 = vpack.c.bf16 %v309_v24, %v308_v23  ;;  %v322_v38 = vmax.f32 %v258_v32, 0.0 }
  0x24   :  { %v229_v11 = vadd.f32 %v1363_v6, %v161_v1  ;;  %v323_v39 = vmax.f32 %v259_v33, 0.0  ;;  %v178_v48 = vmul.f32 %v1358_v5, %v1209_v44  ;;  %v179_v49 = vmul.f32 %v1358_v5, %v1210_v45 }
  0x25   :  { %1147 = vmatmul.msk.bf16.vlgmr.msra.gmra.mxu3 %vm381_vm1, %v372_v7  ;;  %v335_v41 = vmax.f32 %v271_v35, 0.0  ;;  %v1237_v59 = vunpack.c.l.bf16 %v1302_v56  ;;  %v1238_v60 = vunpack.c.h.bf16 %v1302_v56  ;;  %v1261_v61 = vunpack.c.l.bf16 %v1308_v57  ;;  %v1309_v35 = vld [vmem:[%s2390_s0 + $0xd8] sm:$0xff]  }
  0x26   :  { %v293_v15 = vmax.f32 %v229_v11, 0.0  ;;  %v367_v46 = vpack.c.bf16 %v323_v39, %v322_v38  ;;  %v246_v52 = vadd.f32 %v1363_v6, %v178_v48  ;;  %v247_v53 = vadd.f32 %v1363_v6, %v179_v49 }
  0x27   :  { %v1262_v62 = vunpack.c.h.bf16 %v1308_v57  ;;  %v192_v1 = vmul.f32 %v1358_v5, %v1237_v59  ;;  %v193_v2 = vmul.f32 %v1358_v5, %v1238_v60  ;;  %v204_v3 = vmul.f32 %v1358_v5, %v1261_v61 }
  0x28   :  { %v352_v29 = vpack.c.bf16 %v293_v15, %v292_v14  ;;  %v310_v63 = vmax.f32 %v246_v52, 0.0  ;;  %v311_v0 = vmax.f32 %v247_v53, 0.0  ;;  %v1296_v15 = vld [vmem:[%s2390_s0 + $0x70] sm:$0xff]   ;;  %v1265_v39 = vunpack.c.l.bf16 %v1309_v35 }
  0x29   :  { %v260_v10 = vadd.f32 %v1363_v6, %v192_v1  ;;  %v261_v11 = vadd.f32 %v1363_v6, %v193_v2  ;;  %v272_v12 = vadd.f32 %v1363_v6, %v204_v3  ;;  %v1213_v22 = vunpack.c.l.bf16 %v1296_v15 }
  0x2a   :  { %v361_v14 = vpack.c.bf16 %v311_v0, %v310_v63  ;;  %v1214_v23 = vunpack.c.h.bf16 %v1296_v15  ;;  %v206_v45 = vmul.f32 %v1358_v5, %v1265_v39 }
  0x2b   :  { %v324_v16 = vmax.f32 %v260_v10, 0.0  ;;  %v180_v26 = vmul.f32 %v1358_v5, %v1213_v22 }
  0x2c   :  { %v274_v52 = vadd.f32 %v1363_v6, %v206_v45 }
  0x2d   :  { %1125 = vmatmul.msk.bf16.gmra.mxu0 %vm381_vm1, %v350_v18  ;;  %v1287_v18 = vld [vmem:[%s2390_s0 + $0x28] sm:$0xff]  }
  0x2e   :  { %v1177_v30 = vunpack.c.l.bf16 %v1287_v18  ;;  %v1178_v31 = vunpack.c.h.bf16 %v1287_v18  ;;  %v336_v18 = vmax.f32 %v272_v12, 0.0  ;;  %v1304_v12 = vld [vmem:[%s2390_s0 + $0xb0] sm:$0xff]  }
  0x2f   :  { %v1246_v15 = vunpack.c.h.bf16 %v1304_v12 }
  0x30   :  { %1133 = vmatmul.msk.bf16.gmra.mxu1 %vm381_vm1, %v358_v21  ;;  %v1257_v21 = vunpack.c.l.bf16 %v1307_v17  ;;  %v162_v42 = vmul.f32 %v1358_v5, %v1177_v30  ;;  %v163_v43 = vmul.f32 %v1358_v5, %v1178_v31  ;;  %v325_v17 = vmax.f32 %v261_v11, 0.0 }
  0x31   :  { %v248_v30 = vadd.f32 %v1363_v6, %v180_v26 }
  0x32   :  { %v202_v27 = vmul.f32 %v1358_v5, %v1257_v21  ;;  %v230_v50 = vadd.f32 %v1363_v6, %v162_v42  ;;  %v368_v24 = vpack.c.bf16 %v325_v17, %v324_v16 }
  0x33   :  { %1141 = vmatmul.msk.bf16.gmra.mxu2 %vm381_vm1, %v366_v4  ;;  %v205_v4 = vmul.f32 %v1358_v5, %v1262_v62 }
  0x34   :  { %v270_v34 = vadd.f32 %v1363_v6, %v202_v27  ;;  %v294_v54 = vmax.f32 %v230_v50, 0.0  ;;  %v181_v27 = vmul.f32 %v1358_v5, %v1214_v23 }
  0x35   :  { %v273_v13 = vadd.f32 %v1363_v6, %v205_v4 }
  0x36   :  { %v334_v40 = vmax.f32 %v270_v34, 0.0  ;;  %v249_v31 = vadd.f32 %v1363_v6, %v181_v27  ;;  %v1303_v34 = vld [vmem:[%s2390_s0 + $0xa8] sm:$0xff]  }
  0x37   :  { %v337_v19 = vmax.f32 %v273_v13, 0.0  ;;  %v1241_v37 = vunpack.c.l.bf16 %v1303_v34  ;;  %v1242_v38 = vunpack.c.h.bf16 %v1303_v34  ;;  %v1310_v13 = vld [vmem:[%s2390_s0 + $0xe0] sm:$0xff]  }
  0x38   :  { %v373_v47 = vpack.c.bf16 %v335_v41, %v334_v40  ;;  %v1266_v40 = vunpack.c.h.bf16 %v1309_v35  ;;  %v312_v41 = vmax.f32 %v248_v30, 0.0  ;;  %v313_v42 = vmax.f32 %v249_v31, 0.0 }
  0x39   :  { %v374_v25 = vpack.c.bf16 %v337_v19, %v336_v18  ;;  %v195_v44 = vmul.f32 %v1358_v5, %v1242_v38  ;;  %v1269_v16 = vunpack.c.l.bf16 %v1310_v13  ;;  %v1270_v17 = vunpack.c.h.bf16 %v1310_v13 }
  0x3a   :  { %1148 = vmatmul.msk.bf16.gmra.mxu3 %vm381_vm1, %v373_v47 }
  0x3b   :  { %v208_v22 = vmul.f32 %v1358_v5, %v1269_v16  ;;  %v209_v23 = vmul.f32 %v1358_v5, %v1270_v17 }
  0x3d   :  { %1126 = vmatmul.msk.bf16.gmra.mxu0 %vm381_vm1, %v351_v51  ;;  %v231_v51 = vadd.f32 %v1363_v6, %v163_v43  ;;  %v194_v43 = vmul.f32 %v1358_v5, %v1241_v37  ;;  %v276_v27 = vadd.f32 %v1363_v6, %v208_v22  ;;  %v1311_v37 = vld [vmem:[%s2390_s0 + $0xe8] sm:$0xff]  }
  0x3f   :  { %v295_v55 = vmax.f32 %v231_v51, 0.0  ;;  %v262_v50 = vadd.f32 %v1363_v6, %v194_v43  ;;  %v263_v51 = vadd.f32 %v1363_v6, %v195_v44 }
  0x40   :  { %1134 = vmatmul.msk.bf16.gmra.mxu1 %vm381_vm1, %v359_v58  ;;  %v1288_v58 = vld [vmem:[%s2390_s0 + $0x30] sm:$0xff]  }
  0x41   :  { %v353_v7 = vpack.c.bf16 %v295_v55, %v294_v54  ;;  %v1181_v8 = vunpack.c.l.bf16 %v1288_v58  ;;  %v1182_v9 = vunpack.c.h.bf16 %v1288_v58  ;;  %v362_v54 = vpack.c.bf16 %v313_v42, %v312_v41  ;;  %v1297_v55 = vld [vmem:[%s2390_s0 + $0x78] sm:$0xff]  }
  0x42   :  { %v326_v56 = vmax.f32 %v262_v50, 0.0  ;;  %v327_v57 = vmax.f32 %v263_v51, 0.0  ;;  %v338_v58 = vmax.f32 %v274_v52, 0.0  ;;  %v1217_v62 = vunpack.c.l.bf16 %v1297_v55 }
  0x43   :  { %1142 = vmatmul.msk.bf16.gmra.mxu2 %vm381_vm1, %v367_v46  ;;  %v164_v20 = vmul.f32 %v1358_v5, %v1181_v8  ;;  %v165_v21 = vmul.f32 %v1358_v5, %v1182_v9  ;;  %v207_v46 = vmul.f32 %v1358_v5, %v1266_v40  ;;  %v1218_v63 = vunpack.c.h.bf16 %v1297_v55 }
  0x44   :  { %v369_v0 = vpack.c.bf16 %v327_v57, %v326_v56  ;;  %v182_v2 = vmul.f32 %v1358_v5, %v1217_v62  ;;  %v1273_v40 = vunpack.c.l.bf16 %v1311_v37  ;;  %v1274_v41 = vunpack.c.h.bf16 %v1311_v37 }
  0x45   :  { %v232_v28 = vadd.f32 %v1363_v6, %v164_v20  ;;  %v275_v53 = vadd.f32 %v1363_v6, %v207_v46  ;;  %v183_v3 = vmul.f32 %v1358_v5, %v1218_v63 }
  0x46   :  { %v250_v8 = vadd.f32 %v1363_v6, %v182_v2  ;;  %v210_v44 = vmul.f32 %v1358_v5, %v1273_v40  ;;  %v211_v45 = vmul.f32 %v1358_v5, %v1274_v41 }
  0x47   :  { %v296_v32 = vmax.f32 %v232_v28, 0.0  ;;  %v339_v59 = vmax.f32 %v275_v53, 0.0  ;;  %v251_v9 = vadd.f32 %v1363_v6, %v183_v3  ;;  %v277_v28 = vadd.f32 %v1363_v6, %v209_v23 }
  0x48   :  { %v314_v18 = vmax.f32 %v250_v8, 0.0 }
  0x49   :  { %v375_v1 = vpack.c.bf16 %v339_v59, %v338_v58  ;;  %v315_v19 = vmax.f32 %v251_v9, 0.0 }
  0x4a   :  { %1149 = vmatmul.msk.bf16.gmra.mxu3 %vm381_vm1, %v374_v25 }
  0x4d   :  { %1127 = vmatmul.msk.bf16.gmra.mxu0 %vm381_vm1, %v352_v29  ;;  %v233_v29 = vadd.f32 %v1363_v6, %v165_v21  ;;  %v197_v21 = vmul.f32 %v1358_v5, %v1246_v15 }
  0x4f   :  { %v297_v33 = vmax.f32 %v233_v29, 0.0  ;;  %v265_v26 = vadd.f32 %v1363_v6, %v197_v21  ;;  %v363_v29 = vpack.c.bf16 %v315_v19, %v314_v18 }
  0x50   :  { %1135 = vmatmul.msk.bf16.gmra.mxu1 %vm381_vm1, %v360_v36  ;;  %v1289_v36 = vld [vmem:[%s2390_s0 + $0x38] sm:$0xff]  }
  0x51   :  { %v354_v47 = vpack.c.bf16 %v297_v33, %v296_v32  ;;  %v1185_v48 = vunpack.c.l.bf16 %v1289_v36  ;;  %v1186_v49 = vunpack.c.h.bf16 %v1289_v36  ;;  %v329_v31 = vmax.f32 %v265_v26, 0.0  ;;  %v1305_v36 = vld [vmem:[%s2390_s0 + $0xb8] sm:$0xff]  }
  0x52   :  { %v340_v32 = vmax.f32 %v276_v27, 0.0  ;;  %v341_v33 = vmax.f32 %v277_v28, 0.0  ;;  %v1249_v38 = vunpack.c.l.bf16 %v1305_v36  ;;  %v1250_v39 = vunpack.c.h.bf16 %v1305_v36  ;;  %v1313_v36 = vld [vmem:[%s2390_s0 + $0xf8] sm:$0xff]  }
  0x53   :  { %1143 = vmatmul.msk.bf16.gmra.mxu2 %vm381_vm1, %v368_v24  ;;  %v166_v60 = vmul.f32 %v1358_v5, %v1185_v48  ;;  %v167_v61 = vmul.f32 %v1358_v5, %v1186_v49  ;;  %v278_v48 = vadd.f32 %v1363_v6, %v210_v44  ;;  %v279_v49 = vadd.f32 %v1363_v6, %v211_v45 }
  0x54   :  { %v376_v35 = vpack.c.bf16 %v341_v33, %v340_v32  ;;  %v198_v42 = vmul.f32 %v1358_v5, %v1249_v38  ;;  %v199_v43 = vmul.f32 %v1358_v5, %v1250_v39  ;;  %v1281_v41 = vunpack.c.l.bf16 %v1313_v36 }
  0x55   :  { %v234_v4 = vadd.f32 %v1363_v6, %v166_v60  ;;  %v342_v55 = vmax.f32 %v278_v48, 0.0  ;;  %v343_v56 = vmax.f32 %v279_v49, 0.0 }
  0x56   :  { %v266_v46 = vadd.f32 %v1363_v6, %v198_v42  ;;  %v1282_v42 = vunpack.c.h.bf16 %v1313_v36 }
  0x57   :  { %v298_v10 = vmax.f32 %v234_v4, 0.0  ;;  %v377_v59 = vpack.c.bf16 %v343_v56, %v342_v55  ;;  %v1312_v4 = vld [vmem:[%s2390_s0 + $0xf0] sm:$0xff]  }
  0x58   :  { %v330_v52 = vmax.f32 %v266_v46, 0.0  ;;  %v215_v46 = vmul.f32 %v1358_v5, %v1282_v42 }
  0x5a   :  { %1150 = vmatmul.msk.bf16.gmra.mxu3 %vm381_vm1, %v375_v1 }
  0x5d   :  { %1128 = vmatmul.msk.bf16.gmra.mxu0 %vm381_vm1, %v353_v7  ;;  %v235_v7 = vadd.f32 %v1363_v6, %v167_v61 }
  0x5f   :  { %v299_v11 = vmax.f32 %v235_v7, 0.0 }
  0x60   :  { %1136 = vmatmul.msk.bf16.gmra.mxu1 %vm381_vm1, %v361_v14  ;;  %v1245_v14 = vunpack.c.l.bf16 %v1304_v12  ;;  %v1278_v12 = vunpack.c.h.bf16 %v1312_v4 }
  0x61   :  { %v355_v24 = vpack.c.bf16 %v299_v11, %v298_v10  ;;  %v1277_v11 = vunpack.c.l.bf16 %v1312_v4 }
  0x62   :  { %v196_v20 = vmul.f32 %v1358_v5, %v1245_v14  ;;  %v213_v14 = vmul.f32 %v1358_v5, %v1278_v12 }
  0x63   :  { %1144 = vmatmul.msk.bf16.gmra.mxu2 %vm381_vm1, %v369_v0  ;;  %v212_v13 = vmul.f32 %v1358_v5, %v1277_v11 }
  0x64   :  { %v264_v25 = vadd.f32 %v1363_v6, %v196_v20  ;;  %v281_v17 = vadd.f32 %v1363_v6, %v213_v14 }
  0x65   :  { %v280_v16 = vadd.f32 %v1363_v6, %v212_v13 }
  0x66   :  { %v328_v30 = vmax.f32 %v264_v25, 0.0 }
  0x67   :  { %v344_v23 = vmax.f32 %v280_v16, 0.0 }
  0x68   :  { %v370_v34 = vpack.c.bf16 %v329_v31, %v328_v30 }
  0x6a   :  { %1151 = vmatmul.msk.bf16.gmra.mxu3 %vm381_vm1, %v376_v35 }
  0x6d   :  { %1129 = vmatmul.msk.bf16.gmra.mxu0 %vm381_vm1, %v354_v47  ;;  %v267_v47 = vadd.f32 %v1363_v6, %v199_v43  ;;  %v214_v43 = vmul.f32 %v1358_v5, %v1281_v41 }
  0x70   :  { %1137 = vmatmul.msk.bf16.gmra.mxu1 %vm381_vm1, %v362_v54  ;;  %v331_v54 = vmax.f32 %v267_v47, 0.0 }
  0x72   :  { %v371_v58 = vpack.c.bf16 %v331_v54, %v330_v52  ;;  %v282_v54 = vadd.f32 %v1363_v6, %v214_v43 }
  0x73   :  { %1145 = vmatmul.msk.bf16.gmra.mxu2 %vm381_vm1, %v370_v34 }
  0x7a   :  { %1152 = vmatmul.msk.bf16.gmra.mxu3 %vm381_vm1, %v377_v59 }
  0x7d   :  { %1130 = vmatmul.msk.bf16.gmra.mxu0 %vm381_vm1, %v355_v24  ;;  %v345_v24 = vmax.f32 %v281_v17, 0.0 }
  0x7f   :  { %v378_v28 = vpack.c.bf16 %v345_v24, %v344_v23 }
  0x80   :  { %1138 = vmatmul.msk.bf16.gmra.mxu1 %vm381_vm1, %v363_v29 }
  0x83   :  { %1146 = vmatmul.msk.bf16.gmra.mxu2 %vm381_vm1, %v371_v58  ;;  %v346_v58 = vmax.f32 %v282_v54, 0.0 }
  0x8a   :  { %v491_v50 = vpop.f32.mrf.mxu0  ;;  %1153 = vmatmul.msk.bf16.gmra.mxu3 %vm381_vm1, %v378_v28 }
  0x8b   :  { %v986_v51 = vpack.c.bf16 %v491_v50, %v491_v50  ;;  %v785_v60 = vmul.f32 %v491_v50, %v491_v50  ;;  %v652_v62 = vsel %vm651_vm3, %v491_v50, 0.0 }
  0x8d   :  { %v1600_v53 = vpop.f32.mrf.mxu1  ;;  %1051 = vst.msk [vmem:[%s2393_s4] sm:$0xf] %vm1050_vm2, %v986_v51  ;;  %v849_v7 = vsel %vm651_vm3, %v785_v60, 0.0 }
  0x8e   :  { %v1002_v57 = vpack.c.bf16 %v1600_v53, %v1600_v53 }
  0x90   :  { %1067 = vst.msk [vmem:[%s2393_s4 + $0x40] sm:$0xf] %vm1050_vm2, %v1002_v57  ;;  %v283_v57 = vadd.f32 %v1363_v6, %v215_v46 }
  0x92   :  { %v493_v61 = vpop.f32.mrf.mxu0  ;;  %v347_v59 = vmax.f32 %v283_v57, 0.0 }
  0x93   :  { %v653_v63 = vsel %vm651_vm3, %v493_v61, 0.0  ;;  %v786_v0 = vmul.f32 %v493_v61, %v493_v61  ;;  %v987_v1 = vpack.c.bf16 %v493_v61, %v493_v61 }
  0x94   :  { %v654_v2 = vadd.f32 %v653_v63, %v652_v62  ;;  %v379_v61 = vpack.c.bf16 %v347_v59, %v346_v58 }
  0x95   :  { %v1616_v3 = vpop.f32.mrf.mxu1  ;;  %v850_v8 = vsel %vm651_vm3, %v786_v0, 0.0  ;;  %1052 = vst.msk [vmem:[%s2393_s4 + $0x4] sm:$0xf] %vm1050_vm2, %v987_v1 }
  0x96   :  { %v1003_v9 = vpack.c.bf16 %v1616_v3, %v1616_v3  ;;  %v851_v10 = vadd.f32 %v850_v8, %v849_v7  ;;  %v1652_v30 = vpop.f32.mrf.mxu2 }
  0x97   :  { %v1018_v40 = vpack.c.bf16 %v1652_v30, %v1652_v30 }
  0x98   :  { %1068 = vst.msk [vmem:[%s2393_s4 + $0x44] sm:$0xf] %vm1050_vm2, %v1003_v9 }
  0x99   :  { %1083 = vst.msk [vmem:[%s2393_s4 + $0x80] sm:$0xf] %vm1050_vm2, %v1018_v40 }
  0x9a   :  { %v496_v15 = vpop.f32.mrf.mxu0  ;;  %1154 = vmatmul.msk.bf16.gmra.mxu3 %vm381_vm1, %v379_v61 }
  0x9b   :  { %v655_v18 = vsel %vm651_vm3, %v496_v15, 0.0  ;;  %v787_v19 = vmul.f32 %v496_v15, %v496_v15  ;;  %v988_v20 = vpack.c.bf16 %v496_v15, %v496_v15 }
  0x9c   :  { %v656_v21 = vadd.f32 %v655_v18, %v654_v2 }
  0x9d   :  { %v1638_v22 = vpop.f32.mrf.mxu1  ;;  %v852_v25 = vsel %vm651_vm3, %v787_v19, 0.0  ;;  %1053 = vst.msk [vmem:[%s2393_s4 + $0x8] sm:$0xf] %vm1050_vm2, %v988_v20 }
  0x9e   :  { %v1004_v26 = vpack.c.bf16 %v1638_v22, %v1638_v22  ;;  %v853_v27 = vadd.f32 %v852_v25, %v851_v10  ;;  %v1678_v45 = vpop.f32.mrf.mxu2 }
  0x9f   :  { %v1019_v52 = vpack.c.bf16 %v1678_v45, %v1678_v45 }
  0xa0   :  { %1069 = vst.msk [vmem:[%s2393_s4 + $0x48] sm:$0xf] %vm1050_vm2, %v1004_v26 }
  0xa1   :  { %1084 = vst.msk [vmem:[%s2393_s4 + $0x84] sm:$0xf] %vm1050_vm2, %v1019_v52 }
  0xa2   :  { %v498_v29 = vpop.f32.mrf.mxu0 }
  0xa3   :  { %v657_v31 = vsel %vm651_vm3, %v498_v29, 0.0  ;;  %v788_v32 = vmul.f32 %v498_v29, %v498_v29  ;;  %v989_v33 = vpack.c.bf16 %v498_v29, %v498_v29 }
  0xa4   :  { %v658_v34 = vadd.f32 %v657_v31, %v656_v21 }
  0xa5   :  { %v1655_v35 = vpop.f32.mrf.mxu1  ;;  %v854_v37 = vsel %vm651_vm3, %v788_v32, 0.0  ;;  %1054 = vst.msk [vmem:[%s2393_s4 + $0xc] sm:$0xf] %vm1050_vm2, %v989_v33 }
  0xa6   :  { %v1005_v38 = vpack.c.bf16 %v1655_v35, %v1655_v35  ;;  %v855_v39 = vadd.f32 %v854_v37, %v853_v27  ;;  %v1709_v62 = vpop.f32.mrf.mxu2 }
  0xa7   :  { %v1020_v1 = vpack.c.bf16 %v1709_v62, %v1709_v62 }
  0xa8   :  { %1070 = vst.msk [vmem:[%s2393_s4 + $0x4c] sm:$0xf] %vm1050_vm2, %v1005_v38  ;;  %v1762_v14 = vpop.f32.mrf.mxu3 }
  0xa9   :  { %1085 = vst.msk [vmem:[%s2393_s4 + $0x88] sm:$0xf] %vm1050_vm2, %v1020_v1  ;;  %v1034_v18 = vpack.c.bf16 %v1762_v14, %v1762_v14 }
  0xaa   :  { %v501_v44 = vpop.f32.mrf.mxu0 }
  0xab   :  { %v659_v47 = vsel %vm651_vm3, %v501_v44, 0.0  ;;  %v789_v48 = vmul.f32 %v501_v44, %v501_v44  ;;  %v990_v49 = vpack.c.bf16 %v501_v44, %v501_v44  ;;  %1099 = vst.msk [vmem:[%s2393_s4 + $0xc0] sm:$0xf] %vm1050_vm2, %v1034_v18 }
  0xac   :  { %v1682_v50 = vadd.f32 %v659_v47, %v658_v34 }
  0xad   :  { %v1684_v51 = vpop.f32.mrf.mxu1  ;;  %v856_v55 = vsel %vm651_vm3, %v789_v48, 0.0  ;;  %1055 = vst.msk [vmem:[%s2393_s4 + $0x10] sm:$0xf] %vm1050_vm2, %v990_v49 }
  0xae   :  { %v1006_v5 = vpack.c.bf16 %v1684_v51, %v1684_v51  ;;  %v1696_v56 = vadd.f32 %v856_v55, %v855_v39  ;;  %v1734_v4 = vpop.f32.mrf.mxu2 }
  0xaf   :  { %v1021_v9 = vpack.c.bf16 %v1734_v4, %v1734_v4 }
  0xb0   :  { %1071 = vst.msk [vmem:[%s2393_s4 + $0x50] sm:$0xf] %vm1050_vm2, %v1006_v5  ;;  %v1794_v23 = vpop.f32.mrf.mxu3 }
  0xb1   :  { %1086 = vst.msk [vmem:[%s2393_s4 + $0x8c] sm:$0xf] %vm1050_vm2, %v1021_v9  ;;  %v1035_v27 = vpack.c.bf16 %v1794_v23, %v1794_v23 }
  0xb2   :  { %v1707_v60 = vpop.f32.mrf.mxu0 }
  0xb3   :  { %v991_v63 = vpack.c.bf16 %v1707_v60, %v1707_v60  ;;  %1100 = vst.msk [vmem:[%s2393_s4 + $0xc4] sm:$0xf] %vm1050_vm2, %v1035_v27  ;;  %v790_v58 = vmul.f32 %v1707_v60, %v1707_v60  ;;  %v661_v1 = vsel %vm651_vm3, %v1707_v60, 0.0 }
  0xb4   :  { %v662_v18 = vadd.f32 %v661_v1, %v1682_v50 }
  0xb5   :  { %v1713_v0 = vpop.f32.mrf.mxu1  ;;  %1056 = vst.msk [vmem:[%s2393_s4 + $0x14] sm:$0xf] %vm1050_vm2, %v991_v63  ;;  %v858_v60 = vsel %vm651_vm3, %v790_v58, 0.0 }
  0xb6   :  { %v1007_v6 = vpack.c.bf16 %v1713_v0, %v1713_v0  ;;  %v1758_v12 = vpop.f32.mrf.mxu2  ;;  %v859_v50 = vadd.f32 %v858_v60, %v1696_v56 }
  0xb7   :  { %v1022_v17 = vpack.c.bf16 %v1758_v12, %v1758_v12 }
  0xb8   :  { %1072 = vst.msk [vmem:[%s2393_s4 + $0x54] sm:$0xf] %vm1050_vm2, %v1007_v6 }
  0xb9   :  { %1087 = vst.msk [vmem:[%s2393_s4 + $0x90] sm:$0xf] %vm1050_vm2, %v1022_v17 }
  0xba   :  { %v1732_v2 = vpop.f32.mrf.mxu0 }
  0xbb   :  { %v992_v7 = vpack.c.bf16 %v1732_v2, %v1732_v2 }
  0xbd   :  { %v1738_v8 = vpop.f32.mrf.mxu1  ;;  %1057 = vst.msk [vmem:[%s2393_s4 + $0x18] sm:$0xf] %vm1050_vm2, %v992_v7  ;;  %v1826_v32 = vpop.f32.mrf.mxu3  ;;  %v791_v7 = vmul.f32 %v1732_v2, %v1732_v2 }
  0xbe   :  { %v1008_v10 = vpack.c.bf16 %v1738_v8, %v1738_v8  ;;  %v1790_v20 = vpop.f32.mrf.mxu2  ;;  %v1036_v37 = vpack.c.bf16 %v1826_v32, %v1826_v32 }
  0xbf   :  { %v1023_v25 = vpack.c.bf16 %v1790_v20, %v1790_v20 }
  0xc0   :  { %1073 = vst.msk [vmem:[%s2393_s4 + $0x58] sm:$0xf] %vm1050_vm2, %v1008_v10 }
  0xc1   :  { %1088 = vst.msk [vmem:[%s2393_s4 + $0x94] sm:$0xf] %vm1050_vm2, %v1023_v25 }
  0xc2   :  { %v1756_v11 = vpop.f32.mrf.mxu0  ;;  %1101 = vst.msk [vmem:[%s2393_s4 + $0xc8] sm:$0xf] %vm1050_vm2, %v1036_v37 }
  0xc3   :  { %v993_v13 = vpack.c.bf16 %v1756_v11, %v1756_v11  ;;  %v665_v25 = vsel %vm651_vm3, %v1756_v11, 0.0 }
  0xc5   :  { %v1764_v15 = vpop.f32.mrf.mxu1  ;;  %1058 = vst.msk [vmem:[%s2393_s4 + $0x1c] sm:$0xf] %vm1050_vm2, %v993_v13  ;;  %v1858_v41 = vpop.f32.mrf.mxu3  ;;  %v663_v13 = vsel %vm651_vm3, %v1732_v2, 0.0 }
  0xc6   :  { %v1009_v16 = vpack.c.bf16 %v1764_v15, %v1764_v15  ;;  %v1822_v29 = vpop.f32.mrf.mxu2  ;;  %v1037_v46 = vpack.c.bf16 %v1858_v41, %v1858_v41  ;;  %v664_v27 = vadd.f32 %v663_v13, %v662_v18 }
  0xc7   :  { %v1024_v36 = vpack.c.bf16 %v1822_v29, %v1822_v29 }
  0xc8   :  { %1074 = vst.msk [vmem:[%s2393_s4 + $0x5c] sm:$0xf] %vm1050_vm2, %v1009_v16  ;;  %v792_v16 = vmul.f32 %v1756_v11, %v1756_v11 }
  0xc9   :  { %1089 = vst.msk [vmem:[%s2393_s4 + $0x98] sm:$0xf] %vm1050_vm2, %v1024_v36 }
  0xca   :  { %v1788_v19 = vpop.f32.mrf.mxu0  ;;  %1102 = vst.msk [vmem:[%s2393_s4 + $0xcc] sm:$0xf] %vm1050_vm2, %v1037_v46  ;;  %v862_v11 = vsel %vm651_vm3, %v792_v16, 0.0 }
  0xcb   :  { %v994_v21 = vpack.c.bf16 %v1788_v19, %v1788_v19  ;;  %v667_v36 = vsel %vm651_vm3, %v1788_v19, 0.0 }
  0xcd   :  { %v1796_v24 = vpop.f32.mrf.mxu1  ;;  %1059 = vst.msk [vmem:[%s2393_s4 + $0x20] sm:$0xf] %vm1050_vm2, %v994_v21  ;;  %v1886_v52 = vpop.f32.mrf.mxu3  ;;  %v860_v21 = vsel %vm651_vm3, %v791_v7, 0.0 }
  0xce   :  { %v1010_v26 = vpack.c.bf16 %v1796_v24, %v1796_v24  ;;  %v1854_v39 = vpop.f32.mrf.mxu2  ;;  %v1038_v10 = vpack.c.bf16 %v1886_v52, %v1886_v52  ;;  %v861_v56 = vadd.f32 %v860_v21, %v859_v50 }
  0xcf   :  { %v1025_v43 = vpack.c.bf16 %v1854_v39, %v1854_v39 }
  0xd0   :  { %1075 = vst.msk [vmem:[%s2393_s4 + $0x60] sm:$0xf] %vm1050_vm2, %v1010_v26  ;;  %v793_v26 = vmul.f32 %v1788_v19, %v1788_v19 }
  0xd1   :  { %1090 = vst.msk [vmem:[%s2393_s4 + $0x9c] sm:$0xf] %vm1050_vm2, %v1025_v43 }
  0xd2   :  { %v1820_v28 = vpop.f32.mrf.mxu0  ;;  %1103 = vst.msk [vmem:[%s2393_s4 + $0xd0] sm:$0xf] %vm1050_vm2, %v1038_v10 }
  0xd3   :  { %v995_v31 = vpack.c.bf16 %v1820_v28, %v1820_v28  ;;  %v794_v37 = vmul.f32 %v1820_v28, %v1820_v28 }
  0xd5   :  { %v1828_v33 = vpop.f32.mrf.mxu1  ;;  %1060 = vst.msk [vmem:[%s2393_s4 + $0x24] sm:$0xf] %vm1050_vm2, %v995_v31  ;;  %v1904_v61 = vpop.f32.mrf.mxu3  ;;  %v866_v1 = vsel %vm651_vm3, %v794_v37, 0.0 }
  0xd6   :  { %v1011_v34 = vpack.c.bf16 %v1828_v33, %v1828_v33  ;;  %v1884_v48 = vpop.f32.mrf.mxu2  ;;  %v1039_v2 = vpack.c.bf16 %v1904_v61, %v1904_v61 }
  0xd7   :  { %v1026_v6 = vpack.c.bf16 %v1884_v48, %v1884_v48 }
  0xd8   :  { %1076 = vst.msk [vmem:[%s2393_s4 + $0x64] sm:$0xf] %vm1050_vm2, %v1011_v34 }
  0xd9   :  { %1091 = vst.msk [vmem:[%s2393_s4 + $0xa0] sm:$0xf] %vm1050_vm2, %v1026_v6 }
  0xda   :  { %v1852_v38 = vpop.f32.mrf.mxu0  ;;  %1104 = vst.msk [vmem:[%s2393_s4 + $0xd4] sm:$0xf] %vm1050_vm2, %v1039_v2 }
  0xdb   :  { %v996_v40 = vpack.c.bf16 %v1852_v38, %v1852_v38  ;;  %v795_v58 = vmul.f32 %v1852_v38, %v1852_v38  ;;  %v671_v7 = vsel %vm651_vm3, %v1852_v38, 0.0 }
  0xdd   :  { %v1860_v42 = vpop.f32.mrf.mxu1  ;;  %1061 = vst.msk [vmem:[%s2393_s4 + $0x28] sm:$0xf] %vm1050_vm2, %v996_v40  ;;  %v1965_v43 = vpop.f32.mrf.mxu3  ;;  %v868_v60 = vsel %vm651_vm3, %v795_v58, 0.0 }
  0xde   :  { %v1012_v44 = vpack.c.bf16 %v1860_v42, %v1860_v42  ;;  %v1900_v57 = vpop.f32.mrf.mxu2  ;;  %v1040_v58 = vpack.c.bf16 %v1965_v43, %v1965_v43 }
  0xdf   :  { %v1027_v17 = vpack.c.bf16 %v1900_v57, %v1900_v57 }
  0xe0   :  { %1077 = vst.msk [vmem:[%s2393_s4 + $0x68] sm:$0xf] %vm1050_vm2, %v1012_v44  ;;  %v666_v44 = vadd.f32 %v665_v25, %v664_v27 }
  0xe1   :  { %1092 = vst.msk [vmem:[%s2393_s4 + $0xa4] sm:$0xf] %vm1050_vm2, %v1027_v17 }
  0xe2   :  { %v518_v47 = vpop.f32.mrf.mxu0  ;;  %v668_v6 = vadd.f32 %v667_v36, %v666_v44  ;;  %1105 = vst.msk [vmem:[%s2393_s4 + $0xd8] sm:$0xf] %vm1050_vm2, %v1040_v58 }
  0xe3   :  { %v997_v49 = vpack.c.bf16 %v518_v47, %v518_v47  ;;  %v673_v13 = vsel %vm651_vm3, %v518_v47, 0.0 }
  0xe5   :  { %v1888_v54 = vpop.f32.mrf.mxu1  ;;  %1062 = vst.msk [vmem:[%s2393_s4 + $0x2c] sm:$0xf] %vm1050_vm2, %v997_v49  ;;  %v864_v49 = vsel %vm651_vm3, %v793_v26, 0.0  ;;  %v1993_v27 = vpop.f32.mrf.mxu3 }
  0xe6   :  { %v1013_v55 = vpack.c.bf16 %v1888_v54, %v1888_v54  ;;  %v1958_v34 = vpop.f32.mrf.mxu2 }
  0xe8   :  { %1078 = vst.msk [vmem:[%s2393_s4 + $0x6c] sm:$0xf] %vm1050_vm2, %v1013_v55  ;;  %v669_v55 = vsel %vm651_vm3, %v1820_v28, 0.0 }
  0xe9   :  { %v670_v10 = vadd.f32 %v669_v55, %v668_v6 }
  0xea   :  { %v521_v5 = vpop.f32.mrf.mxu0 }
  0xeb   :  { %v998_v59 = vpack.c.bf16 %v521_v5, %v521_v5  ;;  %v797_v16 = vmul.f32 %v521_v5, %v521_v5  ;;  %v672_v18 = vadd.f32 %v671_v7, %v670_v10  ;;  %v675_v25 = vsel %vm651_vm3, %v521_v5, 0.0 }
  0xec   :  { %v1041_v7 = vpack.c.bf16 %v1993_v27, %v1993_v27 }
  0xed   :  { %v1906_v63 = vpop.f32.mrf.mxu1  ;;  %1063 = vst.msk [vmem:[%s2393_s4 + $0x30] sm:$0xf] %vm1050_vm2, %v998_v59  ;;  %v863_v59 = vadd.f32 %v862_v11, %v861_v56  ;;  %v674_v36 = vadd.f32 %v673_v13, %v672_v18 }
  0xee   :  { %v1014_v9 = vpack.c.bf16 %v1906_v63, %v1906_v63  ;;  %v1989_v21 = vpop.f32.mrf.mxu2  ;;  %1106 = vst.msk [vmem:[%s2393_s4 + $0xdc] sm:$0xf] %vm1050_vm2, %v1041_v7 }
  0xef   :  { %v865_v28 = vadd.f32 %v864_v49, %v863_v59  ;;  %v676_v55 = vadd.f32 %v675_v25, %v674_v36  ;;  %v1029_v59 = vpack.c.bf16 %v1989_v21, %v1989_v21  ;;  %v802_v36 = vmul.f32 %v1616_v3, %v1616_v3 }
  0xf0   :  { %1079 = vst.msk [vmem:[%s2393_s4 + $0x70] sm:$0xf] %vm1050_vm2, %v1014_v9  ;;  %v796_v9 = vmul.f32 %v518_v47, %v518_v47  ;;  %v1028_v47 = vpack.c.bf16 %v1958_v34, %v1958_v34 }
  0xf1   :  { %v867_v17 = vadd.f32 %v866_v1, %v865_v28  ;;  %1094 = vst.msk [vmem:[%s2393_s4 + $0xac] sm:$0xf] %vm1050_vm2, %v1029_v59  ;;  %v804_v59 = vmul.f32 %v1655_v35, %v1655_v35 }
  0xf2   :  { %v523_v31 = vpop.f32.mrf.mxu0  ;;  %v870_v38 = vsel %vm651_vm3, %v796_v9, 0.0  ;;  %1093 = vst.msk [vmem:[%s2393_s4 + $0xa8] sm:$0xf] %vm1050_vm2, %v1028_v47 }
  0xf3   :  { %v999_v40 = vpack.c.bf16 %v523_v31, %v523_v31  ;;  %v798_v26 = vmul.f32 %v523_v31, %v523_v31  ;;  %v869_v11 = vadd.f32 %v868_v60, %v867_v17  ;;  %v677_v56 = vsel %vm651_vm3, %v523_v31, 0.0 }
  0xf4   :  { %v678_v1 = vadd.f32 %v677_v56, %v676_v55 }
  0xf5   :  { %v1967_v46 = vpop.f32.mrf.mxu1  ;;  %1064 = vst.msk [vmem:[%s2393_s4 + $0x34] sm:$0xf] %vm1050_vm2, %v999_v40  ;;  %v872_v40 = vsel %vm651_vm3, %v797_v16, 0.0  ;;  %v871_v49 = vadd.f32 %v870_v38, %v869_v11  ;;  %v874_v31 = vsel %vm651_vm3, %v798_v26, 0.0  ;;  %v801_v16 = vmul.f32 %v1600_v53, %v1600_v53  ;;  %v2041_v38 = vpop.f32.mrf.mxu3 }
  0xf6   :  { %v1015_v19 = vpack.c.bf16 %v1967_v46, %v1967_v46  ;;  %v2036_v13 = vpop.f32.mrf.mxu2  ;;  %v683_v11 = vsel %vm651_vm3, %v1600_v53, 0.0  ;;  %v685_v53 = vsel %vm651_vm3, %v1616_v3, 0.0 }
  0xf7   :  { %v873_v6 = vadd.f32 %v872_v40, %v871_v49  ;;  %v803_v49 = vmul.f32 %v1638_v22, %v1638_v22 }
  0xf8   :  { %1080 = vst.msk [vmem:[%s2393_s4 + $0x74] sm:$0xf] %vm1050_vm2, %v1015_v19 }
  0xf9   :  { %v875_v28 = vadd.f32 %v874_v31, %v873_v6  ;;  %v882_v31 = vsel %vm651_vm3, %v802_v36, 0.0  ;;  %v884_v7 = vsel %vm651_vm3, %v803_v49, 0.0  ;;  %v693_v36 = vsel %vm651_vm3, %v1713_v0, 0.0 }
  0xfa   :  { %v526_v2 = vpop.f32.mrf.mxu0 }
  0xfb   :  { %v1000_v50 = vpack.c.bf16 %v526_v2, %v526_v2  ;;  %v799_v44 = vmul.f32 %v526_v2, %v526_v2  ;;  %v679_v19 = vsel %vm651_vm3, %v526_v2, 0.0 }
  0xfc   :  { %v680_v10 = vadd.f32 %v679_v19, %v678_v1  ;;  %v687_v19 = vsel %vm651_vm3, %v1638_v22, 0.0 }
  0xfd   :  { %v1995_v37 = vpop.f32.mrf.mxu1  ;;  %1065 = vst.msk [vmem:[%s2393_s4 + $0x38] sm:$0xf] %vm1050_vm2, %v1000_v50  ;;  %v876_v9 = vsel %vm651_vm3, %v799_v44, 0.0 }
  0xfe   :  { %v1016_v5 = vpack.c.bf16 %v1995_v37, %v1995_v37  ;;  %v877_v25 = vadd.f32 %v876_v9, %v875_v28  ;;  %v2070_v1 = vpop.f32.mrf.mxu2  ;;  %v689_v9 = vsel %vm651_vm3, %v1655_v35, 0.0  ;;  %v805_v28 = vmul.f32 %v1684_v51, %v1684_v51 }
  0xff   :  { %v806_v35 = vmul.f32 %v1713_v0, %v1713_v0  ;;  %v808_v0 = vmul.f32 %v1764_v15, %v1764_v15 }
 0x100   :  { %1081 = vst.msk [vmem:[%s2393_s4 + $0x78] sm:$0xf] %vm1050_vm2, %v1016_v5  ;;  %v880_v5 = vsel %vm651_vm3, %v801_v16, 0.0 }
 0x102   :  { %v528_v60 = vpop.f32.mrf.mxu0 }
 0x103   :  { %v681_v17 = vsel %vm651_vm3, %v528_v60, 0.0  ;;  %v800_v18 = vmul.f32 %v528_v60, %v528_v60  ;;  %v1001_v2 = vpack.c.bf16 %v528_v60, %v528_v60  ;;  %v2079_v60 = vpop.f32.mrf.mxu3 }
 0x104   :  { %v682_v26 = vadd.f32 %v681_v17, %v680_v10  ;;  %v1030_v10 = vpack.c.bf16 %v2036_v13, %v2036_v13  ;;  %v1042_v17 = vpack.c.bf16 %v2041_v38, %v2041_v38 }
 0x105   :  { %v2043_v50 = vpop.f32.mrf.mxu1  ;;  %v878_v47 = vsel %vm651_vm3, %v800_v18, 0.0  ;;  %1066 = vst.msk [vmem:[%s2393_s4 + $0x3c] sm:$0xf] %vm1050_vm2, %v1001_v2  ;;  %v886_v18 = vsel %vm651_vm3, %v804_v59, 0.0  ;;  %v691_v2 = vsel %vm651_vm3, %v1684_v51, 0.0  ;;  %v888_v51 = vsel %vm651_vm3, %v805_v28, 0.0 }
 0x106   :  { %v1017_v40 = vpack.c.bf16 %v2043_v50, %v2043_v50  ;;  %v684_v56 = vadd.f32 %v683_v11, %v682_v26  ;;  %v879_v44 = vadd.f32 %v878_v47, %v877_v25  ;;  %1095 = vst.msk [vmem:[%s2393_s4 + $0xb0] sm:$0xf] %vm1050_vm2, %v1030_v10  ;;  %v1031_v25 = vpack.c.bf16 %v2070_v1, %v2070_v1  ;;  %v2123_v59 = vpop.f32.mrf.mxu2 }
 0x107   :  { %1107 = vst.msk [vmem:[%s2393_s4 + $0xe0] sm:$0xf] %vm1050_vm2, %v1042_v17  ;;  %v807_v47 = vmul.f32 %v1738_v8, %v1738_v8  ;;  %v810_v28 = vmul.f32 %v1828_v33, %v1828_v33  ;;  %v811_v17 = vmul.f32 %v1860_v42, %v1860_v42 }
 0x108   :  { %1082 = vst.msk [vmem:[%s2393_s4 + $0x7c] sm:$0xf] %vm1050_vm2, %v1017_v40  ;;  %v686_v55 = vadd.f32 %v685_v53, %v684_v56  ;;  %v881_v58 = vadd.f32 %v880_v5, %v879_v44  ;;  %v1043_v40 = vpack.c.bf16 %v2079_v60, %v2079_v60  ;;  %v890_v5 = vsel %vm651_vm3, %v806_v35, 0.0 }
 0x109   :  { %1096 = vst.msk [vmem:[%s2393_s4 + $0xb4] sm:$0xf] %vm1050_vm2, %v1031_v25  ;;  %v695_v53 = vsel %vm651_vm3, %v1738_v8, 0.0  ;;  %v898_v35 = vsel %vm651_vm3, %v810_v28, 0.0  ;;  %v812_v25 = vmul.f32 %v1888_v54, %v1888_v54  ;;  %v711_v28 = vsel %vm651_vm3, %v1995_v37, 0.0 }
 0x10a   :  { %v688_v6 = vadd.f32 %v687_v19, %v686_v55  ;;  %v883_v3 = vadd.f32 %v882_v31, %v881_v58  ;;  %1108 = vst.msk [vmem:[%s2393_s4 + $0xe4] sm:$0xf] %vm1050_vm2, %v1043_v40  ;;  %v892_v58 = vsel %vm651_vm3, %v807_v47, 0.0  ;;  %v697_v31 = vsel %vm651_vm3, %v1764_v15, 0.0 }
 0x10b   :  { %v809_v19 = vmul.f32 %v1796_v24, %v1796_v24  ;;  %v2125_v8 = vpop.f32.mrf.mxu3  ;;  %v1032_v47 = vpack.c.bf16 %v2123_v59, %v2123_v59 }
 0x10c   :  { %v690_v22 = vadd.f32 %v689_v9, %v688_v6  ;;  %v885_v16 = vadd.f32 %v884_v7, %v883_v3  ;;  %v894_v7 = vsel %vm651_vm3, %v808_v0, 0.0  ;;  %v699_v9 = vsel %vm651_vm3, %v1796_v24, 0.0 }
 0x10d   :  { %v896_v15 = vsel %vm651_vm3, %v809_v19, 0.0  ;;  %v703_v24 = vsel %vm651_vm3, %v1860_v42, 0.0  ;;  %v814_v0 = vmul.f32 %v1967_v46, %v1967_v46  ;;  %1097 = vst.msk [vmem:[%s2393_s4 + $0xb8] sm:$0xf] %vm1050_vm2, %v1032_v47  ;;  %v815_v19 = vmul.f32 %v1995_v37, %v1995_v37 }
 0x10e   :  { %v692_v26 = vadd.f32 %v691_v2, %v690_v22  ;;  %v887_v11 = vadd.f32 %v886_v18, %v885_v16  ;;  %v701_v16 = vsel %vm651_vm3, %v1828_v33, 0.0  ;;  %v705_v33 = vsel %vm651_vm3, %v1888_v54, 0.0  ;;  %v2149_v40 = vpop.f32.mrf.mxu2 }
 0x10f   :  { %v707_v54 = vsel %vm651_vm3, %v1906_v63, 0.0 }
 0x110   :  { %v694_v56 = vadd.f32 %v693_v36, %v692_v26  ;;  %v889_v44 = vadd.f32 %v888_v51, %v887_v11  ;;  %v900_v51 = vsel %vm651_vm3, %v811_v17, 0.0  ;;  %v813_v36 = vmul.f32 %v1906_v63, %v1906_v63 }
 0x111   :  { %v713_v17 = vsel %vm651_vm3, %v2043_v50, 0.0 }
 0x112   :  { %v891_v49 = vadd.f32 %v890_v5, %v889_v44  ;;  %v696_v55 = vadd.f32 %v695_v53, %v694_v56  ;;  %v1044_v5 = vpack.c.bf16 %v2125_v8, %v2125_v8  ;;  %v902_v53 = vsel %vm651_vm3, %v812_v25, 0.0 }
 0x113   :  { %v2151_v56 = vpop.f32.mrf.mxu3  ;;  %v904_v63 = vsel %vm651_vm3, %v813_v36, 0.0 }
 0x114   :  { %v698_v6 = vadd.f32 %v697_v31, %v696_v55  ;;  %v893_v3 = vadd.f32 %v892_v58, %v891_v49  ;;  %v1033_v49 = vpack.c.bf16 %v2149_v40, %v2149_v40  ;;  %1109 = vst.msk [vmem:[%s2393_s4 + $0xe8] sm:$0xf] %vm1050_vm2, %v1044_v5  ;;  %v709_v31 = vsel %vm651_vm3, %v1967_v46, 0.0 }
 0x115   :  { %v816_v46 = vmul.f32 %v2043_v50, %v2043_v50  ;;  %v819_v50 = vmul.f32 %v1709_v62, %v1709_v62 }
 0x116   :  { %v700_v10 = vadd.f32 %v699_v9, %v698_v6  ;;  %v895_v22 = vadd.f32 %v894_v7, %v893_v3  ;;  %1098 = vst.msk [vmem:[%s2393_s4 + $0xbc] sm:$0xf] %vm1050_vm2, %v1033_v49  ;;  %v1045_v6 = vpack.c.bf16 %v2151_v56, %v2151_v56  ;;  %v906_v9 = vsel %vm651_vm3, %v814_v0, 0.0 }
 0x117   :  { %v910_v25 = vsel %vm651_vm3, %v816_v46, 0.0  ;;  %v821_v0 = vmul.f32 %v1758_v12, %v1758_v12 }
 0x118   :  { %v702_v18 = vadd.f32 %v701_v16, %v700_v10  ;;  %v897_v2 = vadd.f32 %v896_v15, %v895_v22  ;;  %1110 = vst.msk [vmem:[%s2393_s4 + $0xec] sm:$0xf] %vm1050_vm2, %v1045_v6  ;;  %v817_v15 = vmul.f32 %v1652_v30, %v1652_v30  ;;  %v908_v16 = vsel %vm651_vm3, %v815_v19, 0.0 }
 0x119   :  { %v822_v19 = vmul.f32 %v1790_v20, %v1790_v20 }
 0x11a   :  { %v704_v26 = vadd.f32 %v703_v24, %v702_v18  ;;  %v899_v11 = vadd.f32 %v898_v35, %v897_v2  ;;  %v715_v35 = vsel %vm651_vm3, %v1652_v30, 0.0  ;;  %v818_v24 = vmul.f32 %v1678_v45, %v1678_v45 }
 0x11b   :  { %v2195_v18 = vpop.f32.mrf.mxu3  ;;  %v719_v30 = vsel %vm651_vm3, %v1709_v62, 0.0 }
 0x11c   :  { %v706_v42 = vadd.f32 %v705_v33, %v704_v26  ;;  %v901_v44 = vadd.f32 %v900_v51, %v899_v11  ;;  %v912_v51 = vsel %vm651_vm3, %v817_v15, 0.0  ;;  %v717_v33 = vsel %vm651_vm3, %v1678_v45, 0.0 }
 0x11d   :  { %v721_v45 = vsel %vm651_vm3, %v1734_v4, 0.0  ;;  %v1046_v49 = vpack.c.bf16 %v2195_v18, %v2195_v18  ;;  %v824_v15 = vmul.f32 %v1854_v39, %v1854_v39 }
 0x11e   :  { %v708_v55 = vadd.f32 %v707_v54, %v706_v42  ;;  %v903_v58 = vadd.f32 %v902_v53, %v901_v44  ;;  %v914_v42 = vsel %vm651_vm3, %v818_v24, 0.0  ;;  %v820_v44 = vmul.f32 %v1734_v4, %v1734_v4 }
 0x11f   :  { %v916_v54 = vsel %vm651_vm3, %v819_v50, 0.0  ;;  %1111 = vst.msk [vmem:[%s2393_s4 + $0xf0] sm:$0xf] %vm1050_vm2, %v1046_v49  ;;  %v827_v50 = vmul.f32 %v1958_v34, %v1958_v34 }
 0x120   :  { %v905_v3 = vadd.f32 %v904_v63, %v903_v58  ;;  %v710_v7 = vadd.f32 %v709_v31, %v708_v55  ;;  %v918_v63 = vsel %vm651_vm3, %v820_v44, 0.0  ;;  %v723_v31 = vsel %vm651_vm3, %v1758_v12, 0.0 }
 0x121   :  { %v823_v12 = vmul.f32 %v1822_v29, %v1822_v29  ;;  %v828_v44 = vmul.f32 %v1989_v21, %v1989_v21 }
 0x122   :  { %v907_v10 = vadd.f32 %v906_v9, %v905_v3  ;;  %v712_v22 = vadd.f32 %v711_v28, %v710_v7  ;;  %v920_v7 = vsel %vm651_vm3, %v821_v0, 0.0  ;;  %v725_v9 = vsel %vm651_vm3, %v1790_v20, 0.0 }
 0x123   :  { %v2219_v55 = vpop.f32.mrf.mxu3 }
 0x124   :  { %v909_v37 = vadd.f32 %v908_v16, %v907_v10  ;;  %v714_v2 = vadd.f32 %v713_v17, %v712_v22  ;;  %v1047_v4 = vpack.c.bf16 %v2219_v55, %v2219_v55  ;;  %v922_v10 = vsel %vm651_vm3, %v822_v19, 0.0 }
 0x125   :  { %v727_v22 = vsel %vm651_vm3, %v1822_v29, 0.0  ;;  %v924_v17 = vsel %vm651_vm3, %v823_v12, 0.0  ;;  %v731_v29 = vsel %vm651_vm3, %v1884_v48, 0.0  ;;  %v743_v12 = vsel %vm651_vm3, %v2123_v59, 0.0 }
 0x126   :  { %v716_v26 = vadd.f32 %v715_v35, %v714_v2  ;;  %v911_v11 = vadd.f32 %v910_v25, %v909_v37  ;;  %1112 = vst.msk [vmem:[%s2393_s4 + $0xf4] sm:$0xf] %vm1050_vm2, %v1047_v4  ;;  %v729_v37 = vsel %vm651_vm3, %v1854_v39, 0.0  ;;  %v825_v2 = vmul.f32 %v1884_v48, %v1884_v48 }
 0x127   :  { %v926_v25 = vsel %vm651_vm3, %v824_v15, 0.0  ;;  %v733_v39 = vsel %vm651_vm3, %v1900_v57, 0.0  ;;  %v735_v48 = vsel %vm651_vm3, %v1958_v34, 0.0  ;;  %v934_v34 = vsel %vm651_vm3, %v828_v44, 0.0 }
 0x128   :  { %v718_v36 = vadd.f32 %v717_v33, %v716_v26  ;;  %v913_v47 = vadd.f32 %v912_v51, %v911_v11  ;;  %v826_v26 = vmul.f32 %v1900_v57, %v1900_v57  ;;  %v928_v33 = vsel %vm651_vm3, %v825_v2, 0.0 }
 0x129   :  { %v737_v57 = vsel %vm651_vm3, %v1989_v21, 0.0  ;;  %v741_v4 = vsel %vm651_vm3, %v2070_v1, 0.0 }
 0x12a   :  { %v720_v5 = vadd.f32 %v719_v30, %v718_v36  ;;  %v915_v53 = vadd.f32 %v914_v42, %v913_v47  ;;  %v930_v30 = vsel %vm651_vm3, %v826_v26, 0.0 }
 0x12b   :  { %v2261_v36 = vpop.f32.mrf.mxu3 }
 0x12c   :  { %v722_v58 = vadd.f32 %v721_v45, %v720_v5  ;;  %v917_v62 = vadd.f32 %v916_v54, %v915_v53  ;;  %v932_v54 = vsel %vm651_vm3, %v827_v50, 0.0  ;;  %v829_v45 = vmul.f32 %v2036_v13, %v2036_v13 }
 0x12d   :  { %v1048_v0 = vpack.c.bf16 %v2261_v36, %v2261_v36 }
 0x12e   :  { %v724_v6 = vadd.f32 %v723_v31, %v722_v58  ;;  %v919_v3 = vadd.f32 %v918_v63, %v917_v62  ;;  %v739_v62 = vsel %vm651_vm3, %v2036_v13, 0.0  ;;  %v830_v63 = vmul.f32 %v2070_v1, %v2070_v1 }
 0x12f   :  { %1113 = vst.msk [vmem:[%s2393_s4 + $0xf8] sm:$0xf] %vm1050_vm2, %v1048_v0  ;;  %v936_v19 = vsel %vm651_vm3, %v829_v45, 0.0  ;;  %v839_v45 = vmul.f32 %v1965_v43, %v1965_v43 }
 0x130   :  { %v726_v28 = vadd.f32 %v725_v9, %v724_v6  ;;  %v921_v46 = vadd.f32 %v920_v7, %v919_v3  ;;  %v831_v6 = vmul.f32 %v2123_v59, %v2123_v59  ;;  %v938_v9 = vsel %vm651_vm3, %v830_v63, 0.0 }
 0x132   :  { %v923_v16 = vadd.f32 %v922_v10, %v921_v46  ;;  %v728_v20 = vadd.f32 %v727_v22, %v726_v28  ;;  %v832_v28 = vmul.f32 %v2149_v40, %v2149_v40  ;;  %v833_v22 = vmul.f32 %v1762_v14, %v1762_v14 }
 0x133   :  { %v2289_v3 = vpop.f32.mrf.mxu3  ;;  %v940_v15 = vsel %vm651_vm3, %v831_v6, 0.0 }
 0x134   :  { %v730_v35 = vadd.f32 %v729_v37, %v728_v20  ;;  %v925_v24 = vadd.f32 %v924_v17, %v923_v16  ;;  %v1049_v46 = vpack.c.bf16 %v2289_v3, %v2289_v3  ;;  %v745_v16 = vsel %vm651_vm3, %v2149_v40, 0.0 }
 0x135   :  { %v747_v17 = vsel %vm651_vm3, %v1762_v14, 0.0  ;;  %v834_v37 = vmul.f32 %v1794_v23, %v1794_v23  ;;  %v942_v2 = vsel %vm651_vm3, %v832_v28, 0.0  ;;  %v749_v40 = vsel %vm651_vm3, %v1794_v23, 0.0 }
 0x136   :  { %v732_v11 = vadd.f32 %v731_v29, %v730_v35  ;;  %v927_v51 = vadd.f32 %v926_v25, %v925_v24  ;;  %1114 = vst.msk [vmem:[%s2393_s4 + $0xfc] sm:$0xf] %vm1050_vm2, %v1049_v46  ;;  %v944_v25 = vsel %vm651_vm3, %v833_v22, 0.0  ;;  %v835_v29 = vmul.f32 %v1826_v32, %v1826_v32 }
 0x137   :  { %v751_v14 = vsel %vm651_vm3, %v1826_v32, 0.0  ;;  %v753_v23 = vsel %vm651_vm3, %v1858_v41, 0.0  ;;  %v755_v32 = vsel %vm651_vm3, %v1886_v52, 0.0  ;;  %v843_v28 = vmul.f32 %v2125_v8, %v2125_v8 }
 0x138   :  { %v734_v47 = vadd.f32 %v733_v39, %v732_v11  ;;  %v929_v42 = vadd.f32 %v928_v33, %v927_v51  ;;  %v946_v51 = vsel %vm651_vm3, %v834_v37, 0.0  ;;  %v836_v33 = vmul.f32 %v1858_v41, %v1858_v41 }
 0x139   :  { %v757_v41 = vsel %vm651_vm3, %v1904_v61, 0.0  ;;  %v844_v22 = vmul.f32 %v2151_v56, %v2151_v56 }
 0x13a   :  { %v736_v5 = vadd.f32 %v735_v48, %v734_v47  ;;  %v931_v53 = vadd.f32 %v930_v30, %v929_v42  ;;  %v948_v47 = vsel %vm651_vm3, %v835_v29, 0.0  ;;  %v837_v42 = vmul.f32 %v1886_v52, %v1886_v52 }
 0x13b   :  { %v950_v44 = vsel %vm651_vm3, %v836_v33, 0.0  ;;  %v759_v52 = vsel %vm651_vm3, %v1965_v43, 0.0  ;;  %v763_v43 = vsel %vm651_vm3, %v2041_v38, 0.0  ;;  %v847_v29 = vmul.f32 %v2261_v36, %v2261_v36 }
 0x13c   :  { %v738_v49 = vadd.f32 %v737_v57, %v736_v5  ;;  %v933_v58 = vadd.f32 %v932_v54, %v931_v53  ;;  %v838_v5 = vmul.f32 %v1904_v61, %v1904_v61  ;;  %v952_v57 = vsel %vm651_vm3, %v837_v42, 0.0 }
 0x13d   :  { %v761_v61 = vsel %vm651_vm3, %v1993_v27, 0.0 }
 0x13e   :  { %v935_v21 = vadd.f32 %v934_v34, %v933_v58  ;;  %v740_v31 = vadd.f32 %v739_v62, %v738_v49  ;;  %v954_v58 = vsel %vm651_vm3, %v838_v5, 0.0  ;;  %v840_v34 = vmul.f32 %v1993_v27, %v1993_v27 }
 0x13f   :  { %v765_v27 = vsel %vm651_vm3, %v2079_v60, 0.0 }
 0x140   :  { %v937_v13 = vadd.f32 %v936_v19, %v935_v21  ;;  %v742_v7 = vadd.f32 %v741_v4, %v740_v31  ;;  %v956_v21 = vsel %vm651_vm3, %v839_v45, 0.0  ;;  %v841_v31 = vmul.f32 %v2041_v38, %v2041_v38 }
 0x141   :  { %v958_v6 = vsel %vm651_vm3, %v840_v34, 0.0  ;;  %v767_v38 = vsel %vm651_vm3, %v2125_v8, 0.0  ;;  %v771_v8 = vsel %vm651_vm3, %v2195_v18, 0.0 }
 0x142   :  { %v939_v10 = vadd.f32 %v938_v9, %v937_v13  ;;  %v744_v1 = vadd.f32 %v743_v12, %v742_v7  ;;  %v842_v13 = vmul.f32 %v2079_v60, %v2079_v60  ;;  %v960_v12 = vsel %vm651_vm3, %v841_v31, 0.0 }
 0x143   :  { %v769_v60 = vsel %vm651_vm3, %v2151_v56, 0.0  ;;  %v773_v56 = vsel %vm651_vm3, %v2219_v55, 0.0 }
 0x144   :  { %v941_v59 = vadd.f32 %v940_v15, %v939_v10  ;;  %v746_v20 = vadd.f32 %v745_v16, %v744_v1  ;;  %v962_v1 = vsel %vm651_vm3, %v842_v13, 0.0 }
 0x146   :  { %v748_v35 = vadd.f32 %v747_v17, %v746_v20  ;;  %v943_v24 = vadd.f32 %v942_v2, %v941_v59  ;;  %v964_v59 = vsel %vm651_vm3, %v843_v28, 0.0  ;;  %v845_v20 = vmul.f32 %v2195_v18, %v2195_v18 }
 0x147   :  { %v966_v2 = vsel %vm651_vm3, %v844_v22, 0.0  ;;  %v775_v18 = vsel %vm651_vm3, %v2261_v36, 0.0 }
 0x148   :  { %v750_v26 = vadd.f32 %v749_v40, %v748_v35  ;;  %v945_v11 = vadd.f32 %v944_v25, %v943_v24  ;;  %v846_v35 = vmul.f32 %v2219_v55, %v2219_v55  ;;  %v968_v40 = vsel %vm651_vm3, %v845_v20, 0.0 }
 0x149   :  { %v777_v55 = vsel %vm651_vm3, %v2289_v3, 0.0 }
 0x14a   :  { %v752_v39 = vadd.f32 %v751_v14, %v750_v26  ;;  %v947_v50 = vadd.f32 %v946_v51, %v945_v11  ;;  %v970_v51 = vsel %vm651_vm3, %v846_v35, 0.0  ;;  %v848_v14 = vmul.f32 %v2289_v3, %v2289_v3 }
 0x14c   :  { %v754_v30 = vadd.f32 %v753_v23, %v752_v39  ;;  %v949_v48 = vadd.f32 %v948_v47, %v947_v50  ;;  %v972_v50 = vsel %vm651_vm3, %v847_v29, 0.0  ;;  %v974_v42 = vsel %vm651_vm3, %v848_v14, 0.0 }
 0x14e   :  { %v756_v53 = vadd.f32 %v755_v32, %v754_v30  ;;  %v951_v54 = vadd.f32 %v950_v44, %v949_v48 }
 0x150   :  { %v758_v0 = vadd.f32 %v757_v41, %v756_v53  ;;  %v953_v49 = vadd.f32 %v952_v57, %v951_v54 }
 0x152   :  { %v955_v62 = vadd.f32 %v954_v58, %v953_v49  ;;  %v760_v63 = vadd.f32 %v759_v52, %v758_v0 }
 0x154   :  { %v762_v19 = vadd.f32 %v761_v61, %v760_v63  ;;  %v957_v4 = vadd.f32 %v956_v21, %v955_v62 }
 0x156   :  { %v764_v7 = vadd.f32 %v763_v43, %v762_v19  ;;  %v959_v9 = vadd.f32 %v958_v6, %v957_v4 }
 0x158   :  { %v766_v46 = vadd.f32 %v765_v27, %v764_v7  ;;  %v961_v10 = vadd.f32 %v960_v12, %v959_v9 }
 0x15a   :  { %v768_v15 = vadd.f32 %v767_v38, %v766_v46  ;;  %v963_v16 = vadd.f32 %v962_v1, %v961_v10 }
 0x15c   :  { %v770_v17 = vadd.f32 %v769_v60, %v768_v15  ;;  %v965_v37 = vadd.f32 %v964_v59, %v963_v16 }
 0x15e   :  { %v967_v24 = vadd.f32 %v966_v2, %v965_v37  ;;  %v772_v25 = vadd.f32 %v771_v8, %v770_v17 }
 0x160   :  { %v969_v26 = vadd.f32 %v968_v40, %v967_v24  ;;  %v774_v11 = vadd.f32 %v773_v56, %v772_v25 }
 0x162   :  { %v971_v33 = vadd.f32 %v970_v51, %v969_v26  ;;  %v776_v39 = vadd.f32 %v775_v18, %v774_v11 }
 0x164   :  { %v973_v47 = vadd.f32 %v972_v50, %v971_v33  ;;  %v778_v23 = vadd.f32 %v777_v55, %v776_v39 }
 0x166   :  { %v779_v30 = vrot.slane %v778_v23, 4  ;;  %v975_v48 = vadd.f32 %v974_v42, %v973_v47 }
 0x168   :  { %v780_v44 = vadd.f32 %v779_v30, %v778_v23  ;;  %v976_v32 = vrot.slane %v975_v48, 4 }
 0x16a   :  { %v781_v5 = vrot.slane %v780_v44, 2  ;;  %v977_v36 = vadd.f32 %v976_v32, %v975_v48 }
 0x16c   :  { %v782_v53 = vadd.f32 %v781_v5, %v780_v44  ;;  %v978_v54 = vrot.slane %v977_v36, 2 }
 0x16e   :  { %v783_v57 = vrot.slane %v782_v53, 1  ;;  %v979_v41 = vadd.f32 %v978_v54, %v977_v36 }
 0x170   :  { %v980_v45 = vrot.slane %v979_v41, 1  ;;  %v784_v0 = vadd.f32 %v783_v57, %v782_v53 }
 0x172   :  { %v981_v49 = vadd.f32 %v980_v45, %v979_v41 }
 0x174   :  { %v983_v3 = vsel %vm982_vm4, %v784_v0, %v981_v49 }
 0x175   :  { %985 = vst.msk [vmem:[%s2394_s5] sm:$0x3] %vm984_vm5, %v983_v3 }

// kernel: bottleneck_forward.7
= control target key start
LH: loop header
LB: loop body
LE: loop exit
PB: predicated region body
PF: predicated region fallthrough
CT: control target
= control target key end

     0   :  { %vm473_vm0 = vcmask 130048   ;;  %s1410_s0 = inlined_call_operand.vmem [shape: bf16[512,16], index: 0, kind: input, shape index: {}]   ;;  %s1411_s2 = inlined_call_operand.vmem [shape: f32[1,16], index: 2, kind: input, shape index: {}]   ;;  %s1412_s3 = inlined_call_operand.vmem [shape: f32[1,16], index: 3, kind: input, shape index: {}]   ;;  %s1413_s1 = inlined_call_operand.vmem [shape: f32[512,16], index: 1, kind: input, shape index: {}]   ;;  %s1414_s4 = inlined_call_operand.vmem [shape: f32[512,16], index: 4, kind: output, shape index: {}]  }
   0x1   :  { %v543_v0 = vld [vmem:[%s1410_s0] sm:$0xff]   ;;  %v670_v5 = vld [vmem:[%s1410_s0 + $0x8] sm:$0xff]   ;;  %v671_v10 = vld [vmem:[%s1410_s0 + $0x10] sm:$0xff]  }
   0x2   :  { %v734_v1 = vld [vmem:[%s1411_s2] ss:$0 sm:$0xff]  ;;  %v544_v2 = vunpack.c.l.bf16 %v543_v0  ;;  %v545_v4 = vunpack.c.h.bf16 %v543_v0  ;;  %v548_v8 = vunpack.c.l.bf16 %v670_v5  ;;  %v549_v9 = vunpack.c.h.bf16 %v670_v5  ;;  %v282_v12 = vld [vmem:[%s1413_s1 + $0x8] sm:$0xff]  ;;  %v672_v15 = vld [vmem:[%s1410_s0 + $0x18] sm:$0xff]  }
   0x3   :  { %v739_v3 = vld [vmem:[%s1412_s3] ss:$0 sm:$0xff]  ;;  %v552_v13 = vunpack.c.l.bf16 %v671_v10  ;;  %v553_v14 = vunpack.c.h.bf16 %v671_v10  ;;  %v283_v20 = vld [vmem:[%s1413_s1 + $0x10] sm:$0xff]  ;;  %v284_v21 = vld [vmem:[%s1413_s1 + $0x18] sm:$0xff]  ;;  %v556_v24 = vunpack.c.l.bf16 %v672_v15  ;;  %v557_v25 = vunpack.c.h.bf16 %v672_v15 }
   0x4   :  { %v149_v6 = vmul.f32 %v734_v1, %v544_v2  ;;  %v150_v7 = vmul.f32 %v734_v1, %v545_v4  ;;  %v281_v11 = vld [vmem:[%s1413_s1] sm:$0xff]  ;;  %v151_v18 = vmul.f32 %v734_v1, %v548_v8  ;;  %v152_v19 = vmul.f32 %v734_v1, %v549_v9  ;;  %v286_v31 = vld [vmem:[%s1413_s1 + $0x28] sm:$0xff]  ;;  %v287_v41 = vld [vmem:[%s1413_s1 + $0x30] sm:$0xff] }
   0x5   :  { %v153_v22 = vmul.f32 %v734_v1, %v552_v13  ;;  %v154_v23 = vmul.f32 %v734_v1, %v553_v14  ;;  %v285_v30 = vld [vmem:[%s1413_s1 + $0x20] sm:$0xff]  ;;  %v155_v34 = vmul.f32 %v734_v1, %v556_v24  ;;  %v156_v35 = vmul.f32 %v734_v1, %v557_v25  ;;  %v288_v42 = vld [vmem:[%s1413_s1 + $0x38] sm:$0xff]  ;;  %v674_v47 = vld [vmem:[%s1410_s0 + $0x28] sm:$0xff]  }
   0x6   :  { %v217_v16 = vadd.f32 %v739_v3, %v149_v6  ;;  %v218_v17 = vadd.f32 %v739_v3, %v150_v7  ;;  %v219_v28 = vadd.f32 %v739_v3, %v151_v18  ;;  %v220_v29 = vadd.f32 %v739_v3, %v152_v19  ;;  %v673_v36 = vld [vmem:[%s1410_s0 + $0x20] sm:$0xff]   ;;  %v675_v52 = vld [vmem:[%s1410_s0 + $0x30] sm:$0xff]   ;;  %v676_v61 = vld [vmem:[%s1410_s0 + $0x38] sm:$0xff]  }
   0x7   :  { %v221_v32 = vadd.f32 %v739_v3, %v153_v22  ;;  %v222_v33 = vadd.f32 %v739_v3, %v154_v23  ;;  %v223_v45 = vadd.f32 %v739_v3, %v155_v34  ;;  %v224_v46 = vadd.f32 %v739_v3, %v156_v35  ;;  %v289_v0 = vld [vmem:[%s1413_s1 + $0x40] sm:$0xff]  ;;  %v290_v2 = vld [vmem:[%s1413_s1 + $0x48] sm:$0xff]  ;;  %v291_v10 = vld [vmem:[%s1413_s1 + $0x50] sm:$0xff] }
   0x8   :  { %v345_v26 = vadd.f32 %v281_v11, %v217_v16  ;;  %v346_v27 = vadd.f32 %v282_v12, %v218_v17  ;;  %v347_v39 = vadd.f32 %v283_v20, %v219_v28  ;;  %v348_v40 = vadd.f32 %v284_v21, %v220_v29  ;;  %v292_v11 = vld [vmem:[%s1413_s1 + $0x58] sm:$0xff]  ;;  %v293_v20 = vld [vmem:[%s1413_s1 + $0x60] sm:$0xff]  ;;  %v294_v21 = vld [vmem:[%s1413_s1 + $0x68] sm:$0xff] }
   0x9   :  { %v349_v43 = vadd.f32 %v285_v30, %v221_v32  ;;  %v350_v44 = vadd.f32 %v286_v31, %v222_v33  ;;  %v560_v50 = vunpack.c.l.bf16 %v673_v36  ;;  %v561_v51 = vunpack.c.h.bf16 %v673_v36  ;;  %v295_v31 = vld [vmem:[%s1413_s1 + $0x70] sm:$0xff]  ;;  %v296_v32 = vld [vmem:[%s1413_s1 + $0x78] sm:$0xff] }
   0xa   :  { %v409_v37 = vmax.f32 %v345_v26, 0.0  ;;  %v410_v38 = vmax.f32 %v346_v27, 0.0  ;;  %v411_v48 = vmax.f32 %v347_v39, 0.0  ;;  %v412_v49 = vmax.f32 %v348_v40, 0.0  ;;  %v677_v26 = vld [vmem:[%s1410_s0 + $0x40] sm:$0xff]  }
   0xb   :  { %v413_v53 = vmax.f32 %v349_v43, 0.0  ;;  %v414_v54 = vmax.f32 %v350_v44, 0.0  ;;  %v351_v55 = vadd.f32 %v287_v41, %v223_v45  ;;  %v352_v56 = vadd.f32 %v288_v42, %v224_v46  ;;  %v679_v42 = vld [vmem:[%s1410_s0 + $0x50] sm:$0xff]  }
   0xc   :  { %474 = vst.msk [vmem:[%s1414_s4] sm:$0xff] %vm473_vm0, %v409_v37  ;;  %v157_v57 = vmul.f32 %v734_v1, %v560_v50  ;;  %v158_v58 = vmul.f32 %v734_v1, %v561_v51  ;;  %v564_v59 = vunpack.c.l.bf16 %v674_v47  ;;  %v565_v60 = vunpack.c.h.bf16 %v674_v47  ;;  %v678_v37 = vld [vmem:[%s1410_s0 + $0x48] sm:$0xff]   ;;  %v680_v51 = vld [vmem:[%s1410_s0 + $0x58] sm:$0xff]  }
   0xd   :  { %475 = vst.msk [vmem:[%s1414_s4 + $0x8] sm:$0xff] %vm473_vm0, %v410_v38  ;;  %v415_v62 = vmax.f32 %v351_v55, 0.0  ;;  %v416_v63 = vmax.f32 %v352_v56, 0.0  ;;  %v568_v4 = vunpack.c.l.bf16 %v675_v52  ;;  %v569_v5 = vunpack.c.h.bf16 %v675_v52  ;;  %v298_v55 = vld [vmem:[%s1413_s1 + $0x88] sm:$0xff] }
   0xe   :  { %476 = vst.msk [vmem:[%s1414_s4 + $0x10] sm:$0xff] %vm473_vm0, %v411_v48  ;;  %v225_v6 = vadd.f32 %v739_v3, %v157_v57  ;;  %v226_v7 = vadd.f32 %v739_v3, %v158_v58  ;;  %v159_v8 = vmul.f32 %v734_v1, %v564_v59  ;;  %v160_v9 = vmul.f32 %v734_v1, %v565_v60 }
   0xf   :  { %477 = vst.msk [vmem:[%s1414_s4 + $0x18] sm:$0xff] %vm473_vm0, %v412_v49  ;;  %v161_v12 = vmul.f32 %v734_v1, %v568_v4  ;;  %v162_v13 = vmul.f32 %v734_v1, %v569_v5  ;;  %v572_v14 = vunpack.c.l.bf16 %v676_v61  ;;  %v573_v15 = vunpack.c.h.bf16 %v676_v61 }
  0x10   :  { %478 = vst.msk [vmem:[%s1414_s4 + $0x20] sm:$0xff] %vm473_vm0, %v413_v53  ;;  %v353_v16 = vadd.f32 %v289_v0, %v225_v6  ;;  %v354_v17 = vadd.f32 %v290_v2, %v226_v7  ;;  %v227_v18 = vadd.f32 %v739_v3, %v159_v8  ;;  %v228_v19 = vadd.f32 %v739_v3, %v160_v9 }
  0x11   :  { %479 = vst.msk [vmem:[%s1414_s4 + $0x28] sm:$0xff] %vm473_vm0, %v414_v54  ;;  %v229_v22 = vadd.f32 %v739_v3, %v161_v12  ;;  %v230_v23 = vadd.f32 %v739_v3, %v162_v13  ;;  %v163_v24 = vmul.f32 %v734_v1, %v572_v14  ;;  %v164_v25 = vmul.f32 %v734_v1, %v573_v15  ;;  %v297_v54 = vld [vmem:[%s1413_s1 + $0x80] sm:$0xff] }
  0x12   :  { %480 = vst.msk [vmem:[%s1414_s4 + $0x30] sm:$0xff] %vm473_vm0, %v415_v62  ;;  %v417_v27 = vmax.f32 %v353_v16, 0.0  ;;  %v418_v28 = vmax.f32 %v354_v17, 0.0  ;;  %v355_v29 = vadd.f32 %v291_v10, %v227_v18  ;;  %v356_v30 = vadd.f32 %v292_v11, %v228_v19  ;;  %v299_v62 = vld [vmem:[%s1413_s1 + $0x90] sm:$0xff]  ;;  %v301_v10 = vld [vmem:[%s1413_s1 + $0xa0] sm:$0xff]  ;;  %v302_v11 = vld [vmem:[%s1413_s1 + $0xa8] sm:$0xff] }
  0x13   :  { %481 = vst.msk [vmem:[%s1414_s4 + $0x38] sm:$0xff] %vm473_vm0, %v416_v63  ;;  %v357_v33 = vadd.f32 %v293_v20, %v229_v22  ;;  %v358_v34 = vadd.f32 %v294_v21, %v230_v23  ;;  %v231_v35 = vadd.f32 %v739_v3, %v163_v24  ;;  %v232_v36 = vadd.f32 %v739_v3, %v164_v25  ;;  %v300_v63 = vld [vmem:[%s1413_s1 + $0x98] sm:$0xff]  ;;  %v681_v16 = vld [vmem:[%s1410_s0 + $0x60] sm:$0xff]   ;;  %v303_v21 = vld [vmem:[%s1413_s1 + $0xb0] sm:$0xff] }
  0x14   :  { %482 = vst.msk [vmem:[%s1414_s4 + $0x40] sm:$0xff] %vm473_vm0, %v417_v27  ;;  %v419_v38 = vmax.f32 %v355_v29, 0.0  ;;  %v420_v39 = vmax.f32 %v356_v30, 0.0  ;;  %v576_v40 = vunpack.c.l.bf16 %v677_v26  ;;  %v577_v41 = vunpack.c.h.bf16 %v677_v26  ;;  %v304_v22 = vld [vmem:[%s1413_s1 + $0xb8] sm:$0xff]  ;;  %v682_v27 = vld [vmem:[%s1410_s0 + $0x68] sm:$0xff]  }
  0x15   :  { %483 = vst.msk [vmem:[%s1414_s4 + $0x48] sm:$0xff] %vm473_vm0, %v418_v28  ;;  %v421_v43 = vmax.f32 %v357_v33, 0.0  ;;  %v422_v44 = vmax.f32 %v358_v34, 0.0  ;;  %v359_v45 = vadd.f32 %v295_v31, %v231_v35  ;;  %v360_v46 = vadd.f32 %v296_v32, %v232_v36  ;;  %v683_v32 = vld [vmem:[%s1410_s0 + $0x70] sm:$0xff]  }
  0x16   :  { %484 = vst.msk [vmem:[%s1414_s4 + $0x50] sm:$0xff] %vm473_vm0, %v419_v38  ;;  %v165_v47 = vmul.f32 %v734_v1, %v576_v40  ;;  %v166_v48 = vmul.f32 %v734_v1, %v577_v41  ;;  %v580_v49 = vunpack.c.l.bf16 %v678_v37  ;;  %v581_v50 = vunpack.c.h.bf16 %v678_v37  ;;  %v684_v41 = vld [vmem:[%s1410_s0 + $0x78] sm:$0xff]  }
  0x17   :  { %485 = vst.msk [vmem:[%s1414_s4 + $0x58] sm:$0xff] %vm473_vm0, %v420_v39  ;;  %v423_v52 = vmax.f32 %v359_v45, 0.0  ;;  %v424_v53 = vmax.f32 %v360_v46, 0.0  ;;  %v584_v56 = vunpack.c.l.bf16 %v679_v42  ;;  %v585_v57 = vunpack.c.h.bf16 %v679_v42  ;;  %v306_v45 = vld [vmem:[%s1413_s1 + $0xc8] sm:$0xff] }
  0x18   :  { %486 = vst.msk [vmem:[%s1414_s4 + $0x60] sm:$0xff] %vm473_vm0, %v421_v43  ;;  %v233_v58 = vadd.f32 %v739_v3, %v165_v47  ;;  %v234_v59 = vadd.f32 %v739_v3, %v166_v48  ;;  %v167_v60 = vmul.f32 %v734_v1, %v580_v49  ;;  %v168_v61 = vmul.f32 %v734_v1, %v581_v50 }
  0x19   :  { %487 = vst.msk [vmem:[%s1414_s4 + $0x68] sm:$0xff] %vm473_vm0, %v422_v44  ;;  %v169_v0 = vmul.f32 %v734_v1, %v584_v56  ;;  %v170_v2 = vmul.f32 %v734_v1, %v585_v57  ;;  %v588_v4 = vunpack.c.l.bf16 %v680_v51  ;;  %v589_v5 = vunpack.c.h.bf16 %v680_v51  ;;  %v305_v44 = vld [vmem:[%s1413_s1 + $0xc0] sm:$0xff] }
  0x1a   :  { %488 = vst.msk [vmem:[%s1414_s4 + $0x70] sm:$0xff] %vm473_vm0, %v423_v52  ;;  %v361_v6 = vadd.f32 %v297_v54, %v233_v58  ;;  %v362_v7 = vadd.f32 %v298_v55, %v234_v59  ;;  %v235_v8 = vadd.f32 %v739_v3, %v167_v60  ;;  %v236_v9 = vadd.f32 %v739_v3, %v168_v61  ;;  %v307_v52 = vld [vmem:[%s1413_s1 + $0xd0] sm:$0xff] }
  0x1b   :  { %489 = vst.msk [vmem:[%s1414_s4 + $0x78] sm:$0xff] %vm473_vm0, %v424_v53  ;;  %v237_v12 = vadd.f32 %v739_v3, %v169_v0  ;;  %v238_v13 = vadd.f32 %v739_v3, %v170_v2  ;;  %v171_v14 = vmul.f32 %v734_v1, %v588_v4  ;;  %v172_v15 = vmul.f32 %v734_v1, %v589_v5  ;;  %v308_v53 = vld [vmem:[%s1413_s1 + $0xd8] sm:$0xff] }
  0x1c   :  { %v425_v17 = vmax.f32 %v361_v6, 0.0  ;;  %v426_v18 = vmax.f32 %v362_v7, 0.0  ;;  %v363_v19 = vadd.f32 %v299_v62, %v235_v8  ;;  %v364_v20 = vadd.f32 %v300_v63, %v236_v9  ;;  %v309_v62 = vld [vmem:[%s1413_s1 + $0xe0] sm:$0xff]  ;;  %v310_v63 = vld [vmem:[%s1413_s1 + $0xe8] sm:$0xff] }
  0x1d   :  { %v365_v23 = vadd.f32 %v301_v10, %v237_v12  ;;  %v366_v24 = vadd.f32 %v302_v11, %v238_v13  ;;  %v239_v25 = vadd.f32 %v739_v3, %v171_v14  ;;  %v240_v26 = vadd.f32 %v739_v3, %v172_v15  ;;  %v685_v6 = vld [vmem:[%s1410_s0 + $0x80] sm:$0xff]   ;;  %v311_v11 = vld [vmem:[%s1413_s1 + $0xf0] sm:$0xff]  ;;  %v312_v12 = vld [vmem:[%s1413_s1 + $0xf8] sm:$0xff] }
  0x1e   :  { %490 = vst.msk [vmem:[%s1414_s4 + $0x80] sm:$0xff] %vm473_vm0, %v425_v17  ;;  %v427_v28 = vmax.f32 %v363_v19, 0.0  ;;  %v428_v29 = vmax.f32 %v364_v20, 0.0  ;;  %v592_v30 = vunpack.c.l.bf16 %v681_v16  ;;  %v593_v31 = vunpack.c.h.bf16 %v681_v16  ;;  %v686_v17 = vld [vmem:[%s1410_s0 + $0x88] sm:$0xff]  }
  0x1f   :  { %491 = vst.msk [vmem:[%s1414_s4 + $0x88] sm:$0xff] %vm473_vm0, %v426_v18  ;;  %v429_v33 = vmax.f32 %v365_v23, 0.0  ;;  %v430_v34 = vmax.f32 %v366_v24, 0.0  ;;  %v367_v35 = vadd.f32 %v303_v21, %v239_v25  ;;  %v368_v36 = vadd.f32 %v304_v22, %v240_v26  ;;  %v687_v22 = vld [vmem:[%s1410_s0 + $0x90] sm:$0xff]  }
  0x20   :  { %492 = vst.msk [vmem:[%s1414_s4 + $0x90] sm:$0xff] %vm473_vm0, %v427_v28  ;;  %v173_v37 = vmul.f32 %v734_v1, %v592_v30  ;;  %v174_v38 = vmul.f32 %v734_v1, %v593_v31  ;;  %v596_v39 = vunpack.c.l.bf16 %v682_v27  ;;  %v597_v40 = vunpack.c.h.bf16 %v682_v27  ;;  %v688_v31 = vld [vmem:[%s1410_s0 + $0x98] sm:$0xff]  }
  0x21   :  { %493 = vst.msk [vmem:[%s1414_s4 + $0x98] sm:$0xff] %vm473_vm0, %v428_v29  ;;  %v431_v42 = vmax.f32 %v367_v35, 0.0  ;;  %v432_v43 = vmax.f32 %v368_v36, 0.0  ;;  %v600_v46 = vunpack.c.l.bf16 %v683_v32  ;;  %v601_v47 = vunpack.c.h.bf16 %v683_v32  ;;  %v314_v35 = vld [vmem:[%s1413_s1 + $0x108] sm:$0xff] }
  0x22   :  { %494 = vst.msk [vmem:[%s1414_s4 + $0xa0] sm:$0xff] %vm473_vm0, %v429_v33  ;;  %v241_v48 = vadd.f32 %v739_v3, %v173_v37  ;;  %v242_v49 = vadd.f32 %v739_v3, %v174_v38  ;;  %v175_v50 = vmul.f32 %v734_v1, %v596_v39  ;;  %v176_v51 = vmul.f32 %v734_v1, %v597_v40 }
  0x23   :  { %495 = vst.msk [vmem:[%s1414_s4 + $0xa8] sm:$0xff] %vm473_vm0, %v430_v34  ;;  %v177_v54 = vmul.f32 %v734_v1, %v600_v46  ;;  %v178_v55 = vmul.f32 %v734_v1, %v601_v47  ;;  %v604_v56 = vunpack.c.l.bf16 %v684_v41  ;;  %v605_v57 = vunpack.c.h.bf16 %v684_v41  ;;  %v313_v34 = vld [vmem:[%s1413_s1 + $0x100] sm:$0xff] }
  0x24   :  { %496 = vst.msk [vmem:[%s1414_s4 + $0xb0] sm:$0xff] %vm473_vm0, %v431_v42  ;;  %v369_v58 = vadd.f32 %v305_v44, %v241_v48  ;;  %v370_v59 = vadd.f32 %v306_v45, %v242_v49  ;;  %v243_v60 = vadd.f32 %v739_v3, %v175_v50  ;;  %v244_v61 = vadd.f32 %v739_v3, %v176_v51  ;;  %v315_v42 = vld [vmem:[%s1413_s1 + $0x110] sm:$0xff] }
  0x25   :  { %497 = vst.msk [vmem:[%s1414_s4 + $0xb8] sm:$0xff] %vm473_vm0, %v432_v43  ;;  %v245_v0 = vadd.f32 %v739_v3, %v177_v54  ;;  %v246_v2 = vadd.f32 %v739_v3, %v178_v55  ;;  %v179_v4 = vmul.f32 %v734_v1, %v604_v56  ;;  %v180_v5 = vmul.f32 %v734_v1, %v605_v57  ;;  %v316_v43 = vld [vmem:[%s1413_s1 + $0x118] sm:$0xff] }
  0x26   :  { %v433_v7 = vmax.f32 %v369_v58, 0.0  ;;  %v434_v8 = vmax.f32 %v370_v59, 0.0  ;;  %v371_v9 = vadd.f32 %v307_v52, %v243_v60  ;;  %v372_v10 = vadd.f32 %v308_v53, %v244_v61  ;;  %v317_v52 = vld [vmem:[%s1413_s1 + $0x120] sm:$0xff]  ;;  %v318_v53 = vld [vmem:[%s1413_s1 + $0x128] sm:$0xff] }
  0x27   :  { %v373_v13 = vadd.f32 %v309_v62, %v245_v0  ;;  %v374_v14 = vadd.f32 %v310_v63, %v246_v2  ;;  %v247_v15 = vadd.f32 %v739_v3, %v179_v4  ;;  %v248_v16 = vadd.f32 %v739_v3, %v180_v5  ;;  %v689_v58 = vld [vmem:[%s1410_s0 + $0xa0] sm:$0xff]   ;;  %v319_v63 = vld [vmem:[%s1413_s1 + $0x130] sm:$0xff]  ;;  %v320_v0 = vld [vmem:[%s1413_s1 + $0x138] sm:$0xff] }
  0x28   :  { %498 = vst.msk [vmem:[%s1414_s4 + $0xc0] sm:$0xff] %vm473_vm0, %v433_v7  ;;  %v435_v18 = vmax.f32 %v371_v9, 0.0  ;;  %v436_v19 = vmax.f32 %v372_v10, 0.0  ;;  %v608_v20 = vunpack.c.l.bf16 %v685_v6  ;;  %v609_v21 = vunpack.c.h.bf16 %v685_v6  ;;  %v690_v7 = vld [vmem:[%s1410_s0 + $0xa8] sm:$0xff]  }
  0x29   :  { %499 = vst.msk [vmem:[%s1414_s4 + $0xc8] sm:$0xff] %vm473_vm0, %v434_v8  ;;  %v437_v23 = vmax.f32 %v373_v13, 0.0  ;;  %v438_v24 = vmax.f32 %v374_v14, 0.0  ;;  %v375_v25 = vadd.f32 %v311_v11, %v247_v15  ;;  %v376_v26 = vadd.f32 %v312_v12, %v248_v16  ;;  %v691_v12 = vld [vmem:[%s1410_s0 + $0xb0] sm:$0xff]  }
  0x2a   :  { %500 = vst.msk [vmem:[%s1414_s4 + $0xd0] sm:$0xff] %vm473_vm0, %v435_v18  ;;  %v181_v27 = vmul.f32 %v734_v1, %v608_v20  ;;  %v182_v28 = vmul.f32 %v734_v1, %v609_v21  ;;  %v612_v29 = vunpack.c.l.bf16 %v686_v17  ;;  %v613_v30 = vunpack.c.h.bf16 %v686_v17  ;;  %v692_v21 = vld [vmem:[%s1410_s0 + $0xb8] sm:$0xff]  }
  0x2b   :  { %501 = vst.msk [vmem:[%s1414_s4 + $0xd8] sm:$0xff] %vm473_vm0, %v436_v19  ;;  %v439_v32 = vmax.f32 %v375_v25, 0.0  ;;  %v440_v33 = vmax.f32 %v376_v26, 0.0  ;;  %v616_v36 = vunpack.c.l.bf16 %v687_v22  ;;  %v617_v37 = vunpack.c.h.bf16 %v687_v22  ;;  %v322_v25 = vld [vmem:[%s1413_s1 + $0x148] sm:$0xff] }
  0x2c   :  { %502 = vst.msk [vmem:[%s1414_s4 + $0xe0] sm:$0xff] %vm473_vm0, %v437_v23  ;;  %v249_v38 = vadd.f32 %v739_v3, %v181_v27  ;;  %v250_v39 = vadd.f32 %v739_v3, %v182_v28  ;;  %v183_v40 = vmul.f32 %v734_v1, %v612_v29  ;;  %v184_v41 = vmul.f32 %v734_v1, %v613_v30 }
  0x2d   :  { %503 = vst.msk [vmem:[%s1414_s4 + $0xe8] sm:$0xff] %vm473_vm0, %v438_v24  ;;  %v185_v44 = vmul.f32 %v734_v1, %v616_v36  ;;  %v186_v45 = vmul.f32 %v734_v1, %v617_v37  ;;  %v620_v46 = vunpack.c.l.bf16 %v688_v31  ;;  %v621_v47 = vunpack.c.h.bf16 %v688_v31  ;;  %v321_v24 = vld [vmem:[%s1413_s1 + $0x140] sm:$0xff] }
  0x2e   :  { %504 = vst.msk [vmem:[%s1414_s4 + $0xf0] sm:$0xff] %vm473_vm0, %v439_v32  ;;  %v377_v48 = vadd.f32 %v313_v34, %v249_v38  ;;  %v378_v49 = vadd.f32 %v314_v35, %v250_v39  ;;  %v251_v50 = vadd.f32 %v739_v3, %v183_v40  ;;  %v252_v51 = vadd.f32 %v739_v3, %v184_v41  ;;  %v323_v32 = vld [vmem:[%s1413_s1 + $0x150] sm:$0xff] }
  0x2f   :  { %505 = vst.msk [vmem:[%s1414_s4 + $0xf8] sm:$0xff] %vm473_vm0, %v440_v33  ;;  %v253_v54 = vadd.f32 %v739_v3, %v185_v44  ;;  %v254_v55 = vadd.f32 %v739_v3, %v186_v45  ;;  %v187_v56 = vmul.f32 %v734_v1, %v620_v46  ;;  %v188_v57 = vmul.f32 %v734_v1, %v621_v47  ;;  %v324_v33 = vld [vmem:[%s1413_s1 + $0x158] sm:$0xff] }
  0x30   :  { %v441_v59 = vmax.f32 %v377_v48, 0.0  ;;  %v442_v60 = vmax.f32 %v378_v49, 0.0  ;;  %v379_v61 = vadd.f32 %v315_v42, %v251_v50  ;;  %v380_v62 = vadd.f32 %v316_v43, %v252_v51  ;;  %v325_v42 = vld [vmem:[%s1413_s1 + $0x160] sm:$0xff]  ;;  %v326_v43 = vld [vmem:[%s1413_s1 + $0x168] sm:$0xff] }
  0x31   :  { %v381_v2 = vadd.f32 %v317_v52, %v253_v54  ;;  %v382_v4 = vadd.f32 %v318_v53, %v254_v55  ;;  %v255_v5 = vadd.f32 %v739_v3, %v187_v56  ;;  %v256_v6 = vadd.f32 %v739_v3, %v188_v57  ;;  %v693_v48 = vld [vmem:[%s1410_s0 + $0xc0] sm:$0xff]   ;;  %v327_v53 = vld [vmem:[%s1413_s1 + $0x170] sm:$0xff]  ;;  %v328_v54 = vld [vmem:[%s1413_s1 + $0x178] sm:$0xff] }
  0x32   :  { %506 = vst.msk [vmem:[%s1414_s4 + $0x100] sm:$0xff] %vm473_vm0, %v441_v59  ;;  %v443_v8 = vmax.f32 %v379_v61, 0.0  ;;  %v444_v9 = vmax.f32 %v380_v62, 0.0  ;;  %v624_v10 = vunpack.c.l.bf16 %v689_v58  ;;  %v625_v11 = vunpack.c.h.bf16 %v689_v58  ;;  %v694_v59 = vld [vmem:[%s1410_s0 + $0xc8] sm:$0xff]  }
  0x33   :  { %507 = vst.msk [vmem:[%s1414_s4 + $0x108] sm:$0xff] %vm473_vm0, %v442_v60  ;;  %v445_v13 = vmax.f32 %v381_v2, 0.0  ;;  %v446_v14 = vmax.f32 %v382_v4, 0.0  ;;  %v383_v15 = vadd.f32 %v319_v63, %v255_v5  ;;  %v384_v16 = vadd.f32 %v320_v0, %v256_v6  ;;  %v695_v0 = vld [vmem:[%s1410_s0 + $0xd0] sm:$0xff]  }
  0x34   :  { %508 = vst.msk [vmem:[%s1414_s4 + $0x110] sm:$0xff] %vm473_vm0, %v443_v8  ;;  %v189_v17 = vmul.f32 %v734_v1, %v624_v10  ;;  %v190_v18 = vmul.f32 %v734_v1, %v625_v11  ;;  %v628_v19 = vunpack.c.l.bf16 %v690_v7  ;;  %v629_v20 = vunpack.c.h.bf16 %v690_v7  ;;  %v696_v11 = vld [vmem:[%s1410_s0 + $0xd8] sm:$0xff]  }
  0x35   :  { %509 = vst.msk [vmem:[%s1414_s4 + $0x118] sm:$0xff] %vm473_vm0, %v444_v9  ;;  %v447_v22 = vmax.f32 %v383_v15, 0.0  ;;  %v448_v23 = vmax.f32 %v384_v16, 0.0  ;;  %v632_v26 = vunpack.c.l.bf16 %v691_v12  ;;  %v633_v27 = vunpack.c.h.bf16 %v691_v12  ;;  %v330_v15 = vld [vmem:[%s1413_s1 + $0x188] sm:$0xff] }
  0x36   :  { %510 = vst.msk [vmem:[%s1414_s4 + $0x120] sm:$0xff] %vm473_vm0, %v445_v13  ;;  %v257_v28 = vadd.f32 %v739_v3, %v189_v17  ;;  %v258_v29 = vadd.f32 %v739_v3, %v190_v18  ;;  %v191_v30 = vmul.f32 %v734_v1, %v628_v19  ;;  %v192_v31 = vmul.f32 %v734_v1, %v629_v20 }
  0x37   :  { %511 = vst.msk [vmem:[%s1414_s4 + $0x128] sm:$0xff] %vm473_vm0, %v446_v14  ;;  %v193_v34 = vmul.f32 %v734_v1, %v632_v26  ;;  %v194_v35 = vmul.f32 %v734_v1, %v633_v27  ;;  %v636_v36 = vunpack.c.l.bf16 %v692_v21  ;;  %v637_v37 = vunpack.c.h.bf16 %v692_v21  ;;  %v329_v14 = vld [vmem:[%s1413_s1 + $0x180] sm:$0xff] }
  0x38   :  { %512 = vst.msk [vmem:[%s1414_s4 + $0x130] sm:$0xff] %vm473_vm0, %v447_v22  ;;  %v385_v38 = vadd.f32 %v321_v24, %v257_v28  ;;  %v386_v39 = vadd.f32 %v322_v25, %v258_v29  ;;  %v259_v40 = vadd.f32 %v739_v3, %v191_v30  ;;  %v260_v41 = vadd.f32 %v739_v3, %v192_v31  ;;  %v331_v22 = vld [vmem:[%s1413_s1 + $0x190] sm:$0xff] }
  0x39   :  { %513 = vst.msk [vmem:[%s1414_s4 + $0x138] sm:$0xff] %vm473_vm0, %v448_v23  ;;  %v261_v44 = vadd.f32 %v739_v3, %v193_v34  ;;  %v262_v45 = vadd.f32 %v739_v3, %v194_v35  ;;  %v195_v46 = vmul.f32 %v734_v1, %v636_v36  ;;  %v196_v47 = vmul.f32 %v734_v1, %v637_v37  ;;  %v332_v23 = vld [vmem:[%s1413_s1 + $0x198] sm:$0xff] }
  0x3a   :  { %v449_v49 = vmax.f32 %v385_v38, 0.0  ;;  %v450_v50 = vmax.f32 %v386_v39, 0.0  ;;  %v387_v51 = vadd.f32 %v323_v32, %v259_v40  ;;  %v388_v52 = vadd.f32 %v324_v33, %v260_v41  ;;  %v333_v32 = vld [vmem:[%s1413_s1 + $0x1a0] sm:$0xff]  ;;  %v334_v33 = vld [vmem:[%s1413_s1 + $0x1a8] sm:$0xff] }
  0x3b   :  { %v389_v55 = vadd.f32 %v325_v42, %v261_v44  ;;  %v390_v56 = vadd.f32 %v326_v43, %v262_v45  ;;  %v263_v57 = vadd.f32 %v739_v3, %v195_v46  ;;  %v264_v58 = vadd.f32 %v739_v3, %v196_v47  ;;  %v697_v38 = vld [vmem:[%s1410_s0 + $0xe0] sm:$0xff]   ;;  %v335_v43 = vld [vmem:[%s1413_s1 + $0x1b0] sm:$0xff]  ;;  %v336_v44 = vld [vmem:[%s1413_s1 + $0x1b8] sm:$0xff] }
  0x3c   :  { %514 = vst.msk [vmem:[%s1414_s4 + $0x140] sm:$0xff] %vm473_vm0, %v449_v49  ;;  %v451_v60 = vmax.f32 %v387_v51, 0.0  ;;  %v452_v61 = vmax.f32 %v388_v52, 0.0  ;;  %v640_v62 = vunpack.c.l.bf16 %v693_v48  ;;  %v641_v63 = vunpack.c.h.bf16 %v693_v48  ;;  %v698_v49 = vld [vmem:[%s1410_s0 + $0xe8] sm:$0xff]  }
  0x3d   :  { %515 = vst.msk [vmem:[%s1414_s4 + $0x148] sm:$0xff] %vm473_vm0, %v450_v50  ;;  %v453_v2 = vmax.f32 %v389_v55, 0.0  ;;  %v454_v4 = vmax.f32 %v390_v56, 0.0  ;;  %v391_v5 = vadd.f32 %v327_v53, %v263_v57  ;;  %v392_v6 = vadd.f32 %v328_v54, %v264_v58  ;;  %v699_v54 = vld [vmem:[%s1410_s0 + $0xf0] sm:$0xff]  }
  0x3e   :  { %516 = vst.msk [vmem:[%s1414_s4 + $0x150] sm:$0xff] %vm473_vm0, %v451_v60  ;;  %v197_v7 = vmul.f32 %v734_v1, %v640_v62  ;;  %v198_v8 = vmul.f32 %v734_v1, %v641_v63  ;;  %v644_v9 = vunpack.c.l.bf16 %v694_v59  ;;  %v645_v10 = vunpack.c.h.bf16 %v694_v59  ;;  %v700_v63 = vld [vmem:[%s1410_s0 + $0xf8] sm:$0xff]  }
  0x3f   :  { %517 = vst.msk [vmem:[%s1414_s4 + $0x158] sm:$0xff] %vm473_vm0, %v452_v61  ;;  %v455_v12 = vmax.f32 %v391_v5, 0.0  ;;  %v456_v13 = vmax.f32 %v392_v6, 0.0  ;;  %v648_v16 = vunpack.c.l.bf16 %v695_v0  ;;  %v649_v17 = vunpack.c.h.bf16 %v695_v0  ;;  %v338_v5 = vld [vmem:[%s1413_s1 + $0x1c8] sm:$0xff] }
  0x40   :  { %518 = vst.msk [vmem:[%s1414_s4 + $0x160] sm:$0xff] %vm473_vm0, %v453_v2  ;;  %v265_v18 = vadd.f32 %v739_v3, %v197_v7  ;;  %v266_v19 = vadd.f32 %v739_v3, %v198_v8  ;;  %v199_v20 = vmul.f32 %v734_v1, %v644_v9  ;;  %v200_v21 = vmul.f32 %v734_v1, %v645_v10 }
  0x41   :  { %519 = vst.msk [vmem:[%s1414_s4 + $0x168] sm:$0xff] %vm473_vm0, %v454_v4  ;;  %v201_v24 = vmul.f32 %v734_v1, %v648_v16  ;;  %v202_v25 = vmul.f32 %v734_v1, %v649_v17  ;;  %v652_v26 = vunpack.c.l.bf16 %v696_v11  ;;  %v653_v27 = vunpack.c.h.bf16 %v696_v11  ;;  %v337_v4 = vld [vmem:[%s1413_s1 + $0x1c0] sm:$0xff] }
  0x42   :  { %520 = vst.msk [vmem:[%s1414_s4 + $0x170] sm:$0xff] %vm473_vm0, %v455_v12  ;;  %v393_v28 = vadd.f32 %v329_v14, %v265_v18  ;;  %v394_v29 = vadd.f32 %v330_v15, %v266_v19  ;;  %v267_v30 = vadd.f32 %v739_v3, %v199_v20  ;;  %v268_v31 = vadd.f32 %v739_v3, %v200_v21  ;;  %v339_v12 = vld [vmem:[%s1413_s1 + $0x1d0] sm:$0xff] }
  0x43   :  { %521 = vst.msk [vmem:[%s1414_s4 + $0x178] sm:$0xff] %vm473_vm0, %v456_v13  ;;  %v269_v34 = vadd.f32 %v739_v3, %v201_v24  ;;  %v270_v35 = vadd.f32 %v739_v3, %v202_v25  ;;  %v203_v36 = vmul.f32 %v734_v1, %v652_v26  ;;  %v204_v37 = vmul.f32 %v734_v1, %v653_v27  ;;  %v340_v13 = vld [vmem:[%s1413_s1 + $0x1d8] sm:$0xff] }
  0x44   :  { %v457_v39 = vmax.f32 %v393_v28, 0.0  ;;  %v458_v40 = vmax.f32 %v394_v29, 0.0  ;;  %v395_v41 = vadd.f32 %v331_v22, %v267_v30  ;;  %v396_v42 = vadd.f32 %v332_v23, %v268_v31  ;;  %v341_v22 = vld [vmem:[%s1413_s1 + $0x1e0] sm:$0xff]  ;;  %v342_v23 = vld [vmem:[%s1413_s1 + $0x1e8] sm:$0xff] }
  0x45   :  { %v397_v45 = vadd.f32 %v333_v32, %v269_v34  ;;  %v398_v46 = vadd.f32 %v334_v33, %v270_v35  ;;  %v271_v47 = vadd.f32 %v739_v3, %v203_v36  ;;  %v272_v48 = vadd.f32 %v739_v3, %v204_v37  ;;  %v343_v32 = vld [vmem:[%s1413_s1 + $0x1f0] sm:$0xff]  ;;  %v344_v33 = vld [vmem:[%s1413_s1 + $0x1f8] sm:$0xff] }
  0x46   :  { %522 = vst.msk [vmem:[%s1414_s4 + $0x180] sm:$0xff] %vm473_vm0, %v457_v39  ;;  %v459_v50 = vmax.f32 %v395_v41, 0.0  ;;  %v460_v51 = vmax.f32 %v396_v42, 0.0  ;;  %v656_v52 = vunpack.c.l.bf16 %v697_v38  ;;  %v657_v53 = vunpack.c.h.bf16 %v697_v38 }
  0x47   :  { %523 = vst.msk [vmem:[%s1414_s4 + $0x188] sm:$0xff] %vm473_vm0, %v458_v40  ;;  %v461_v55 = vmax.f32 %v397_v45, 0.0  ;;  %v462_v56 = vmax.f32 %v398_v46, 0.0  ;;  %v399_v57 = vadd.f32 %v335_v43, %v271_v47  ;;  %v400_v58 = vadd.f32 %v336_v44, %v272_v48 }
  0x48   :  { %524 = vst.msk [vmem:[%s1414_s4 + $0x190] sm:$0xff] %vm473_vm0, %v459_v50  ;;  %v205_v59 = vmul.f32 %v734_v1, %v656_v52  ;;  %v206_v60 = vmul.f32 %v734_v1, %v657_v53  ;;  %v660_v61 = vunpack.c.l.bf16 %v698_v49  ;;  %v661_v62 = vunpack.c.h.bf16 %v698_v49 }
  0x49   :  { %525 = vst.msk [vmem:[%s1414_s4 + $0x198] sm:$0xff] %vm473_vm0, %v460_v51  ;;  %v463_v0 = vmax.f32 %v399_v57, 0.0  ;;  %v464_v2 = vmax.f32 %v400_v58, 0.0  ;;  %v664_v6 = vunpack.c.l.bf16 %v699_v54  ;;  %v665_v7 = vunpack.c.h.bf16 %v699_v54 }
  0x4a   :  { %526 = vst.msk [vmem:[%s1414_s4 + $0x1a0] sm:$0xff] %vm473_vm0, %v461_v55  ;;  %v273_v8 = vadd.f32 %v739_v3, %v205_v59  ;;  %v274_v9 = vadd.f32 %v739_v3, %v206_v60  ;;  %v207_v10 = vmul.f32 %v734_v1, %v660_v61  ;;  %v208_v11 = vmul.f32 %v734_v1, %v661_v62 }
  0x4b   :  { %527 = vst.msk [vmem:[%s1414_s4 + $0x1a8] sm:$0xff] %vm473_vm0, %v462_v56  ;;  %v209_v14 = vmul.f32 %v734_v1, %v664_v6  ;;  %v210_v15 = vmul.f32 %v734_v1, %v665_v7  ;;  %v668_v16 = vunpack.c.l.bf16 %v700_v63  ;;  %v669_v17 = vunpack.c.h.bf16 %v700_v63 }
  0x4c   :  { %528 = vst.msk [vmem:[%s1414_s4 + $0x1b0] sm:$0xff] %vm473_vm0, %v463_v0  ;;  %v401_v18 = vadd.f32 %v337_v4, %v273_v8  ;;  %v402_v19 = vadd.f32 %v338_v5, %v274_v9  ;;  %v275_v20 = vadd.f32 %v739_v3, %v207_v10  ;;  %v276_v21 = vadd.f32 %v739_v3, %v208_v11 }
  0x4d   :  { %529 = vst.msk [vmem:[%s1414_s4 + $0x1b8] sm:$0xff] %vm473_vm0, %v464_v2  ;;  %v277_v24 = vadd.f32 %v739_v3, %v209_v14  ;;  %v278_v25 = vadd.f32 %v739_v3, %v210_v15  ;;  %v211_v26 = vmul.f32 %v734_v1, %v668_v16  ;;  %v212_v27 = vmul.f32 %v734_v1, %v669_v17 }
  0x4e   :  { %v465_v28 = vmax.f32 %v401_v18, 0.0  ;;  %v466_v29 = vmax.f32 %v402_v19, 0.0  ;;  %v403_v30 = vadd.f32 %v339_v12, %v275_v20  ;;  %v404_v31 = vadd.f32 %v340_v13, %v276_v21 }
  0x4f   :  { %v405_v34 = vadd.f32 %v341_v22, %v277_v24  ;;  %v406_v35 = vadd.f32 %v342_v23, %v278_v25  ;;  %v279_v36 = vadd.f32 %v739_v3, %v211_v26  ;;  %v280_v37 = vadd.f32 %v739_v3, %v212_v27 }
  0x50   :  { %530 = vst.msk [vmem:[%s1414_s4 + $0x1c0] sm:$0xff] %vm473_vm0, %v465_v28  ;;  %v467_v1 = vmax.f32 %v403_v30, 0.0  ;;  %v468_v38 = vmax.f32 %v404_v31, 0.0 }
  0x51   :  { %531 = vst.msk [vmem:[%s1414_s4 + $0x1c8] sm:$0xff] %vm473_vm0, %v466_v29  ;;  %v469_v39 = vmax.f32 %v405_v34, 0.0  ;;  %v470_v40 = vmax.f32 %v406_v35, 0.0  ;;  %v407_v41 = vadd.f32 %v343_v32, %v279_v36  ;;  %v408_v42 = vadd.f32 %v344_v33, %v280_v37 }
  0x52   :  { %532 = vst.msk [vmem:[%s1414_s4 + $0x1d0] sm:$0xff] %vm473_vm0, %v467_v1 }
  0x53   :  { %533 = vst.msk [vmem:[%s1414_s4 + $0x1d8] sm:$0xff] %vm473_vm0, %v468_v38  ;;  %v471_v3 = vmax.f32 %v407_v41, 0.0  ;;  %v472_v43 = vmax.f32 %v408_v42, 0.0 }
  0x54   :  { %534 = vst.msk [vmem:[%s1414_s4 + $0x1e0] sm:$0xff] %vm473_vm0, %v469_v39 }
  0x55   :  { %535 = vst.msk [vmem:[%s1414_s4 + $0x1e8] sm:$0xff] %vm473_vm0, %v470_v40 }
  0x56   :  { %536 = vst.msk [vmem:[%s1414_s4 + $0x1f0] sm:$0xff] %vm473_vm0, %v471_v3 }
  0x57   :  { %537 = vst.msk [vmem:[%s1414_s4 + $0x1f8] sm:$0xff] %vm473_vm0, %v472_v43 }

// kernel: bottleneck_forward.5
= control target key start
LH: loop header
LB: loop body
LE: loop exit
PB: predicated region body
PF: predicated region fallthrough
CT: control target
= control target key end

     0   :  { %s3279_s18 = smov 0   ;;  %s4672_s0 = inlined_call_operand.vmem [shape: bf16[512,4], index: 0, kind: input, shape index: {}]   ;;  %s4673_s1 = inlined_call_operand.vmem [shape: f32[1,4], index: 1, kind: input, shape index: {}]   ;;  %s4674_s2 = inlined_call_operand.vmem [shape: f32[1,4], index: 2, kind: input, shape index: {}]   ;;  %s4675_s3 = inlined_call_operand.vmem [shape: bf16[3,12,4], index: 3, kind: input, shape index: {}]   ;;  %s4676_s4 = inlined_call_operand.vmem [shape: bf16[512,4], index: 4, kind: output, shape index: {0}]   ;;  %s4677_s5 = inlined_call_operand.vmem [shape: f32[2,2,4], index: 5, kind: output, shape index: {1}]  }
   0x1 LB: > { %s3285_s19 = sadd.s32 4294967295, %s3244_s18   ;;  %p2588_p0 = scmp.ge.s32.totalorder %s3244_s18, 1  ;;  %s3244_s18 = sphi %s3279_s18, %s16_s18  }
   0x2   : > { %p191_p1 = scmp.lt.s32.totalorder %s3244_s18, 3 }
   0x4   : > { %p192_p2 = pnand %p2588_p0, %p191_p1 }
   0x6   : > { %195 = sbr.rel (%p192_p2) target bundleno = 622 (0x26e), region = 36 }
   0xb   : > { %vm408_vm0 = vcmask 31744   ;;  %v3246_v0 = vmov 0.0   ;;  %s2589_s20 = sshll.u32 %s3285_s19, 5  ;;  %s3247_s21 = smov 4   ;;  %v3356_v7 = vld [vmem:[%s4673_s1] ss:$0 sm:$0xff] }
   0xc   : > { %410 = vst.msk [vmem:[#allocation2 + $0x8] sm:$0xff] %vm408_vm0, %v3246_v0  ;;  %p224_p3 = scmp.lt.s32.totalorder %s2589_s20, 63  ;;  %v3372_v16 = vld [vmem:[%s4674_s2] ss:$0 sm:$0xff]  ;;  %s3248_s30 = smov 8   ;;  %vm1407_vm1 = vcmask 1045504  }
   0xd   : > { %411 = vst.msk [vmem:[#allocation2 + $0x10] sm:$0xff] %vm408_vm0, %v3246_v0  ;;  %vm867_vm2 = vcmask 64512   ;;  %vm1358_vm3 = vcmask 97280   ;;  %vm2464_vm4 = vcmask 27648   ;;  %p235_p4 = scmp.lt.s32.totalorder %s3285_s19, 1  ;;  %vm2428_vm5 = vcmask 1040384  }
   0xe   : > { %409 = vst.msk [vmem:[#allocation2] sm:$0xff] %vm408_vm0, %v3246_v0  ;;  %s4718_s20 = smov (!%p224_p3, %s2589_s20), 63  ;;  %vm2430_vm6 = vcmask 25600  }
   0xf   : > { %412 = vst.msk [vmem:[#allocation2 + $0x18] sm:$0xff] %vm408_vm0, %v3246_v0  ;;  %s2590_s22 = sshll.u32 %s4718_s20, 2  ;;  %s4720_s19 = smov (!%p235_p4, %s3285_s19), 1 }
  0x10   : > { %414 = vst.msk [vmem:[#allocation2 + $0x220] sm:$0xff] %vm408_vm0, %v3246_v0  ;;  %s3337_s25 = scalar_lea.vmem %s4672_s0, %s2590_s22  ;;  %s4314_s24 = scalar_lea.vmem %s4676_s4, %s2590_s22 }
  0x11   : > { %415 = vst.msk [vmem:[#allocation2 + $0x228] sm:$0xff] %vm408_vm0, %v3246_v0  ;;  %v2729_v4 = vld [vmem:[%s3337_s25 + $0x18] sm:$0xff]   ;;  %v2727_v5 = vld [vmem:[%s3337_s25 + $0x8] sm:$0xff]   ;;  %v2664_v8 = vld [vmem:[%s3337_s25] sm:$0xff]   ;;  %s2593_s20 = sshll.u32 %s4720_s19, 1 }
  0x12   : > { %416 = vst.msk [vmem:[#allocation2 + $0x230] sm:$0xff] %vm408_vm0, %v3246_v0  ;;  %v2677_v6 = vunpack.c.l.bf16 %v2729_v4  ;;  %v2678_v9 = vunpack.c.h.bf16 %v2729_v4  ;;  %v2669_v10 = vunpack.c.l.bf16 %v2727_v5  ;;  %v2670_v11 = vunpack.c.h.bf16 %v2727_v5  ;;  %v2730_v14 = vld [vmem:[%s3337_s25 + $0x20] sm:$0xff]   ;;  %v2728_v18 = vld [vmem:[%s3337_s25 + $0x10] sm:$0xff]   ;;  %v2731_v22 = vld [vmem:[%s3337_s25 + $0x28] sm:$0xff]   ;;  %s238_s26 = scalar_lea.vmem %s4677_s5, %s2593_s20 }
  0x13   : > { %v515_v1 = vld [vmem:[#allocation2 + $0x8] sm:$0xff]  ;;  %417 = vst.msk [vmem:[#allocation2 + $0x238] sm:$0xff] %vm408_vm0, %v3246_v0  ;;  %v2665_v12 = vunpack.c.l.bf16 %v2664_v8  ;;  %v2666_v13 = vunpack.c.h.bf16 %v2664_v8  ;;  %v2681_v21 = vunpack.c.l.bf16 %v2730_v14  ;;  %v2682_v25 = vunpack.c.h.bf16 %v2730_v14  ;;  %v2733_v28 = vld [vmem:[%s3337_s25 + $0x38] sm:$0xff]   ;;  %v2732_v32 = vld [vmem:[%s3337_s25 + $0x30] sm:$0xff]  }
  0x14   : > { %v516_v2 = vld [vmem:[#allocation2 + $0x10] sm:$0xff]  ;;  %419 = vst.msk [vmem:[#allocation2 + $0x20] sm:$0xff] %vm408_vm0, %v3246_v0  ;;  %v314_v15 = vmul.f32 %v3356_v7, %v2677_v6  ;;  %v315_v17 = vmul.f32 %v3356_v7, %v2678_v9  ;;  %v310_v19 = vmul.f32 %v3356_v7, %v2669_v10  ;;  %v311_v20 = vmul.f32 %v3356_v7, %v2670_v11  ;;  %v2734_v41 = vld [vmem:[%s3337_s25 + $0x40] sm:$0xff]  }
  0x15   : > { %v2756_v3 = vpack.i.bf16 %v516_v2, %v515_v1  ;;  %420 = vst.msk [vmem:[#allocation2 + $0x40] sm:$0xff] %vm408_vm0, %v3246_v0  ;;  %v308_v23 = vmul.f32 %v3356_v7, %v2665_v12  ;;  %v309_v24 = vmul.f32 %v3356_v7, %v2666_v13  ;;  %v2673_v27 = vunpack.c.l.bf16 %v2728_v18  ;;  %v2736_v58 = vld [vmem:[%s3337_s25 + $0x50] sm:$0xff]   ;;  %v2737_v13 = vld [vmem:[%s3337_s25 + $0x58] sm:$0xff]  }
  0x16   : > { %421 = vst.msk [vmem:[#allocation2 + $0x60] sm:$0xff] %vm408_vm0, %v3246_v0  ;;  %v350_v26 = vadd.f32 %v3372_v16, %v314_v15  ;;  %v351_v29 = vadd.f32 %v3372_v16, %v315_v17  ;;  %v2674_v30 = vunpack.c.h.bf16 %v2728_v18  ;;  %v2685_v31 = vunpack.c.l.bf16 %v2731_v22 }
  0x17   : > { %2757 = vrot.lane.b32.xlu0 %v2756_v3, %s3247_s21  ;;  %422 = vst.msk [vmem:[#allocation2 + $0x80] sm:$0xff] %vm408_vm0, %v3246_v0  ;;  %v346_v33 = vadd.f32 %v3372_v16, %v310_v19  ;;  %v347_v34 = vadd.f32 %v3372_v16, %v311_v20  ;;  %v316_v35 = vmul.f32 %v3356_v7, %v2681_v21  ;;  %v2686_v36 = vunpack.c.h.bf16 %v2731_v22  ;;  %v2735_v3 = vld [vmem:[%s3337_s25 + $0x48] sm:$0xff]  }
  0x18   : > { %423 = vst.msk [vmem:[#allocation2 + $0xa0] sm:$0xff] %vm408_vm0, %v3246_v0  ;;  %v344_v37 = vadd.f32 %v3372_v16, %v308_v23  ;;  %v345_v38 = vadd.f32 %v3372_v16, %v309_v24  ;;  %v317_v39 = vmul.f32 %v3356_v7, %v2682_v25  ;;  %v2693_v40 = vunpack.c.l.bf16 %v2733_v28  ;;  %v2739_v23 = vld [vmem:[%s3337_s25 + $0x68] sm:$0xff]  }
  0x19   : > { %424 = vst.msk [vmem:[#allocation2 + $0xc0] sm:$0xff] %vm408_vm0, %v3246_v0  ;;  %v382_v42 = vmax.f32 %v350_v26, 0.0  ;;  %v312_v43 = vmul.f32 %v3356_v7, %v2673_v27  ;;  %v2694_v44 = vunpack.c.h.bf16 %v2733_v28  ;;  %v2689_v45 = vunpack.c.l.bf16 %v2732_v32 }
  0x1a   : > { %425 = vst.msk [vmem:[#allocation2 + $0xe0] sm:$0xff] %vm408_vm0, %v3246_v0  ;;  %v383_v46 = vmax.f32 %v351_v29, 0.0  ;;  %v313_v47 = vmul.f32 %v3356_v7, %v2674_v30  ;;  %v318_v48 = vmul.f32 %v3356_v7, %v2685_v31  ;;  %v2690_v49 = vunpack.c.h.bf16 %v2732_v32 }
  0x1b   : > { %426 = vst.msk [vmem:[#allocation2 + $0x100] sm:$0xff] %vm408_vm0, %v3246_v0  ;;  %v378_v50 = vmax.f32 %v346_v33, 0.0  ;;  %v352_v51 = vadd.f32 %v3372_v16, %v316_v35  ;;  %v319_v52 = vmul.f32 %v3356_v7, %v2686_v36  ;;  %v2697_v53 = vunpack.c.l.bf16 %v2734_v41  ;;  %v2738_v33 = vld [vmem:[%s3337_s25 + $0x60] sm:$0xff]  }
  0x1c   : > { %427 = vst.msk [vmem:[#allocation2 + $0x120] sm:$0xff] %vm408_vm0, %v3246_v0  ;;  %v379_v54 = vmax.f32 %v347_v34, 0.0  ;;  %v353_v55 = vadd.f32 %v3372_v16, %v317_v39  ;;  %v322_v56 = vmul.f32 %v3356_v7, %v2693_v40  ;;  %v2698_v57 = vunpack.c.h.bf16 %v2734_v41 }
  0x1d   : > { %428 = vst.msk [vmem:[#allocation2 + $0x140] sm:$0xff] %vm408_vm0, %v3246_v0  ;;  %v376_v59 = vmax.f32 %v344_v37, 0.0  ;;  %v348_v60 = vadd.f32 %v3372_v16, %v312_v43  ;;  %v323_v61 = vmul.f32 %v3356_v7, %v2694_v44  ;;  %v320_v62 = vmul.f32 %v3356_v7, %v2689_v45  ;;  %v2740_v44 = vld [vmem:[%s3337_s25 + $0x70] sm:$0xff]  }
  0x1e   : > { %429 = vst.msk [vmem:[#allocation2 + $0x160] sm:$0xff] %vm408_vm0, %v3246_v0  ;;  %v377_v63 = vmax.f32 %v345_v38, 0.0  ;;  %v354_v1 = vadd.f32 %v3372_v16, %v318_v48  ;;  %v321_v2 = vmul.f32 %v3356_v7, %v2690_v49  ;;  %v384_v4 = vmax.f32 %v352_v51, 0.0 }
  0x1f   : > { %430 = vst.msk [vmem:[#allocation2 + $0x180] sm:$0xff] %vm408_vm0, %v3246_v0  ;;  %v355_v5 = vadd.f32 %v3372_v16, %v319_v52  ;;  %v324_v6 = vmul.f32 %v3356_v7, %v2697_v53  ;;  %v2705_v8 = vunpack.c.l.bf16 %v2736_v58  ;;  %v385_v9 = vmax.f32 %v353_v55, 0.0 }
  0x20   : > { %431 = vst.msk [vmem:[#allocation2 + $0x1a0] sm:$0xff] %vm408_vm0, %v3246_v0  ;;  %v358_v10 = vadd.f32 %v3372_v16, %v322_v56  ;;  %v325_v11 = vmul.f32 %v3356_v7, %v2698_v57  ;;  %v2706_v12 = vunpack.c.h.bf16 %v2736_v58  ;;  %v380_v14 = vmax.f32 %v348_v60, 0.0 }
  0x21   : > { %432 = vst.msk [vmem:[#allocation2 + $0x1c0] sm:$0xff] %vm408_vm0, %v3246_v0  ;;  %v359_v15 = vadd.f32 %v3372_v16, %v323_v61  ;;  %v356_v17 = vadd.f32 %v3372_v16, %v320_v62  ;;  %v2701_v18 = vunpack.c.l.bf16 %v2735_v3  ;;  %v386_v20 = vmax.f32 %v354_v1, 0.0 }
  0x22   : > { %433 = vst.msk [vmem:[#allocation2 + $0x1e0] sm:$0xff] %vm408_vm0, %v3246_v0  ;;  %v3443_v21 = vadd.f32 %v3372_v16, %v321_v2  ;;  %v2702_v22 = vunpack.c.h.bf16 %v2735_v3  ;;  %v387_v24 = vmax.f32 %v355_v5, 0.0  ;;  %v3448_v25 = vadd.f32 %v3372_v16, %v324_v6 }
  0x23   : > { %434 = vst.msk [vmem:[#allocation2 + $0x200] sm:$0xff] %vm408_vm0, %v3246_v0  ;;  %v328_v26 = vmul.f32 %v3356_v7, %v2705_v8  ;;  %v2709_v27 = vunpack.c.l.bf16 %v2737_v13  ;;  %v390_v29 = vmax.f32 %v358_v10, 0.0  ;;  %v3453_v30 = vadd.f32 %v3372_v16, %v325_v11 }
  0x24   : > { %435 = vst.msk [vmem:[#allocation2 + $0x38] sm:$0xff] %vm408_vm0, %v3246_v0  ;;  %v329_v31 = vmul.f32 %v3356_v7, %v2706_v12  ;;  %v2710_v32 = vunpack.c.h.bf16 %v2737_v13  ;;  %v391_v35 = vmax.f32 %v359_v15, 0.0  ;;  %v388_v36 = vmax.f32 %v356_v17, 0.0 }
  0x25   : > { %436 = vst.msk [vmem:[#allocation2 + $0x58] sm:$0xff] %vm408_vm0, %v3246_v0  ;;  %v326_v37 = vmul.f32 %v3356_v7, %v2701_v18  ;;  %v2717_v38 = vunpack.c.l.bf16 %v2739_v23  ;;  %v389_v41 = vmax.f32 %v3443_v21, 0.0  ;;  %v2718_v43 = vunpack.c.h.bf16 %v2739_v23 }
  0x26   : > { %437 = vst.msk [vmem:[#allocation2 + $0x78] sm:$0xff] %vm408_vm0, %v3246_v0  ;;  %v330_v48 = vmul.f32 %v3356_v7, %v2709_v27  ;;  %v2713_v49 = vunpack.c.l.bf16 %v2738_v33  ;;  %v365_v52 = vadd.f32 %v3372_v16, %v329_v31  ;;  %v331_v53 = vmul.f32 %v3356_v7, %v2710_v32 }
  0x27   : > { %438 = vst.msk [vmem:[#allocation2 + $0x98] sm:$0xff] %vm408_vm0, %v3246_v0  ;;  %v393_v56 = vmax.f32 %v3453_v30, 0.0  ;;  %v362_v57 = vadd.f32 %v3372_v16, %v326_v37  ;;  %v334_v58 = vmul.f32 %v3356_v7, %v2717_v38 }
  0x28   : > { %439 = vst.msk [vmem:[#allocation2 + $0xb8] sm:$0xff] %vm408_vm0, %v3246_v0  ;;  %v366_v3 = vadd.f32 %v3372_v16, %v330_v48  ;;  %v397_v8 = vmax.f32 %v365_v52, 0.0 }
  0x29   : > { %440 = vst.msk [vmem:[#allocation2 + $0xd8] sm:$0xff] %vm408_vm0, %v3246_v0  ;;  %v394_v12 = vmax.f32 %v362_v57, 0.0  ;;  %v370_v13 = vadd.f32 %v3372_v16, %v334_v58 }
  0x2a   : > { %441 = vst.msk [vmem:[#allocation2 + $0xf8] sm:$0xff] %vm408_vm0, %v3246_v0 }
  0x2b   : > { %442 = vst.msk [vmem:[#allocation2 + $0x118] sm:$0xff] %vm408_vm0, %v3246_v0 }
  0x2c   : > { %443 = vst.msk [vmem:[#allocation2 + $0x138] sm:$0xff] %vm408_vm0, %v3246_v0 }
  0x2d   : > { %444 = vst.msk [vmem:[#allocation2 + $0x158] sm:$0xff] %vm408_vm0, %v3246_v0 }
  0x2e   : > { %445 = vst.msk [vmem:[#allocation2 + $0x178] sm:$0xff] %vm408_vm0, %v3246_v0 }
  0x2f   : > { %446 = vst.msk [vmem:[#allocation2 + $0x198] sm:$0xff] %vm408_vm0, %v3246_v0 }
  0x30   : > { %447 = vst.msk [vmem:[#allocation2 + $0x1b8] sm:$0xff] %vm408_vm0, %v3246_v0 }
  0x31   : > { %448 = vst.msk [vmem:[#allocation2 + $0x1d8] sm:$0xff] %vm408_vm0, %v3246_v0 }
  0x32   : > { %449 = vst.msk [vmem:[#allocation2 + $0x1f8] sm:$0xff] %vm408_vm0, %v3246_v0 }
  0x33   : > { %450 = vst.msk [vmem:[#allocation2 + $0x218] sm:$0xff] %vm408_vm0, %v3246_v0  ;;  %v349_v0 = vadd.f32 %v3372_v16, %v313_v47  ;;  %v364_v47 = vadd.f32 %v3372_v16, %v328_v26 }
  0x34   : > { %457 = vst.msk [vmem:[#allocation2 + $0x88] sm:$0xff] %vm408_vm0, %v382_v42  ;;  %v327_v42 = vmul.f32 %v3356_v7, %v2702_v22  ;;  %v398_v22 = vmax.f32 %v366_v3, 0.0  ;;  %v547_v3 = vld [vmem:[#allocation2 + $0x9] sm:$0xff] }
  0x35   : > { %458 = vst.msk [vmem:[#allocation2 + $0x90] sm:$0xff] %vm408_vm0, %v383_v46  ;;  %v381_v19 = vmax.f32 %v349_v0, 0.0  ;;  %v392_v46 = vmax.f32 %v3448_v25, 0.0  ;;  %v2722_v0 = vunpack.c.h.bf16 %v2740_v44  ;;  %v396_v2 = vmax.f32 %v364_v47, 0.0 }
  0x36   : > { %453 = vst.msk [vmem:[#allocation2 + $0x48] sm:$0xff] %vm408_vm0, %v378_v50  ;;  %v363_v62 = vadd.f32 %v3372_v16, %v327_v42 }
  0x37   : > { %454 = vst.msk [vmem:[#allocation2 + $0x50] sm:$0xff] %vm408_vm0, %v379_v54  ;;  %v2714_v54 = vunpack.c.h.bf16 %v2738_v33 }
  0x38   : > { %451 = vst.msk [vmem:[#allocation2 + $0x28] sm:$0xff] %vm408_vm0, %v376_v59  ;;  %v2721_v59 = vunpack.c.l.bf16 %v2740_v44  ;;  %v395_v18 = vmax.f32 %v363_v62, 0.0 }
  0x39   : > { %452 = vst.msk [vmem:[#allocation2 + $0x30] sm:$0xff] %vm408_vm0, %v377_v63  ;;  %v335_v63 = vmul.f32 %v3356_v7, %v2718_v43  ;;  %v333_v10 = vmul.f32 %v3356_v7, %v2714_v54 }
  0x3a   : > { %459 = vst.msk [vmem:[#allocation2 + $0xa8] sm:$0xff] %vm408_vm0, %v384_v4  ;;  %v332_v4 = vmul.f32 %v3356_v7, %v2713_v49 }
  0x3b   : > { %v523_v28 = vld [vmem:[#allocation2 + $0x88] sm:$0xff]  ;;  %460 = vst.msk [vmem:[#allocation2 + $0xb0] sm:$0xff] %vm408_vm0, %v385_v9  ;;  %v367_v9 = vadd.f32 %v3372_v16, %v331_v53  ;;  %v369_v26 = vadd.f32 %v3372_v16, %v333_v10 }
  0x3c   : > { %v524_v34 = vld [vmem:[#allocation2 + $0x90] sm:$0xff]  ;;  %455 = vst.msk [vmem:[#allocation2 + $0x68] sm:$0xff] %vm408_vm0, %v380_v14  ;;  %v336_v14 = vmul.f32 %v3356_v7, %v2721_v59  ;;  %v368_v23 = vadd.f32 %v3372_v16, %v332_v4 }
  0x3d   : > { %v3459_v39 = vpack.i.bf16 %v524_v34, %v523_v28  ;;  %v519_v40 = vld [vmem:[#allocation2 + $0x48] sm:$0xff]  ;;  %456 = vst.msk [vmem:[#allocation2 + $0x70] sm:$0xff] %vm408_vm0, %v381_v19  ;;  %v371_v19 = vadd.f32 %v3372_v16, %v335_v63  ;;  %v399_v25 = vmax.f32 %v367_v9, 0.0  ;;  %v401_v37 = vmax.f32 %v369_v26, 0.0  ;;  %v548_v4 = vld [vmem:[#allocation2 + $0x11] sm:$0xff] }
  0x3e   : > { %v520_v45 = vld [vmem:[#allocation2 + $0x50] sm:$0xff]  ;;  %461 = vst.msk [vmem:[#allocation2 + $0xc8] sm:$0xff] %vm408_vm0, %v386_v20  ;;  %v337_v20 = vmul.f32 %v3356_v7, %v2722_v0  ;;  %v372_v30 = vadd.f32 %v3372_v16, %v336_v14  ;;  %v2836_v10 = vpack.i.bf16 %v548_v4, %v547_v3 }
  0x3f   : > { %2777 = vrot.lane.b32.xlu2 %v3459_v39, %s3247_s21  ;;  %v3471_v50 = vpack.i.bf16 %v520_v45, %v519_v40  ;;  %v517_v51 = vld [vmem:[#allocation2 + $0x28] sm:$0xff]  ;;  %462 = vst.msk [vmem:[#allocation2 + $0xd0] sm:$0xff] %vm408_vm0, %v387_v24  ;;  %v403_v31 = vmax.f32 %v371_v19, 0.0  ;;  %v3564_v9 = vld [vmem:[#allocation2 + $0x51] sm:$0xff] }
  0x40   : > { %v518_v55 = vld [vmem:[#allocation2 + $0x30] sm:$0xff]  ;;  %465 = vst.msk [vmem:[#allocation2 + $0x108] sm:$0xff] %vm408_vm0, %v390_v29  ;;  %v402_v29 = vmax.f32 %v370_v13, 0.0  ;;  %v373_v32 = vadd.f32 %v3372_v16, %v337_v20 }
  0x41   : > { %2767 = vrot.lane.b32.xlu1 %v3471_v50, %s3247_s21  ;;  %v3482_v60 = vpack.i.bf16 %v518_v55, %v517_v51  ;;  %v525_v61 = vld [vmem:[#allocation2 + $0xa8] sm:$0xff]  ;;  %466 = vst.msk [vmem:[#allocation2 + $0x110] sm:$0xff] %vm408_vm0, %v391_v35  ;;  %v400_v35 = vmax.f32 %v368_v23, 0.0  ;;  %v3571_v13 = vld [vmem:[#allocation2 + $0x91] sm:$0xff] }
  0x42   : > { %v526_v1 = vld [vmem:[#allocation2 + $0xb0] sm:$0xff]  ;;  %463 = vst.msk [vmem:[#allocation2 + $0xe8] sm:$0xff] %vm408_vm0, %v388_v36  ;;  %v405_v43 = vmax.f32 %v373_v32, 0.0 }
  0x43   : > { %2762 = vrot.lane.b32.xlu0 %v3482_v60, %s3247_s21  ;;  %v3492_v5 = vpack.i.bf16 %v526_v1, %v525_v61  ;;  %v521_v6 = vld [vmem:[#allocation2 + $0x68] sm:$0xff]  ;;  %464 = vst.msk [vmem:[#allocation2 + $0xf0] sm:$0xff] %vm408_vm0, %v389_v41  ;;  %v404_v41 = vmax.f32 %v372_v30, 0.0  ;;  %v3583_v20 = vld [vmem:[#allocation2 + $0xb1] sm:$0xff] }
  0x44   : > { %v522_v11 = vld [vmem:[#allocation2 + $0x70] sm:$0xff]  ;;  %467 = vst.msk [vmem:[#allocation2 + $0x128] sm:$0xff] %vm408_vm0, %v392_v46 }
  0x45   : > { %v3500_v15 = vpack.i.bf16 %v522_v11, %v521_v6  ;;  %v527_v17 = vld [vmem:[#allocation2 + $0xc8] sm:$0xff]  ;;  %468 = vst.msk [vmem:[#allocation2 + $0x130] sm:$0xff] %vm408_vm0, %v393_v56 }
  0x46   : > { %v528_v21 = vld [vmem:[#allocation2 + $0xd0] sm:$0xff]  ;;  %471 = vst.msk [vmem:[#allocation2 + $0x168] sm:$0xff] %vm408_vm0, %v396_v2 }
  0x47   : > { %2782 = vrot.lane.b32.xlu2 %v3492_v5, %s3247_s21  ;;  %v3509_v24 = vpack.i.bf16 %v528_v21, %v527_v17  ;;  %472 = vst.msk [vmem:[#allocation2 + $0x170] sm:$0xff] %vm408_vm0, %v397_v8  ;;  %v531_v27 = vld [vmem:[#allocation2 + $0x108] sm:$0xff]  ;;  %v3554_v2 = vld [vmem:[#allocation2 + $0x31] sm:$0xff] }
  0x48   : > { %v532_v28 = vld [vmem:[#allocation2 + $0x110] sm:$0xff]  ;;  %469 = vst.msk [vmem:[#allocation2 + $0x148] sm:$0xff] %vm408_vm0, %v394_v12 }
  0x49   : > { %2772 = vrot.lane.b32.xlu1 %v3500_v15, %s3247_s21  ;;  %470 = vst.msk [vmem:[#allocation2 + $0x150] sm:$0xff] %vm408_vm0, %v395_v18  ;;  %v529_v33 = vld [vmem:[#allocation2 + $0xe8] sm:$0xff]  ;;  %v3522_v36 = vpack.i.bf16 %v532_v28, %v531_v27  ;;  %v3576_v17 = vld [vmem:[#allocation2 + $0x71] sm:$0xff] }
  0x4a   : > { %v530_v34 = vld [vmem:[#allocation2 + $0xf0] sm:$0xff]  ;;  %473 = vst.msk [vmem:[#allocation2 + $0x188] sm:$0xff] %vm408_vm0, %v398_v22 }
  0x4b   : > { %2787 = vrot.lane.b32.xlu0 %v3509_v24, %s3247_s21  ;;  %474 = vst.msk [vmem:[#allocation2 + $0x190] sm:$0xff] %vm408_vm0, %v399_v25  ;;  %v533_v38 = vld [vmem:[#allocation2 + $0x128] sm:$0xff]  ;;  %v3526_v42 = vpack.i.bf16 %v530_v34, %v529_v33  ;;  %v3592_v25 = vld [vmem:[#allocation2 + $0xf1] sm:$0xff] }
  0x4c   : > { %v534_v40 = vld [vmem:[#allocation2 + $0x130] sm:$0xff]  ;;  %477 = vst.msk [vmem:[#allocation2 + $0x1c8] sm:$0xff] %vm408_vm0, %v402_v29 }
  0x4d   : > { %478 = vst.msk [vmem:[#allocation2 + $0x1d0] sm:$0xff] %vm408_vm0, %v403_v31  ;;  %v3532_v44 = vpack.i.bf16 %v534_v40, %v533_v38  ;;  %v537_v45 = vld [vmem:[#allocation2 + $0x168] sm:$0xff]  ;;  %v3597_v27 = vld [vmem:[#allocation2 + $0xd1] sm:$0xff] }
  0x4e   : > { %475 = vst.msk [vmem:[#allocation2 + $0x1a8] sm:$0xff] %vm408_vm0, %v400_v35  ;;  %v538_v46 = vld [vmem:[#allocation2 + $0x170] sm:$0xff] }
  0x4f   : > { %2797 = vrot.lane.b32.xlu2 %v3522_v36, %s3247_s21  ;;  %476 = vst.msk [vmem:[#allocation2 + $0x1b0] sm:$0xff] %vm408_vm0, %v401_v37  ;;  %v535_v47 = vld [vmem:[#allocation2 + $0x148] sm:$0xff]  ;;  %v2811_v49 = vpack.i.bf16 %v538_v46, %v537_v45  ;;  %v3604_v30 = vld [vmem:[#allocation2 + $0x111] sm:$0xff] }
  0x50   : > { %479 = vst.msk [vmem:[#allocation2 + $0x1e8] sm:$0xff] %vm408_vm0, %v404_v41  ;;  %v536_v48 = vld [vmem:[#allocation2 + $0x150] sm:$0xff] }
  0x51   : > { %2792 = vrot.lane.b32.xlu1 %v3526_v42, %s3247_s21  ;;  %480 = vst.msk [vmem:[#allocation2 + $0x1f0] sm:$0xff] %vm408_vm0, %v405_v43  ;;  %v539_v51 = vld [vmem:[#allocation2 + $0x188] sm:$0xff]  ;;  %v2806_v53 = vpack.i.bf16 %v536_v48, %v535_v47  ;;  %v568_v34 = vld [vmem:[#allocation2 + $0x151] sm:$0xff] }
  0x52   : > { %v540_v52 = vld [vmem:[#allocation2 + $0x190] sm:$0xff] }
  0x53   : > { %2802 = vrot.lane.b32.xlu0 %v3532_v44, %s3247_s21  ;;  %v2816_v54 = vpack.i.bf16 %v540_v52, %v539_v51  ;;  %v543_v55 = vld [vmem:[#allocation2 + $0x1c8] sm:$0xff]  ;;  %v566_v37 = vld [vmem:[#allocation2 + $0x131] sm:$0xff] }
  0x54   : > { %v544_v56 = vld [vmem:[#allocation2 + $0x1d0] sm:$0xff] }
  0x55   : > { %v541_v57 = vld [vmem:[#allocation2 + $0x1a8] sm:$0xff]  ;;  %v3544_v59 = vpack.i.bf16 %v544_v56, %v543_v55  ;;  %v570_v41 = vld [vmem:[#allocation2 + $0x171] sm:$0xff] }
  0x56   : > { %v542_v58 = vld [vmem:[#allocation2 + $0x1b0] sm:$0xff] }
  0x57   : > { %2812 = vrot.lane.b32.xlu2 %v2811_v49, %s3247_s21  ;;  %v545_v61 = vld [vmem:[#allocation2 + $0x1e8] sm:$0xff]  ;;  %v3546_v63 = vpack.i.bf16 %v542_v58, %v541_v57  ;;  %v574_v47 = vld [vmem:[#allocation2 + $0x1b1] sm:$0xff] }
  0x58   : > { %v546_v62 = vld [vmem:[#allocation2 + $0x1f0] sm:$0xff]  ;;  %v2741_v57 = vld [vmem:[%s3337_s25 + $0x78] sm:$0xff]  }
  0x59   : > { %2807 = vrot.lane.b32.xlu1 %v2806_v53, %s3247_s21  ;;  %v3550_v0 = vpack.i.bf16 %v546_v62, %v545_v61  ;;  %v3552_v1 = vld [vmem:[#allocation2 + $0x29] sm:$0xff]  ;;  %v572_v49 = vld [vmem:[#allocation2 + $0x191] sm:$0xff]  ;;  %v2725_v61 = vunpack.c.l.bf16 %v2741_v57  ;;  %v2726_v62 = vunpack.c.h.bf16 %v2741_v57 }
  0x5a   : > { %v2841_v6 = vpack.i.bf16 %v3554_v2, %v3552_v1  ;;  %v3562_v8 = vld [vmem:[#allocation2 + $0x49] sm:$0xff]  ;;  %v2916_v55 = vpack.i.bf16 %v3552_v1, %v3564_v9 }
  0x5b   : > { %2817 = vrot.lane.b32.xlu0 %v2816_v54, %s3247_s21  ;;  %v2846_v11 = vpack.i.bf16 %v3564_v9, %v3562_v8  ;;  %v3569_v12 = vld [vmem:[#allocation2 + $0x89] sm:$0xff]  ;;  %v2946_v1 = vpack.i.bf16 %v3562_v8, %v3576_v17 }
  0x5c   : > { %v3574_v14 = vld [vmem:[#allocation2 + $0x69] sm:$0xff]  ;;  %v2856_v18 = vpack.i.bf16 %v3571_v13, %v3569_v12 }
  0x5d   : > { %v3581_v19 = vld [vmem:[#allocation2 + $0xa9] sm:$0xff]  ;;  %v2851_v21 = vpack.i.bf16 %v3576_v17, %v3574_v14  ;;  %v2941_v3 = vpack.i.bf16 %v3574_v14, %v574_v47 }
  0x5e   : > { %v2861_v22 = vpack.i.bf16 %v3583_v20, %v3581_v19  ;;  %v3590_v23 = vld [vmem:[#allocation2 + $0xe9] sm:$0xff]  ;;  %v3036_v57 = vpack.i.bf16 %v3581_v19, %v3597_v27 }
  0x5f   : > { %2827 = vrot.lane.b32.xlu2 %v3544_v59, %s3247_s21  ;;  %v3595_v26 = vld [vmem:[#allocation2 + $0xc9] sm:$0xff]  ;;  %v2871_v28 = vpack.i.bf16 %v3592_v25, %v3590_v23 }
  0x60   : > { %v3602_v29 = vld [vmem:[#allocation2 + $0x109] sm:$0xff]  ;;  %v2866_v31 = vpack.i.bf16 %v3597_v27, %v3595_v26 }
  0x61   : > { %2822 = vrot.lane.b32.xlu1 %v3546_v63, %s3247_s21  ;;  %v3611_v32 = vpack.i.bf16 %v3604_v30, %v3602_v29  ;;  %v567_v33 = vld [vmem:[#allocation2 + $0x149] sm:$0xff] }
  0x62   : > { %v565_v35 = vld [vmem:[#allocation2 + $0x129] sm:$0xff]  ;;  %v3616_v38 = vpack.i.bf16 %v568_v34, %v567_v33  ;;  %v3702_v33 = vld [vmem:[#allocation2 + $0x1f1] sm:$0xff]  ;;  %v3006_v34 = vpack.i.bf16 %v3569_v12, %v3583_v20 }
  0x63   : > { %2832 = vrot.lane.b32.xlu0 %v3550_v0, %s3247_s21  ;;  %v569_v40 = vld [vmem:[#allocation2 + $0x169] sm:$0xff]  ;;  %v3618_v43 = vpack.i.bf16 %v566_v37, %v565_v35  ;;  %v3001_v37 = vpack.i.bf16 %v3581_v19, %v3702_v33 }
  0x64   : > { %v3622_v45 = vpack.i.bf16 %v570_v41, %v569_v40  ;;  %v573_v46 = vld [vmem:[#allocation2 + $0x1a9] sm:$0xff] }
  0x65   : > { %v571_v48 = vld [vmem:[#allocation2 + $0x189] sm:$0xff]  ;;  %v2901_v51 = vpack.i.bf16 %v574_v47, %v573_v46  ;;  %v2926_v56 = vpack.i.bf16 %v573_v46, %v3554_v2  ;;  %v339_v2 = vmul.f32 %v3356_v7, %v2726_v62 }
  0x66   : > { %v3628_v52 = vld [vmem:[#allocation2 + $0x1c9] sm:$0xff]  ;;  %v2896_v53 = vpack.i.bf16 %v572_v49, %v571_v48 }
  0x67   : > { %2842 = vrot.lane.b32.xlu2 %v2841_v6, %s3248_s30  ;;  %v2906_v54 = vpack.i.bf16 %v3562_v8, %v3628_v52  ;;  %v375_v4 = vadd.f32 %v3372_v16, %v339_v2  ;;  %v3673_v8 = vld [vmem:[#allocation2 + $0x1d1] sm:$0xff] }
  0x68   : > { %v3756_v2 = vld [vmem:[#allocation2 + $0xef] sm:$0xff] }
  0x69   : > { %2837 = vrot.lane.b32.xlu1 %v2836_v10, %s3248_s30  ;;  %v407_v10 = vmax.f32 %v375_v4, 0.0 }
  0x6b   : > { %2847 = vrot.lane.b32.xlu0 %v2846_v11, %s3248_s30  ;;  %482 = vst.msk [vmem:[#allocation2 + $0x210] sm:$0xff] %vm408_vm0, %v407_v10  ;;  %v3765_v10 = vld [vmem:[#allocation2 + $0x1a7] sm:$0xff] }
  0x6f   : > { %2857 = vrot.lane.b32.xlu2 %v2856_v18, %s3248_s30 }
  0x71   : > { %2852 = vrot.lane.b32.xlu1 %v2851_v21, %s3248_s30  ;;  %v3687_v21 = vld [vmem:[#allocation2 + $0x1e9] sm:$0xff] }
  0x72   : > { %v981_v46 = vld [vmem:[#allocation2 + $0x210] sm:$0xff] }
  0x73   : > { %2862 = vrot.lane.b32.xlu0 %v2861_v22, %s3248_s30 }
  0x77   : > { %2872 = vrot.lane.b32.xlu2 %v2871_v28, %s3248_s30 }
  0x79   : > { %2867 = vrot.lane.b32.xlu1 %v2866_v31, %s3248_s30 }
  0x7b   : > { %2877 = vrot.lane.b32.xlu0 %v3611_v32, %s3248_s30 }
  0x7f   : > { %2887 = vrot.lane.b32.xlu2 %v3616_v38, %s3248_s30 }
  0x81   : > { %2882 = vrot.lane.b32.xlu1 %v3618_v43, %s3248_s30 }
  0x83   : > { %2892 = vrot.lane.b32.xlu0 %v3622_v45, %s3248_s30 }
  0x87   : > { %2902 = vrot.lane.b32.xlu2 %v2901_v51, %s3248_s30 }
  0x89   : > { %2897 = vrot.lane.b32.xlu1 %v2896_v53, %s3248_s30  ;;  %v3677_v18 = vpop.permute.xlu0 %2757 }
  0x8b   : > { %2907 = vrot.lane.b32.xlu0 %v2906_v54, %s3248_s30 }
  0x8f   : > { %2917 = vrot.lane.b32.xlu2 %v2916_v55, %s3248_s30 }
  0x91   : > { %2912 = vrot.lane.b32.xlu1 %v3471_v50, %s3247_s21 }
  0x93   : > { %2922 = vrot.lane.b32.xlu0 %v3482_v60, %s3247_s21  ;;  %v338_v60 = vmul.f32 %v3356_v7, %v2725_v61  ;;  %v2956_v7 = vpack.i.bf16 %v3628_v52, %v3564_v9  ;;  %v2971_v9 = vpack.i.bf16 %v3569_v12, %v3673_v8 }
  0x97   : > { %2932 = vrot.lane.b32.xlu2 %v3546_v63, %s3247_s21  ;;  %v374_v63 = vadd.f32 %v3372_v16, %v338_v60  ;;  %v3754_v60 = vld [vmem:[#allocation2 + $0xe7] sm:$0xff] }
  0x99   : > { %2927 = vrot.lane.b32.xlu1 %v2926_v56, %s3248_s30  ;;  %v3647_v58 = vpop.permute.xlu2 %2777  ;;  %v406_v6 = vmax.f32 %v374_v63, 0.0  ;;  %v3743_v56 = vld [vmem:[#allocation2 + $0x211] sm:$0xff] }
  0x9b   : > { %2937 = vrot.lane.b32.xlu0 %v3500_v15, %s3247_s21  ;;  %481 = vst.msk [vmem:[#allocation2 + $0x208] sm:$0xff] %vm408_vm0, %v406_v6 }
  0x9f   : > { %2947 = vrot.lane.b32.xlu2 %v2946_v1, %s3248_s30 }
  0xa1   : > { %2942 = vrot.lane.b32.xlu1 %v2941_v3, %s3248_s30  ;;  %v3660_v11 = vpop.permute.xlu2 %2782 }
  0xa2   : > { %v980_v12 = vld [vmem:[#allocation2 + $0x208] sm:$0xff] }
  0xa3   : > { %2952 = vrot.lane.b32.xlu0 %v3471_v50, %s3247_s21  ;;  %v2976_v50 = vpack.i.bf16 %v3574_v14, %v3571_v13  ;;  %v2986_v14 = vpack.i.bf16 %v3687_v21, %v3576_v17  ;;  %v2618_v17 = vld [vmem:[%s4675_s3] sm:$0xf]  ;;  %v3728_v48 = vld [vmem:[#allocation2 + $0x209] sm:$0xff]  ;;  %v3732_v51 = vpack.i.bf16 %v981_v46, %v980_v12 }
  0xa4   : > { %v3016_v54 = vpack.i.bf16 %v3728_v48, %v3571_v13  ;;  %v3031_v13 = vpack.i.bf16 %v3595_v26, %v3743_v56 }
  0xa7   : > { %2962 = vrot.lane.b32.xlu2 %v3544_v59, %s3247_s21 }
  0xa9   : > { %2957 = vrot.lane.b32.xlu1 %v2956_v7, %s3248_s30  ;;  %v3671_v16 = vpop.permute.xlu2 %2797  ;;  %v3767_v7 = vld [vmem:[#allocation2 + $0x1af] sm:$0xff] }
  0xab   : > { %2967 = vrot.lane.b32.xlu0 %v3459_v39, %s3247_s21 }
  0xaf   : > { %2977 = vrot.lane.b32.xlu2 %v2976_v50, %s3248_s30 }
  0xb1   : > { %2972 = vrot.lane.b32.xlu1 %v2971_v9, %s3248_s30  ;;  %v3685_v59 = vpop.permute.xlu2 %2812 }
  0xb3   : > { %2982 = vrot.lane.b32.xlu0 %v3500_v15, %s3247_s21  ;;  %v3691_v22 = vpop.permute.xlu1 %2767 }
  0xb5   : > { %v3693_v28 = vpop.permute.xlu0 %2762 }
  0xb7   : > { %2992 = vrot.lane.b32.xlu2 %v3550_v0, %s3247_s21  ;;  %v2660_v0 = vld [vmem:[%s4675_s3] sm:$0x30] }
  0xb8   : > { %v2619_v40 = vor.u32 %v2660_v0, %v2618_v17  ;;  %v3775_v0 = vld [vmem:[#allocation2 + $0x1e7] sm:$0xff] }
  0xb9   : > { %2987 = vrot.lane.b32.xlu1 %v2986_v14, %s3248_s30  ;;  %v3700_v31 = vpop.permute.xlu2 %2827 }
  0xba   : > { %v3722_v41 = vsel %vm1407_vm1, %v2619_v40, 0 }
  0xbb   : > { %2997 = vrot.lane.b32.xlu0 %v3492_v5, %s3247_s21  ;;  %v3706_v15 = vpop.permute.xlu1 %2772  ;;  %1563 = vmatpush.bf16.msra.mxu1 %v3722_v41 }
  0xbd   : > { %v3716_v35 = vpop.permute.xlu0 %2787 }
  0xbf   : > { %3007 = vrot.lane.b32.xlu2 %v3006_v34, %s3248_s30 }
  0xc1   : > { %3002 = vrot.lane.b32.xlu1 %v3001_v37, %s3248_s30  ;;  %v3725_v47 = vpop.permute.xlu2 %2842  ;;  %v3777_v37 = vld [vmem:[#allocation2 + $0x1ef] sm:$0xff] }
  0xc3   : > { %3012 = vrot.lane.b32.xlu0 %v3459_v39, %s3247_s21  ;;  %v2793_v49 = vpop.permute.xlu1 %2792 }
  0xc4   : > { %v2795_v62 = vunpack.i.h.bf16 %v2793_v49  ;;  %v2794_v1 = vunpack.i.l.bf16 %v2793_v49 }
  0xc5   : > { %v3734_v53 = vpop.permute.xlu0 %2802 }
  0xc6   : > { %v850_v19 = vsel %vm408_vm0, %v3756_v2, %v2795_v62  ;;  %v849_v6 = vsel %vm408_vm0, %v3754_v60, %v2794_v1  ;;  %v3056_v1 = vpack.i.bf16 %v3595_v26, %v3592_v25 }
  0xc7   : > { %3022 = vrot.lane.b32.xlu2 %v3732_v51, %s3247_s21 }
  0xc9   : > { %3017 = vrot.lane.b32.xlu1 %v3016_v54, %s3248_s30  ;;  %v3741_v55 = vpop.permute.xlu2 %2857 }
  0xcb   : > { %3027 = vrot.lane.b32.xlu0 %v3509_v24, %s3247_s21  ;;  %v2808_v39 = vpop.permute.xlu1 %2807 }
  0xcc   : > { %v2809_v62 = vunpack.i.l.bf16 %v2808_v39 }
  0xcd   : > { %v3749_v61 = vpop.permute.xlu0 %2817 }
  0xcf   : > { %3037 = vrot.lane.b32.xlu2 %v3036_v57, %s3248_s30 }
  0xd1   : > { %3032 = vrot.lane.b32.xlu1 %v3031_v13, %s3248_s30  ;;  %v2873_v3 = vpop.permute.xlu2 %2872  ;;  %v2810_v13 = vunpack.i.h.bf16 %v2808_v39  ;;  %v2759_v39 = vunpack.i.l.bf16 %v3677_v18 }
  0xd2   : > { %v2875_v63 = vunpack.i.h.bf16 %v2873_v3  ;;  %v2874_v4 = vunpack.i.l.bf16 %v2873_v3  ;;  %v504_v3 = vld [vmem:[#allocation2 + $0x14f] sm:$0xff] }
  0xd3   : > { %3042 = vrot.lane.b32.xlu0 %v3492_v5, %s3247_s21  ;;  %v2823_v50 = vpop.permute.xlu1 %2822  ;;  %v3046_v5 = vpack.i.bf16 %v3590_v23, %v3583_v20  ;;  %v503_v20 = vld [vmem:[#allocation2 + $0x147] sm:$0xff] }
  0xd4   : > { %v2825_v9 = vunpack.i.h.bf16 %v2823_v50  ;;  %v2824_v14 = vunpack.i.l.bf16 %v2823_v50  ;;  %v3770_v34 = vsel %vm867_vm2, %v849_v6, %v2874_v4  ;;  %v3773_v17 = vsel %vm867_vm2, %v850_v19, %v2875_v63  ;;  %v483_v6 = vld [vmem:[#allocation2 + $0x7] sm:$0xff]  ;;  %v484_v50 = vld [vmem:[#allocation2 + $0xf] sm:$0xff] }
  0xd5   : > { %v2833_v40 = vpop.permute.xlu0 %2832  ;;  %v2760_v19 = vunpack.i.h.bf16 %v3677_v18 }
  0xd6   : > { %v862_v46 = vsel %vm408_vm0, %v3767_v7, %v2825_v9  ;;  %v861_v49 = vsel %vm408_vm0, %v3765_v10, %v2824_v14  ;;  %v2835_v54 = vunpack.i.h.bf16 %v2833_v40  ;;  %v2834_v57 = vunpack.i.l.bf16 %v2833_v40 }
  0xd7   : > { %3052 = vrot.lane.b32.xlu2 %v3526_v42, %s3247_s21  ;;  %v856_v14 = vsel %vm408_vm0, %v504_v3, %v2810_v13  ;;  %v855_v40 = vsel %vm408_vm0, %v503_v20, %v2809_v62  ;;  %v3066_v13 = vpack.i.bf16 %v3602_v29, %v3597_v27  ;;  %v3826_v27 = vld [vmem:[#allocation2 + $0xaf] sm:$0xff] }
  0xd8   : > { %v3793_v63 = vsel %vm408_vm0, %v3777_v37, %v2835_v54  ;;  %v3797_v4 = vsel %vm408_vm0, %v3775_v0, %v2834_v57  ;;  %v963_v62 = vld [vmem:[#allocation2 + $0xf0] sm:$0xff] }
  0xd9   : > { %4686 = vst [vmem:[#allocation3_spill] sm:$0xff] %v3793_v63  ;;  %3047 = vrot.lane.b32.xlu1 %v3046_v5, %s3248_s30  ;;  %v2888_v26 = vpop.permute.xlu2 %2887  ;;  %v835_v5 = vsel %vm408_vm0, %v483_v6, %v2759_v39  ;;  %v2785_v39 = vunpack.i.h.bf16 %v3660_v11 }
  0xda   : > { %4687 = vst [vmem:[#allocation4_spill] sm:$0xff] %v3797_v4  ;;  %v2890_v42 = vunpack.i.h.bf16 %v2888_v26  ;;  %v2889_v9 = vunpack.i.l.bf16 %v2888_v26  ;;  %v836_v4 = vsel %vm408_vm0, %v484_v50, %v2760_v19  ;;  %v3833_v50 = vld [vmem:[#allocation2 + $0xa7] sm:$0xff] }
  0xdb   : > { %3057 = vrot.lane.b32.xlu0 %v3056_v1, %s3248_s30  ;;  %v2838_v54 = vpop.permute.xlu1 %2837 }
  0xdc   : > { %v2840_v57 = vunpack.i.h.bf16 %v2838_v54  ;;  %v2839_v12 = vunpack.i.l.bf16 %v2838_v54  ;;  %v3806_v63 = vsel %vm867_vm2, %v855_v40, %v2889_v9  ;;  %v3809_v18 = vsel %vm867_vm2, %v856_v14, %v2890_v42  ;;  %v2640_v40 = vld [vmem:[%s4675_s3 + $0x10] sm:$0xf]  ;;  %v2662_v54 = vld [vmem:[%s4675_s3 + $0x10] sm:$0x30] }
  0xdd   : > { %4688 = vst [vmem:[#allocation5_spill] sm:$0xff] %v3806_v63  ;;  %v3813_v26 = vpop.permute.xlu0 %2847 }
  0xde   : > { %4689 = vst [vmem:[#allocation6_spill] sm:$0xff] %v3809_v18  ;;  %v868_v1 = vsel %vm867_vm2, %v835_v5, %v2839_v12  ;;  %v869_v20 = vsel %vm867_vm2, %v836_v4, %v2840_v57  ;;  %v2784_v12 = vunpack.i.l.bf16 %v3660_v11  ;;  %v3076_v11 = vpack.i.bf16 %v3590_v23, %v3604_v30  ;;  %v3857_v30 = vld [vmem:[#allocation2 + $0x27] sm:$0xff] }
  0xdf   : > { %v900_v3 = vpack.c.bf16 %v869_v20, %v868_v1  ;;  %3067 = vrot.lane.b32.xlu2 %v3066_v13, %s3248_s30  ;;  %v2641_v13 = vor.u32 %v2662_v54, %v2640_v40  ;;  %v2765_v23 = vunpack.i.h.bf16 %v3693_v28  ;;  %v2844_v20 = vunpack.i.l.bf16 %v3725_v47 }
  0xe0   : > { %v845_v1 = vsel %vm408_vm0, %v3833_v50, %v2784_v12  ;;  %v2789_v40 = vunpack.i.l.bf16 %v3716_v35 }
  0xe1   : > { %2620 = vmatmul.msk.bf16.vlgmr.msra.gmra.mxu1 %vm1358_vm3, %v900_v3  ;;  %3062 = vrot.lane.b32.xlu1 %v3509_v24, %s3247_s21  ;;  %v2903_v19 = vpop.permute.xlu2 %2902  ;;  %v846_v24 = vsel %vm408_vm0, %v3826_v27, %v2785_v39  ;;  %v3086_v3 = vpack.i.bf16 %v3673_v8, %v3592_v25  ;;  %v3862_v39 = vld [vmem:[#allocation2 + $0x2f] sm:$0xff] }
  0xe2   : > { %v2905_v29 = vunpack.i.h.bf16 %v2903_v19  ;;  %v2904_v6 = vunpack.i.l.bf16 %v2903_v19  ;;  %v2845_v19 = vunpack.i.h.bf16 %v3725_v47  ;;  %v500_v47 = vld [vmem:[#allocation2 + $0x10f] sm:$0xff] }
  0xe3   : > { %3072 = vrot.lane.b32.xlu0 %v3522_v36, %s3247_s21  ;;  %v3831_v4 = vpop.permute.xlu1 %2852 }
  0xe4   : > { %v3836_v42 = vsel %vm867_vm2, %v861_v49, %v2904_v6  ;;  %v3839_v9 = vsel %vm867_vm2, %v862_v46, %v2905_v29  ;;  %v2764_v46 = vunpack.i.l.bf16 %v3693_v28  ;;  %v3866_v29 = vsel %vm1407_vm1, %v2641_v13, 0  ;;  %v499_v49 = vld [vmem:[#allocation2 + $0x107] sm:$0xff] }
  0xe5   : > { %4690 = vst [vmem:[#allocation7_spill] sm:$0xff] %v3836_v42  ;;  %v2863_v14 = vpop.permute.xlu0 %2862  ;;  %v2800_v28 = vunpack.i.h.bf16 %v3671_v16  ;;  %2144 = vmatpush.bf16.msra.mxu2 %v3866_v29 }
  0xe6   : > { %4691 = vst [vmem:[#allocation8_spill] sm:$0xff] %v3839_v9  ;;  %v2865_v57 = vunpack.i.h.bf16 %v2863_v14  ;;  %v2864_v5 = vunpack.i.l.bf16 %v2863_v14  ;;  %v2790_v14 = vunpack.i.h.bf16 %v3716_v35  ;;  %v837_v54 = vsel %vm408_vm0, %v3857_v30, %v2764_v46 }
  0xe7   : > { %v838_v35 = vsel %vm408_vm0, %v3862_v39, %v2765_v23  ;;  %v870_v13 = vsel %vm867_vm2, %v837_v54, %v2844_v20  ;;  %v2661_v23 = vld [vmem:[%s4675_s3 + $0x8] sm:$0x30] }
  0xe8   : > { %v3869_v6 = vsel %vm867_vm2, %v845_v1, %v2864_v5  ;;  %v3872_v12 = vsel %vm867_vm2, %v846_v24, %v2865_v57  ;;  %v3883_v5 = vld [vmem:[#allocation2 + $0xc7] sm:$0xff]  ;;  %v3885_v24 = vld [vmem:[#allocation2 + $0xcf] sm:$0xff]  ;;  %v2799_v57 = vunpack.i.l.bf16 %v3671_v16  ;;  %v871_v46 = vsel %vm867_vm2, %v838_v35, %v2845_v19 }
  0xe9   : > { %3077 = vrot.lane.b32.xlu1 %v3076_v11, %s3248_s30  ;;  %v962_v1 = vld [vmem:[#allocation2 + $0xe8] sm:$0xff]  ;;  %v848_v20 = vsel %vm408_vm0, %v3885_v24, %v2790_v14  ;;  %v847_v54 = vsel %vm408_vm0, %v3883_v5, %v2789_v40  ;;  %v3904_v42 = vpop.permute.xlu2 %2917  ;;  %v901_v14 = vpack.c.bf16 %v871_v46, %v870_v13 }
  0xea   : > { %v3081_v18 = vpack.i.bf16 %v963_v62, %v962_v1  ;;  %v2598_v16 = vld [vmem:[%s4675_s3 + $0x8] sm:$0xf]  ;;  %v506_v46 = vld [vmem:[#allocation2 + $0x16f] sm:$0xff] }
  0xeb   : > { %3087 = vrot.lane.b32.xlu0 %v3086_v3, %s3248_s30  ;;  %v2868_v11 = vpop.permute.xlu1 %2867  ;;  %v852_v3 = vsel %vm408_vm0, %v500_v47, %v2800_v28  ;;  %v2599_v62 = vor.u32 %v2661_v23, %v2598_v16  ;;  %v851_v28 = vsel %vm408_vm0, %v499_v49, %v2799_v57  ;;  %v2815_v16 = vunpack.i.h.bf16 %v3685_v59 }
  0xec   : > { %v2870_v25 = vunpack.i.h.bf16 %v2868_v11  ;;  %v2869_v63 = vunpack.i.l.bf16 %v2868_v11  ;;  %3082 = vrot.lane.b32.xlu2 %v3081_v18, %s3247_s21  ;;  %v2814_v23 = vunpack.i.l.bf16 %v3685_v59  ;;  %v2805_v49 = vunpack.i.h.bf16 %v3734_v53 }
  0xed   : > { %v2878_v11 = vpop.permute.xlu0 %2877  ;;  %v1409_v47 = vsel %vm1407_vm1, %v2599_v62, 0  ;;  %v2804_v57 = vunpack.i.l.bf16 %v3734_v53  ;;  %v858_v53 = vsel %vm408_vm0, %v506_v46, %v2815_v16  ;;  %v2769_v16 = vunpack.i.l.bf16 %v3691_v22  ;;  %v3959_v46 = vld [vmem:[#allocation2 + $0x4f] sm:$0xff] }
  0xee   : > { %v2880_v19 = vunpack.i.h.bf16 %v2878_v11  ;;  %v2879_v35 = vunpack.i.l.bf16 %v2878_v11  ;;  %v3908_v1 = vsel %vm867_vm2, %v847_v54, %v2869_v63  ;;  %v3911_v9 = vsel %vm867_vm2, %v848_v20, %v2870_v25  ;;  %1418 = vmatpush.bf16.msra.mxu0 %v1409_v47  ;;  %2742 = vmatpush.bf16.msra.mxu3 %v1409_v47  ;;  %v505_v25 = vld [vmem:[#allocation2 + $0x167] sm:$0xff]  ;;  %v502_v54 = vld [vmem:[#allocation2 + $0x12f] sm:$0xff] }
  0xef   : > { %v501_v20 = vld [vmem:[#allocation2 + $0x127] sm:$0xff]  ;;  %v857_v62 = vsel %vm408_vm0, %v505_v25, %v2814_v23  ;;  %v2770_v47 = vunpack.i.h.bf16 %v3691_v22  ;;  %v3951_v25 = vpack.i.bf16 %v3702_v33, %v3687_v21  ;;  %v2820_v21 = vunpack.i.h.bf16 %v3749_v61 }
  0xf0   : > { %v3919_v18 = vsel %vm867_vm2, %v851_v28, %v2879_v35  ;;  %v3922_v63 = vsel %vm867_vm2, %v852_v3, %v2880_v19  ;;  %v853_v19 = vsel %vm408_vm0, %v501_v20, %v2804_v57  ;;  %v3957_v57 = vld [vmem:[#allocation2 + $0x47] sm:$0xff]  ;;  %v2850_v20 = vunpack.i.h.bf16 %v3813_v26 }
  0xf1   : > { %2621 = vmatmul.msk.bf16.gmra.mxu1 %vm1358_vm3, %v901_v14  ;;  %3092 = vrot.lane.b32.xlu1 %v3532_v44, %s3247_s21  ;;  %v854_v44 = vsel %vm408_vm0, %v502_v54, %v2805_v49  ;;  %v3953_v23 = vpop.permute.xlu2 %2932  ;;  %v2849_v54 = vunpack.i.l.bf16 %v3813_v26  ;;  %v2819_v33 = vunpack.i.l.bf16 %v3749_v61  ;;  %v839_v26 = vsel %vm408_vm0, %v3957_v57, %v2769_v16 }
  0xf2   : > { %2743 = vmatpush.bf16.msrb.mxu3 %v3722_v41 }
  0xf3   : > { %3102 = vrot.lane.b32.xlu0 %v3522_v36, %s3247_s21  ;;  %v2883_v59 = vpop.permute.xlu1 %2882 }
  0xf4   : > { %v2885_v3 = vunpack.i.h.bf16 %v2883_v59  ;;  %v2884_v11 = vunpack.i.l.bf16 %v2883_v59  ;;  %3097 = vrot.lane.b32.xlu2 %v3618_v43, %s3248_s30 }
  0xf5   : > { %v2893_v35 = vpop.permute.xlu0 %2892 }
  0xf6   : > { %v2895_v28 = vunpack.i.h.bf16 %v2893_v35  ;;  %v2894_v14 = vunpack.i.l.bf16 %v2893_v35  ;;  %v3942_v41 = vsel %vm867_vm2, %v853_v19, %v2884_v11  ;;  %v3945_v36 = vsel %vm867_vm2, %v854_v44, %v2885_v3  ;;  %v507_v11 = vld [vmem:[#allocation2 + $0x187] sm:$0xff]  ;;  %v508_v44 = vld [vmem:[#allocation2 + $0x18f] sm:$0xff] }
  0xf7   : > { %4692 = vst [vmem:[#allocation9_spill] sm:$0xff] %v3942_v41  ;;  %v3982_v19 = vld [vmem:[#allocation2 + $0x1c7] sm:$0xff]  ;;  %v860_v3 = vsel %vm408_vm0, %v508_v44, %v2820_v21  ;;  %v859_v16 = vsel %vm408_vm0, %v507_v11, %v2819_v33  ;;  %v2919_v11 = vunpack.i.l.bf16 %v3904_v42 }
  0xf8   : > { %4693 = vst [vmem:[#allocation10_spill] sm:$0xff] %v3945_v36  ;;  %v3964_v59 = vsel %vm867_vm2, %v857_v62, %v2894_v14  ;;  %v3967_v22 = vsel %vm867_vm2, %v858_v53, %v2895_v28  ;;  %v840_v62 = vsel %vm408_vm0, %v3959_v46, %v2770_v47  ;;  %v2829_v53 = vunpack.i.l.bf16 %v3700_v31  ;;  %v1696_v33 = vld [vmem:[#allocation2 + $0x168] sm:$0xff]  ;;  %v967_v36 = vld [vmem:[#allocation2 + $0x130] sm:$0xff] }
  0xf9   : > { %4694 = vst [vmem:[#allocation11_spill] sm:$0xff] %v3964_v59  ;;  %3107 = vrot.lane.b32.xlu1 %v3611_v32, %s3248_s30  ;;  %v872_v28 = vsel %vm867_vm2, %v839_v26, %v2849_v54  ;;  %v873_v14 = vsel %vm867_vm2, %v840_v62, %v2850_v20  ;;  %v4004_v21 = vpop.permute.xlu2 %2947  ;;  %v1695_v54 = vld [vmem:[#allocation2 + $0x150] sm:$0xff] }
  0xfa   : > { %4695 = vst [vmem:[#allocation12_spill] sm:$0xff] %v3967_v22  ;;  %v863_v59 = vsel %vm408_vm0, %v3982_v19, %v2829_v53  ;;  %v902_v26 = vpack.c.bf16 %v873_v14, %v872_v28  ;;  %v2854_v22 = vunpack.i.l.bf16 %v3831_v4 }
  0xfb   : > { %3117 = vrot.lane.b32.xlu0 %v3951_v25, %s3248_s30  ;;  %v2898_v61 = vpop.permute.xlu1 %2897 }
  0xfc   : > { %v2900_v32 = vunpack.i.h.bf16 %v2898_v61  ;;  %v2899_v35 = vunpack.i.l.bf16 %v2898_v61 }
  0xfd   : > { %v2908_v49 = vpop.permute.xlu0 %2907 }
  0xfe   : > { %v3989_v47 = vsel %vm867_vm2, %v859_v16, %v2899_v35  ;;  %v3992_v13 = vsel %vm867_vm2, %v860_v3, %v2900_v32  ;;  %v2909_v40 = vunpack.i.l.bf16 %v2908_v49  ;;  %v1697_v3 = vld [vmem:[#allocation2 + $0x170] sm:$0xff]  ;;  %v2910_v61 = vunpack.i.h.bf16 %v2908_v49  ;;  %v1694_v49 = vld [vmem:[#allocation2 + $0x148] sm:$0xff] }
  0xff   : > { %v2775_v32 = vunpack.i.h.bf16 %v3706_v15  ;;  %v2774_v35 = vunpack.i.l.bf16 %v3706_v15  ;;  %v2855_v15 = vunpack.i.h.bf16 %v3831_v4  ;;  %v4025_v41 = vpack.i.bf16 %v1695_v54, %v1694_v49 }
 0x100   : > { %v3999_v20 = vsel %vm867_vm2, %v863_v59, %v2909_v40  ;;  %v4009_v59 = vpack.i.bf16 %v1697_v3, %v1696_v33  ;;  %v4019_v33 = vld [vmem:[#allocation2 + $0x67] sm:$0xff]  ;;  %v4021_v3 = vld [vmem:[#allocation2 + $0x6f] sm:$0xff] }
 0x101   : > { %4696 = vst [vmem:[#allocation13_spill] sm:$0xff] %v3999_v20  ;;  %2622 = vmatmul.msk.bf16.gmra.mxu1 %vm1358_vm3, %v902_v26  ;;  %3122 = vrot.lane.b32.xlu1 %v3616_v38, %s3248_s30 }
 0x102   : > { %3112 = vrot.lane.b32.xlu2 %v4025_v41, %s3247_s21 }
 0x103   : > { %v2913_v44 = vpop.permute.xlu1 %2912  ;;  %3132 = vrot.lane.b32.xlu0 %v3618_v43, %s3248_s30 }
 0x104   : > { %v2915_v62 = vunpack.i.h.bf16 %v2913_v44  ;;  %v2914_v53 = vunpack.i.l.bf16 %v2913_v44 }
 0x105   : > { %v2923_v40 = vpop.permute.xlu0 %2922 }
 0x106   : > { %v1999_v28 = vsel %vm408_vm0, %v3959_v46, %v2915_v62  ;;  %v1998_v14 = vsel %vm408_vm0, %v3957_v57, %v2914_v53  ;;  %v2925_v16 = vunpack.i.h.bf16 %v2923_v40  ;;  %v2924_v26 = vunpack.i.l.bf16 %v2923_v40 }
 0x107   : > { %v2030_v43 = vsel %vm867_vm2, %v1998_v14, %v2910_v61  ;;  %v2031_v44 = vsel %vm867_vm2, %v1999_v28, %v2919_v11  ;;  %v2920_v53 = vunpack.i.h.bf16 %v3904_v42  ;;  %v842_v11 = vsel %vm408_vm0, %v4021_v3, %v2775_v32  ;;  %v4041_v28 = vpop.permute.xlu2 %2962 }
 0x108   : > { %v2062_v62 = vpack.c.bf16 %v2031_v44, %v2030_v43  ;;  %v841_v61 = vsel %vm408_vm0, %v4019_v33, %v2774_v35  ;;  %v1271_v4 = vsel %vm408_vm0, %v3862_v39, %v2925_v16  ;;  %v1270_v54 = vsel %vm408_vm0, %v3857_v30, %v2924_v26 }
 0x109   : > { %3137 = vrot.lane.b32.xlu1 %v4009_v59, %s3247_s21  ;;  %v874_v14 = vsel %vm867_vm2, %v841_v61, %v2854_v22  ;;  %v875_v32 = vsel %vm867_vm2, %v842_v11, %v2855_v15  ;;  %v1302_v35 = vsel %vm867_vm2, %v1270_v54, %v2920_v53  ;;  %v3151_v30 = vpack.i.bf16 %v3673_v8, %v3628_v52  ;;  %v1698_v8 = vld [vmem:[#allocation2 + $0x188] sm:$0xff]  ;;  %v1699_v11 = vld [vmem:[#allocation2 + $0x190] sm:$0xff] }
 0x10a   : > { %2642 = vmatmul.msk.bf16.vlgmr.msra.gmra.mxu2 %vm1358_vm3, %v2062_v62  ;;  %v2934_v16 = vunpack.i.l.bf16 %v3953_v23  ;;  %v903_v62 = vpack.c.bf16 %v875_v32, %v874_v14  ;;  %v2949_v22 = vunpack.i.l.bf16 %v4004_v21  ;;  %v2935_v15 = vunpack.i.h.bf16 %v3953_v23 }
 0x10b   : > { %v2928_v40 = vpop.permute.xlu1 %2927  ;;  %3147 = vrot.lane.b32.xlu0 %v3622_v45, %s3248_s30  ;;  %v966_v45 = vld [vmem:[#allocation2 + $0x128] sm:$0xff]  ;;  %v2779_v14 = vunpack.i.l.bf16 %v3647_v58 }
 0x10c   : > { %v2929_v42 = vunpack.i.l.bf16 %v2928_v40  ;;  %v3126_v61 = vpack.i.bf16 %v967_v36, %v966_v45  ;;  %v2930_v52 = vunpack.i.h.bf16 %v2928_v40  ;;  %v1294_v36 = vsel %vm408_vm0, %v3765_v10, %v2934_v16  ;;  %v1731_v40 = vld [vmem:[#allocation2 + $0x191] sm:$0xff] }
 0x10d   : > { %v2938_v43 = vpop.permute.xlu0 %2937  ;;  %v1295_v10 = vsel %vm408_vm0, %v3767_v7, %v2935_v15  ;;  %v1702_v7 = vld [vmem:[#allocation2 + $0x1c8] sm:$0xff]  ;;  %v1703_v15 = vld [vmem:[#allocation2 + $0x1d0] sm:$0xff] }
 0x10e   : > { %v2940_v44 = vunpack.i.h.bf16 %v2938_v43  ;;  %v1303_v39 = vsel %vm867_vm2, %v1271_v4, %v2929_v42  ;;  %v2939_v26 = vunpack.i.l.bf16 %v2938_v43  ;;  %3127 = vrot.lane.b32.xlu2 %v3126_v61, %s3247_s21  ;;  %v2780_v4 = vunpack.i.h.bf16 %v3647_v58  ;;  %v1730_v42 = vld [vmem:[#allocation2 + $0x189] sm:$0xff] }
 0x10f   : > { %v1334_v49 = vpack.c.bf16 %v1303_v39, %v1302_v35  ;;  %v2860_v35 = vunpack.i.h.bf16 %v3741_v55  ;;  %v2859_v39 = vunpack.i.l.bf16 %v3741_v55  ;;  %v4073_v16 = vpop.permute.xlu2 %2977  ;;  %v4080_v45 = vpack.i.bf16 %v1731_v40, %v1730_v42 }
 0x110   : > { %v2001_v53 = vsel %vm408_vm0, %v4021_v3, %v2940_v44  ;;  %v2000_v23 = vsel %vm408_vm0, %v4019_v33, %v2939_v26  ;;  %v4075_v26 = vpack.i.bf16 %v1699_v11, %v1698_v8  ;;  %v3141_v20 = vpack.i.bf16 %v1703_v15, %v1702_v7 }
 0x111   : > { %2600 = vmatmul.msk.bf16.vlgmr.msra.gmra.mxu0 %vm1358_vm3, %v1334_v49  ;;  %2623 = vmatmul.msk.bf16.gmra.mxu1 %vm1358_vm3, %v903_v62  ;;  %v2033_v44 = vsel %vm867_vm2, %v2001_v53, %v2949_v22  ;;  %v1326_v49 = vsel %vm867_vm2, %v1294_v36, %v2930_v52  ;;  %v492_v22 = vld [vmem:[#allocation2 + $0x8f] sm:$0xff]  ;;  %v2950_v11 = vunpack.i.h.bf16 %v4004_v21 }
 0x112   : > { %3152 = vrot.lane.b32.xlu1 %v3151_v30, %s3248_s30  ;;  %v844_v52 = vsel %vm408_vm0, %v492_v22, %v2780_v4  ;;  %v1002_v4 = vld [vmem:[#allocation2 + $0x169] sm:$0xff] }
 0x113   : > { %v2943_v54 = vpop.permute.xlu1 %2942  ;;  %3162 = vrot.lane.b32.xlu0 %v3616_v38, %s3248_s30  ;;  %v491_v38 = vld [vmem:[#allocation2 + $0x87] sm:$0xff] }
 0x114   : > { %v2945_v32 = vunpack.i.h.bf16 %v2943_v54  ;;  %v2944_v43 = vunpack.i.l.bf16 %v2943_v54  ;;  %v843_v8 = vsel %vm408_vm0, %v491_v38, %v2779_v14  ;;  %v877_v14 = vsel %vm867_vm2, %v844_v52, %v2860_v35 }
 0x115   : > { %v2953_v30 = vpop.permute.xlu0 %2952  ;;  %v876_v36 = vsel %vm867_vm2, %v843_v8, %v2859_v39  ;;  %v4117_v8 = vld [vmem:[#allocation2 + $0x1cf] sm:$0xff] }
 0x116   : > { %v1327_v58 = vsel %vm867_vm2, %v1295_v10, %v2944_v43  ;;  %v2032_v62 = vsel %vm867_vm2, %v2000_v23, %v2945_v32  ;;  %v2955_v61 = vunpack.i.h.bf16 %v2953_v30  ;;  %v2954_v55 = vunpack.i.l.bf16 %v2953_v30  ;;  %3142 = vrot.lane.b32.xlu2 %v3141_v20, %s3247_s21  ;;  %v1003_v32 = vld [vmem:[#allocation2 + $0x171] sm:$0xff] }
 0x117   : > { %v1346_v53 = vpack.c.bf16 %v1327_v58, %v1326_v49  ;;  %v2063_v54 = vpack.c.bf16 %v2033_v44, %v2032_v62  ;;  %v2964_v10 = vunpack.i.l.bf16 %v4041_v28  ;;  %v4102_v49 = vpop.permute.xlu2 %2992  ;;  %v3191_v58 = vpack.i.bf16 %v1003_v32, %v1002_v4 }
 0x118   : > { %v1273_v23 = vsel %vm408_vm0, %v3959_v46, %v2955_v61  ;;  %v1272_v42 = vsel %vm408_vm0, %v3957_v57, %v2954_v55  ;;  %v904_v57 = vpack.c.bf16 %v877_v14, %v876_v36  ;;  %v2979_v20 = vunpack.i.l.bf16 %v4073_v16  ;;  %v1700_v55 = vld [vmem:[#allocation2 + $0x1a8] sm:$0xff] }
 0x119   : > { %2612 = vmatmul.msk.bf16.vlgmr.msra.gmra.mxu3 %vm1358_vm3, %v1346_v53  ;;  %v1304_v46 = vsel %vm867_vm2, %v1272_v42, %v2950_v11  ;;  %v2965_v62 = vunpack.i.h.bf16 %v4041_v28  ;;  %v1701_v53 = vld [vmem:[#allocation2 + $0x1b0] sm:$0xff] }
 0x11a   : > { %2643 = vmatmul.msk.bf16.gmra.mxu2 %vm1358_vm3, %v2063_v54  ;;  %3167 = vrot.lane.b32.xlu1 %v4075_v26, %s3247_s21  ;;  %v1296_v54 = vsel %vm408_vm0, %v3982_v19, %v2964_v10  ;;  %v1732_v28 = vld [vmem:[#allocation2 + $0x1a9] sm:$0xff] }
 0x11b   : > { %v2958_v40 = vpop.permute.xlu1 %2957  ;;  %3177 = vrot.lane.b32.xlu0 %v4080_v45, %s3248_s30  ;;  %2744 = vmatpush.bf16.msra.mxu3 %v3866_v29  ;;  %v1297_v36 = vsel %vm408_vm0, %v4117_v8, %v2965_v62 }
 0x11c   : > { %v2959_v21 = vunpack.i.l.bf16 %v2958_v40  ;;  %v2960_v61 = vunpack.i.h.bf16 %v2958_v40 }
 0x11d   : > { %v2968_v43 = vpop.permute.xlu0 %2967 }
 0x11e   : > { %v2970_v44 = vunpack.i.h.bf16 %v2968_v43  ;;  %v1305_v39 = vsel %vm867_vm2, %v1273_v23, %v2959_v21  ;;  %v2969_v35 = vunpack.i.l.bf16 %v2968_v43  ;;  %3157 = vrot.lane.b32.xlu2 %v4025_v41, %s3247_s21  ;;  %v3196_v23 = vpack.i.bf16 %v1701_v53, %v1700_v55  ;;  %v1704_v43 = vld [vmem:[#allocation2 + $0x1e8] sm:$0xff] }
 0x11f   : > { %v1335_v30 = vpack.c.bf16 %v1305_v39, %v1304_v46  ;;  %v3008_v39 = vpop.permute.xlu2 %3007 }
 0x120   : > { %v2003_v29 = vsel %vm408_vm0, %v492_v22, %v2970_v44  ;;  %v2002_v7 = vsel %vm408_vm0, %v491_v38, %v2969_v35  ;;  %v1733_v22 = vld [vmem:[#allocation2 + $0x1b1] sm:$0xff]  ;;  %v1328_v38 = vsel %vm867_vm2, %v1296_v54, %v2960_v61  ;;  %v3211_v61 = vpack.i.bf16 %v3743_v56, %v3728_v48 }
 0x121   : > { %2601 = vmatmul.msk.bf16.gmra.mxu0 %vm1358_vm3, %v1335_v30  ;;  %2624 = vmatmul.msk.bf16.gmra.mxu1 %vm1358_vm3, %v904_v57  ;;  %v3206_v14 = vpack.i.bf16 %v1733_v22, %v1732_v28  ;;  %v1705_v44 = vld [vmem:[#allocation2 + $0x1f0] sm:$0xff]  ;;  %v2980_v57 = vunpack.i.h.bf16 %v4073_v16  ;;  %v2995_v54 = vunpack.i.h.bf16 %v4102_v49 }
 0x122   : > { %3182 = vrot.lane.b32.xlu1 %v3951_v25, %s3248_s30  ;;  %v2035_v25 = vsel %vm867_vm2, %v2003_v29, %v2979_v20  ;;  %v3171_v46 = vpack.i.bf16 %v1705_v44, %v1704_v43 }
 0x123   : > { %v2973_v15 = vpop.permute.xlu1 %2972  ;;  %3192 = vrot.lane.b32.xlu0 %v3191_v58, %s3248_s30 }
 0x124   : > { %v2975_v52 = vunpack.i.h.bf16 %v2973_v15  ;;  %v2974_v11 = vunpack.i.l.bf16 %v2973_v15  ;;  %v4697_v15 = vpack.c.bf16 %v3872_v12, %v3869_v6 }
 0x125   : > { %v2983_v19 = vpop.permute.xlu0 %2982 }
 0x126   : > { %v1329_v42 = vsel %vm867_vm2, %v1297_v36, %v2974_v11  ;;  %v2034_v40 = vsel %vm867_vm2, %v2002_v7, %v2975_v52  ;;  %v2985_v21 = vunpack.i.h.bf16 %v2983_v19  ;;  %v2984_v41 = vunpack.i.l.bf16 %v2983_v19  ;;  %3172 = vrot.lane.b32.xlu2 %v3171_v46, %s3247_s21  ;;  %v1709_v52 = vld [vmem:[#allocation2 + $0x230] sm:$0xff] }
 0x127   : > { %v1347_v4 = vpack.c.bf16 %v1329_v42, %v1328_v38  ;;  %v2064_v32 = vpack.c.bf16 %v2035_v25, %v2034_v40  ;;  %v3023_v22 = vpop.permute.xlu2 %3022 }
 0x128   : > { %v1275_v10 = vsel %vm408_vm0, %v4021_v3, %v2985_v21  ;;  %v1274_v35 = vsel %vm408_vm0, %v4019_v33, %v2984_v41  ;;  %v2994_v3 = vunpack.i.l.bf16 %v4102_v49  ;;  %v3009_v33 = vunpack.i.l.bf16 %v3008_v39 }
 0x129   : > { %2613 = vmatmul.msk.bf16.gmra.mxu3 %vm1358_vm3, %v1347_v4  ;;  %v1306_v16 = vsel %vm867_vm2, %v1274_v35, %v2980_v57  ;;  %v3010_v21 = vunpack.i.h.bf16 %v3008_v39 }
 0x12a   : > { %2644 = vmatmul.msk.bf16.gmra.mxu2 %vm1358_vm3, %v2064_v32  ;;  %3197 = vrot.lane.b32.xlu1 %v3196_v23, %s3247_s21  ;;  %v1298_v48 = vsel %vm408_vm0, %v3775_v0, %v2994_v3  ;;  %v1299_v0 = vsel %vm408_vm0, %v3777_v37, %v2995_v54 }
 0x12b   : > { %v2988_v30 = vpop.permute.xlu1 %2987  ;;  %3207 = vrot.lane.b32.xlu0 %v3206_v14, %s3248_s30  ;;  %v925_v14 = vld [vmem:[#allocation2 + $0x8f] sm:$0xff] }
 0x12c   : > { %v2989_v58 = vunpack.i.l.bf16 %v2988_v30  ;;  %v2990_v28 = vunpack.i.h.bf16 %v2988_v30 }
 0x12d   : > { %v2998_v20 = vpop.permute.xlu0 %2997 }
 0x12e   : > { %v3000_v62 = vunpack.i.h.bf16 %v2998_v20  ;;  %v1307_v29 = vsel %vm867_vm2, %v1275_v10, %v2989_v58  ;;  %v2999_v55 = vunpack.i.l.bf16 %v2998_v20  ;;  %3187 = vrot.lane.b32.xlu2 %v4009_v59, %s3247_s21  ;;  %v924_v59 = vld [vmem:[#allocation2 + $0x87] sm:$0xff]  ;;  %v3024_v10 = vunpack.i.l.bf16 %v3023_v22 }
 0x12f   : > { %v1336_v53 = vpack.c.bf16 %v1307_v29, %v1306_v16  ;;  %v3038_v44 = vpop.permute.xlu2 %3037  ;;  %v4172_v58 = vld [vmem:[#allocation2 + $0x207] sm:$0xff]  ;;  %v4181_v29 = vld [vmem:[#allocation2 + $0x20f] sm:$0xff] }
 0x130   : > { %v2005_v7 = vsel %vm408_vm0, %v3826_v27, %v3000_v62  ;;  %v2004_v56 = vsel %vm408_vm0, %v3833_v50, %v2999_v55  ;;  %v1708_v27 = vld [vmem:[#allocation2 + $0x228] sm:$0xff]  ;;  %v1330_v50 = vsel %vm867_vm2, %v1298_v48, %v2990_v28  ;;  %v3039_v20 = vunpack.i.l.bf16 %v3038_v44 }
 0x131   : > { %2602 = vmatmul.msk.bf16.gmra.mxu0 %vm1358_vm3, %v1336_v53  ;;  %2625 = vmatmul.msk.bf16.gmra.mxu1 %vm1358_vm3, %v4697_v15  ;;  %v2037_v11 = vsel %vm867_vm2, %v2005_v7, %v3009_v33  ;;  %v3025_v62 = vunpack.i.h.bf16 %v3023_v22  ;;  %v1300_v3 = vsel %vm408_vm0, %v4172_v58, %v3024_v10  ;;  %v926_v22 = vld [vmem:[#allocation2 + $0xa7] sm:$0xff] }
 0x132   : > { %3212 = vrot.lane.b32.xlu1 %v3211_v61, %s3248_s30  ;;  %v928_v10 = vld [vmem:[#allocation2 + $0xc7] sm:$0xff] }
 0x133   : > { %v3003_v49 = vpop.permute.xlu1 %3002  ;;  %3222 = vrot.lane.b32.xlu0 %v4080_v45, %s3248_s30  ;;  %v3226_v45 = vpack.i.bf16 %v1709_v52, %v1708_v27  ;;  %v1740_v27 = vld [vmem:[#allocation2 + $0x229] sm:$0xff] }
 0x134   : > { %v3005_v6 = vunpack.i.h.bf16 %v3003_v49  ;;  %v3004_v12 = vunpack.i.l.bf16 %v3003_v49 }
 0x135   : > { %v3013_v25 = vpop.permute.xlu0 %3012 }
 0x136   : > { %v1331_v36 = vsel %vm867_vm2, %v1299_v0, %v3004_v12  ;;  %v2036_v19 = vsel %vm867_vm2, %v2004_v56, %v3005_v6  ;;  %v3015_v23 = vunpack.i.h.bf16 %v3013_v25  ;;  %v3014_v38 = vunpack.i.l.bf16 %v3013_v25  ;;  %3202 = vrot.lane.b32.xlu2 %v3732_v51, %s3247_s21  ;;  %v1741_v6 = vld [vmem:[#allocation2 + $0x231] sm:$0xff] }
 0x137   : > { %v1348_v42 = vpack.c.bf16 %v1331_v36, %v1330_v50  ;;  %v2065_v40 = vpack.c.bf16 %v2037_v11, %v2036_v19  ;;  %v4698_v51 = vpack.c.bf16 %v3911_v9, %v3908_v1  ;;  %v1301_v9 = vsel %vm408_vm0, %v4181_v29, %v3025_v62  ;;  %v3053_v52 = vpop.permute.xlu2 %3052 }
 0x138   : > { %v1277_v37 = vsel %vm408_vm0, %v925_v14, %v3015_v23  ;;  %v1276_v41 = vsel %vm408_vm0, %v924_v59, %v3014_v38  ;;  %v3040_v12 = vunpack.i.h.bf16 %v3038_v44  ;;  %v3231_v11 = vpack.i.bf16 %v1741_v6, %v1740_v27 }
 0x139   : > { %2614 = vmatmul.msk.bf16.gmra.mxu3 %vm1358_vm3, %v1348_v42  ;;  %v1308_v57 = vsel %vm867_vm2, %v1276_v41, %v3010_v21  ;;  %v3054_v23 = vunpack.i.l.bf16 %v3053_v52  ;;  %v4699_v21 = vpack.c.bf16 %v3773_v17, %v3770_v34 }
 0x13a   : > { %2645 = vmatmul.msk.bf16.gmra.mxu2 %vm1358_vm3, %v2065_v40  ;;  %3227 = vrot.lane.b32.xlu1 %v3226_v45, %s3247_s21  ;;  %v3055_v45 = vunpack.i.h.bf16 %v3053_v52 }
 0x13b   : > { %v3018_v4 = vpop.permute.xlu1 %3017 }
 0x13c   : > { %v3019_v32 = vunpack.i.l.bf16 %v3018_v4  ;;  %v3020_v61 = vunpack.i.h.bf16 %v3018_v4  ;;  %v2009_v41 = vsel %vm408_vm0, %v3756_v2, %v3055_v45  ;;  %v2008_v4 = vsel %vm408_vm0, %v3754_v60, %v3054_v23  ;;  %v4704_v45 = vld [vmem:[#allocation7_spill] sm:$0xff] }
 0x13d   : > { %v3028_v43 = vpop.permute.xlu0 %3027  ;;  %v4700_v60 = vpack.c.bf16 %v3992_v13, %v3989_v47  ;;  %v1658_v13 = vld [vmem:[#allocation2 + $0x107] sm:$0xff]  ;;  %v1659_v47 = vld [vmem:[#allocation2 + $0x10f] sm:$0xff] }
 0x13e   : > { %v3030_v46 = vunpack.i.h.bf16 %v3028_v43  ;;  %v1309_v39 = vsel %vm867_vm2, %v1277_v37, %v3019_v32  ;;  %v3029_v35 = vunpack.i.l.bf16 %v3028_v43  ;;  %3217 = vrot.lane.b32.xlu2 %v4075_v26, %s3247_s21  ;;  %v1332_v7 = vsel %vm867_vm2, %v1300_v3, %v3020_v61  ;;  %v927_v26 = vld [vmem:[#allocation2 + $0xaf] sm:$0xff] }
 0x13f   : > { %v1337_v30 = vpack.c.bf16 %v1309_v39, %v1308_v57  ;;  %v3068_v37 = vpop.permute.xlu2 %3067 }
 0x140   : > { %v2007_v16 = vsel %vm408_vm0, %v3885_v24, %v3030_v46  ;;  %v2006_v55 = vsel %vm408_vm0, %v3883_v5, %v3029_v35  ;;  %v929_v35 = vld [vmem:[#allocation2 + $0xcf] sm:$0xff]  ;;  %v3069_v17 = vunpack.i.l.bf16 %v3068_v37 }
 0x141   : > { %2603 = vmatmul.msk.bf16.gmra.mxu0 %vm1358_vm3, %v1337_v30  ;;  %2626 = vmatmul.msk.bf16.gmra.mxu1 %vm1358_vm3, %v4698_v51  ;;  %v2039_v54 = vsel %vm867_vm2, %v2007_v16, %v3039_v20  ;;  %v2830_v16 = vunpack.i.h.bf16 %v3700_v31  ;;  %v3070_v31 = vunpack.i.h.bf16 %v3068_v37 }
 0x143   : > { %v3033_v53 = vpop.permute.xlu1 %3032 }
 0x144   : > { %v3035_v24 = vunpack.i.h.bf16 %v3033_v53  ;;  %v3034_v33 = vunpack.i.l.bf16 %v3033_v53 }
 0x145   : > { %v3043_v1 = vpop.permute.xlu0 %3042 }
 0x146   : > { %v1333_v15 = vsel %vm867_vm2, %v1301_v9, %v3034_v33  ;;  %v2038_v28 = vsel %vm867_vm2, %v2006_v55, %v3035_v24  ;;  %v3045_v48 = vunpack.i.h.bf16 %v3043_v1  ;;  %v3044_v5 = vunpack.i.l.bf16 %v3043_v1  ;;  %3232 = vrot.lane.b32.xlu2 %v3231_v11, %s3248_s30  ;;  %v930_v11 = vld [vmem:[#allocation2 + $0xe7] sm:$0xff] }
 0x147   : > { %v1349_v56 = vpack.c.bf16 %v1333_v15, %v1332_v7  ;;  %v2066_v49 = vpack.c.bf16 %v2039_v54, %v2038_v28  ;;  %v3083_v62 = vpop.permute.xlu2 %3082  ;;  %v864_v54 = vsel %vm408_vm0, %v4117_v8, %v2830_v16  ;;  %v4701_v28 = vpack.c.bf16 %v3922_v63, %v3919_v18 }
 0x148   : > { %v1279_v0 = vsel %vm408_vm0, %v927_v26, %v3045_v48  ;;  %v1278_v25 = vsel %vm408_vm0, %v926_v22, %v3044_v5  ;;  %v4702_v5 = vld [vmem:[#allocation13_spill] sm:$0xff]  ;;  %v3085_v27 = vunpack.i.h.bf16 %v3083_v62  ;;  %v3084_v52 = vunpack.i.l.bf16 %v3083_v62 }
 0x149   : > { %2615 = vmatmul.msk.bf16.gmra.mxu3 %vm1358_vm3, %v1349_v56  ;;  %v1310_v38 = vsel %vm867_vm2, %v1278_v25, %v3040_v12 }
 0x14a   : > { %2646 = vmatmul.msk.bf16.gmra.mxu2 %vm1358_vm3, %v2066_v49 }
 0x14b   : > { %v3048_v50 = vpop.permute.xlu1 %3047 }
 0x14c   : > { %v3049_v36 = vunpack.i.l.bf16 %v3048_v50  ;;  %v3050_v59 = vunpack.i.h.bf16 %v3048_v50 }
 0x14d   : > { %v3058_v19 = vpop.permute.xlu0 %3057 }
 0x14e   : > { %v1311_v42 = vsel %vm867_vm2, %v1279_v0, %v3049_v36  ;;  %v3059_v14 = vunpack.i.l.bf16 %v3058_v19  ;;  %v2040_v57 = vsel %vm867_vm2, %v2008_v4, %v3050_v59  ;;  %v3060_v34 = vunpack.i.h.bf16 %v3058_v19  ;;  %v931_v0 = vld [vmem:[#allocation2 + $0xef] sm:$0xff]  ;;  %v1660_v4 = vld [vmem:[#allocation2 + $0x127] sm:$0xff] }
 0x14f   : > { %v1338_v40 = vpack.c.bf16 %v1311_v42, %v1310_v38  ;;  %v3098_v48 = vpop.permute.xlu2 %3097  ;;  %v1283_v50 = vsel %vm408_vm0, %v931_v0, %v3085_v27  ;;  %v1282_v36 = vsel %vm408_vm0, %v930_v11, %v3084_v52  ;;  %v4703_v19 = vld [vmem:[#allocation8_spill] sm:$0xff]  ;;  %v4711_v0 = vld [vmem:[#allocation6_spill] sm:$0xff] }
 0x150   : > { %v2041_v39 = vsel %vm867_vm2, %v2009_v41, %v3059_v14  ;;  %v4705_v23 = vpack.c.bf16 %v4703_v19, %v4704_v45  ;;  %v4270_v27 = vld [vmem:[#allocation2 + $0x147] sm:$0xff]  ;;  %v4272_v52 = vld [vmem:[#allocation2 + $0x14f] sm:$0xff] }
 0x151   : > { %2604 = vmatmul.msk.bf16.gmra.mxu0 %vm1358_vm3, %v1338_v40  ;;  %2627 = vmatmul.msk.bf16.gmra.mxu1 %vm1358_vm3, %v4699_v21  ;;  %v2067_v30 = vpack.c.bf16 %v2041_v39, %v2040_v57  ;;  %v3100_v57 = vunpack.i.h.bf16 %v3098_v48  ;;  %v3099_v39 = vunpack.i.l.bf16 %v3098_v48 }
 0x153   : > { %v3063_v32 = vpop.permute.xlu1 %3062 }
 0x154   : > { %v3065_v43 = vunpack.i.h.bf16 %v3063_v32  ;;  %v3064_v44 = vunpack.i.l.bf16 %v3063_v32  ;;  %v1661_v32 = vld [vmem:[#allocation2 + $0x12f] sm:$0xff] }
 0x155   : > { %v3073_v46 = vpop.permute.xlu0 %3072 }
 0x156   : > { %v1281_v20 = vsel %vm408_vm0, %v929_v35, %v3065_v43  ;;  %v1280_v2 = vsel %vm408_vm0, %v928_v10, %v3064_v44  ;;  %v3075_v53 = vunpack.i.h.bf16 %v3073_v46  ;;  %v3074_v24 = vunpack.i.l.bf16 %v3073_v46 }
 0x157   : > { %v1312_v61 = vsel %vm867_vm2, %v1280_v2, %v3060_v34  ;;  %v1313_v3 = vsel %vm867_vm2, %v1281_v20, %v3069_v17  ;;  %v4706_v34 = vld [vmem:[#allocation4_spill] sm:$0xff]  ;;  %v4708_v2 = vld [vmem:[#allocation10_spill] sm:$0xff] }
 0x158   : > { %v1339_v9 = vpack.c.bf16 %v1313_v3, %v1312_v61  ;;  %v2011_v8 = vsel %vm408_vm0, %v1659_v47, %v3075_v53  ;;  %v2010_v49 = vsel %vm408_vm0, %v1658_v13, %v3074_v24 }
 0x159   : > { %2632 = vmatmul.msk.bf16.vlgmr.msrb.gmra.mxu3 %vm1358_vm3, %v4700_v60  ;;  %v2042_v6 = vsel %vm867_vm2, %v2010_v49, %v3070_v31  ;;  %v4709_v60 = vld [vmem:[#allocation9_spill] sm:$0xff] }
 0x15a   : > { %2647 = vmatmul.msk.bf16.gmra.mxu2 %vm1358_vm3, %v2067_v30  ;;  %v4707_v30 = vld [vmem:[#allocation3_spill] sm:$0xff]  ;;  %v4710_v62 = vpack.c.bf16 %v4708_v2, %v4709_v60 }
 0x15b   : > { %v3078_v51 = vpop.permute.xlu1 %3077 }
 0x15c   : > { %v3079_v15 = vunpack.i.l.bf16 %v3078_v51  ;;  %v3080_v18 = vunpack.i.h.bf16 %v3078_v51  ;;  %v3113_v38 = vpop.permute.xlu2 %3112 }
 0x15d   : > { %v3088_v55 = vpop.permute.xlu0 %3087  ;;  %v3115_v49 = vunpack.i.h.bf16 %v3113_v38 }
 0x15e   : > { %v3090_v33 = vunpack.i.h.bf16 %v3088_v55  ;;  %v4225_v1 = vpop.f32.mrf.mxu1  ;;  %v2043_v12 = vsel %vm867_vm2, %v2011_v8, %v3079_v15  ;;  %v3089_v63 = vunpack.i.l.bf16 %v3088_v55  ;;  %v1314_v59 = vsel %vm867_vm2, %v1282_v36, %v3080_v18  ;;  %v4712_v18 = vld [vmem:[#allocation5_spill] sm:$0xff] }
 0x15f   : > { %v2068_v25 = vpack.c.bf16 %v2043_v12, %v2042_v6 }
 0x160   : > { %v897_v7 = vsel %vm867_vm2, %v864_v54, %v3090_v33  ;;  %v1315_v14 = vsel %vm867_vm2, %v1283_v50, %v3089_v63  ;;  %v4713_v63 = vpack.c.bf16 %v4711_v0, %v4712_v18 }
 0x161   : > { %2605 = vmatmul.msk.bf16.gmra.mxu0 %vm1358_vm3, %v1339_v9  ;;  %2628 = vmatmul.msk.bf16.gmra.mxu1 %vm1358_vm3, %v4701_v28  ;;  %v914_v56 = vpack.c.bf16 %v897_v7, %v4702_v5  ;;  %v1340_v46 = vpack.c.bf16 %v1315_v14, %v1314_v59 }
 0x163   : > { %v3093_v22 = vpop.permute.xlu1 %3092 }
 0x164   : > { %v3095_v21 = vunpack.i.h.bf16 %v3093_v22  ;;  %v3094_v37 = vunpack.i.l.bf16 %v3093_v22  ;;  %v3114_v22 = vunpack.i.l.bf16 %v3113_v38 }
 0x165   : > { %v3103_v26 = vpop.permute.xlu0 %3102 }
 0x166   : > { %v4244_v42 = vpop.f32.mrf.mxu1  ;;  %v2013_v10 = vsel %vm408_vm0, %v1661_v32, %v3095_v21  ;;  %v2012_v35 = vsel %vm408_vm0, %v1660_v4, %v3094_v37  ;;  %v3105_v51 = vunpack.i.h.bf16 %v3103_v26  ;;  %v3104_v61 = vunpack.i.l.bf16 %v3103_v26 }
 0x167   : > { %v2044_v3 = vsel %vm867_vm2, %v2012_v35, %v3099_v39  ;;  %v2045_v55 = vsel %vm867_vm2, %v2013_v10, %v3100_v57  ;;  %v2014_v11 = vsel %vm408_vm0, %v4270_v27, %v3114_v22  ;;  %v1670_v39 = vld [vmem:[#allocation2 + $0x1c7] sm:$0xff]  ;;  %v1671_v10 = vld [vmem:[#allocation2 + $0x1cf] sm:$0xff] }
 0x168   : > { %v3128_v24 = vpop.permute.xlu2 %3127  ;;  %v2069_v54 = vpack.c.bf16 %v2045_v55, %v2044_v3  ;;  %v1285_v31 = vsel %vm408_vm0, %v1659_v47, %v3105_v51  ;;  %v1284_v15 = vsel %vm408_vm0, %v1658_v13, %v3104_v61 }
 0x169   : > { %2633 = vmatmul.msk.bf16.gmra.mxu3 %vm1358_vm3, %v4705_v23  ;;  %v3130_v50 = vunpack.i.h.bf16 %v3128_v24  ;;  %v3129_v36 = vunpack.i.l.bf16 %v3128_v24 }
 0x16a   : > { %2648 = vmatmul.msk.bf16.gmra.mxu2 %vm1358_vm3, %v2068_v25 }
 0x16b   : > { %v3108_v40 = vpop.permute.xlu1 %3107  ;;  %v1287_v14 = vsel %vm408_vm0, %v1661_v32, %v3130_v50  ;;  %v1286_v21 = vsel %vm408_vm0, %v1660_v4, %v3129_v36 }
 0x16c   : > { %v3110_v9 = vunpack.i.h.bf16 %v3108_v40  ;;  %v3109_v7 = vunpack.i.l.bf16 %v3108_v40 }
 0x16d   : > { %v3118_v41 = vpop.permute.xlu0 %3117 }
 0x16e   : > { %v3120_v43 = vunpack.i.h.bf16 %v3118_v41  ;;  %v3119_v44 = vunpack.i.l.bf16 %v3118_v41  ;;  %v4262_v33 = vpop.f32.mrf.mxu1  ;;  %v1316_v48 = vsel %vm867_vm2, %v1284_v15, %v3109_v7  ;;  %v1317_v5 = vsel %vm867_vm2, %v1285_v31, %v3110_v9  ;;  %v4715_v9 = vld [vmem:[#allocation11_spill] sm:$0xff] }
 0x16f   : > { %v1341_v26 = vpack.c.bf16 %v1317_v5, %v1316_v48 }
 0x170   : > { %v898_v17 = vsel %vm867_vm2, %v4706_v34, %v3119_v44  ;;  %v899_v20 = vsel %vm867_vm2, %v4707_v30, %v3120_v43  ;;  %v3143_v47 = vpop.permute.xlu2 %3142 }
 0x171   : > { %2606 = vmatmul.msk.bf16.gmra.mxu0 %vm1358_vm3, %v1340_v46  ;;  %2629 = vmatmul.msk.bf16.gmra.mxu1 %vm1358_vm3, %v4710_v62  ;;  %v915_v16 = vpack.c.bf16 %v899_v20, %v898_v17  ;;  %v3145_v46 = vunpack.i.h.bf16 %v3143_v47  ;;  %v3144_v57 = vunpack.i.l.bf16 %v3143_v47  ;;  %v4297_v62 = vld [vmem:[#allocation2 + $0x167] sm:$0xff] }
 0x173   : > { %v3123_v53 = vpop.permute.xlu1 %3122  ;;  %v2023_v61 = vsel %vm408_vm0, %v1671_v10, %v3145_v46  ;;  %v2022_v3 = vsel %vm408_vm0, %v1670_v39, %v3144_v57  ;;  %v1672_v57 = vld [vmem:[#allocation2 + $0x1e7] sm:$0xff]  ;;  %v1673_v39 = vld [vmem:[#allocation2 + $0x1ef] sm:$0xff] }
 0x174   : > { %v3125_v13 = vunpack.i.h.bf16 %v3123_v53  ;;  %v3124_v12 = vunpack.i.l.bf16 %v3123_v53 }
 0x175   : > { %v3133_v28 = vpop.permute.xlu0 %3132 }
 0x176   : > { %v4274_v6 = vpop.f32.mrf.mxu1  ;;  %v2046_v19 = vsel %vm867_vm2, %v2014_v11, %v3124_v12  ;;  %v3135_v38 = vunpack.i.h.bf16 %v3133_v28  ;;  %v3134_v40 = vunpack.i.l.bf16 %v3133_v28 }
 0x178   : > { %v3158_v37 = vpop.permute.xlu2 %3157  ;;  %v1318_v43 = vsel %vm867_vm2, %v1286_v21, %v3134_v40  ;;  %v1319_v44 = vsel %vm867_vm2, %v1287_v14, %v3135_v38 }
 0x179   : > { %2634 = vmatmul.msk.bf16.gmra.mxu3 %vm1358_vm3, %v914_v56  ;;  %v2015_v56 = vsel %vm408_vm0, %v4272_v52, %v3115_v49  ;;  %v1342_v32 = vpack.c.bf16 %v1319_v44, %v1318_v43  ;;  %v3160_v49 = vunpack.i.h.bf16 %v3158_v37  ;;  %v3159_v22 = vunpack.i.l.bf16 %v3158_v37 }
 0x17a   : > { %2649 = vmatmul.msk.bf16.gmra.mxu2 %vm1358_vm3, %v2069_v54  ;;  %v2047_v45 = vsel %vm867_vm2, %v2015_v56, %v3125_v13  ;;  %v4714_v54 = vld [vmem:[#allocation12_spill] sm:$0xff] }
 0x17b   : > { %v3138_v8 = vpop.permute.xlu1 %3137  ;;  %v2070_v59 = vpack.c.bf16 %v2047_v45, %v2046_v19  ;;  %v4716_v7 = vpack.c.bf16 %v4714_v54, %v4715_v9 }
 0x17c   : > { %v3140_v4 = vunpack.i.h.bf16 %v3138_v8  ;;  %v3139_v30 = vunpack.i.l.bf16 %v3138_v8 }
 0x17d   : > { %v3148_v25 = vpop.permute.xlu0 %3147 }
 0x17e   : > { %v4289_v41 = vpop.f32.mrf.mxu1  ;;  %v3150_v53 = vunpack.i.h.bf16 %v3148_v25  ;;  %v3149_v24 = vunpack.i.l.bf16 %v3148_v25  ;;  %v2016_v28 = vsel %vm408_vm0, %v4297_v62, %v3139_v30  ;;  %v1288_v25 = vsel %vm408_vm0, %v4270_v27, %v3159_v22 }
 0x180   : > { %v3173_v31 = vpop.permute.xlu2 %3172  ;;  %v2048_v13 = vsel %vm867_vm2, %v2016_v28, %v3149_v24 }
 0x181   : > { %2607 = vmatmul.msk.bf16.gmra.mxu0 %vm1358_vm3, %v1341_v26  ;;  %2630 = vmatmul.msk.bf16.gmra.mxu1 %vm1358_vm3, %v4713_v63  ;;  %v1289_v63 = vsel %vm408_vm0, %v4272_v52, %v3160_v49  ;;  %v3175_v40 = vunpack.i.h.bf16 %v3173_v31 }
 0x184   : > { %v3153_v23 = vpop.permute.xlu1 %3152 }
 0x185   : > { %v3163_v35 = vpop.permute.xlu0 %3162  ;;  %v3155_v2 = vunpack.i.h.bf16 %v3153_v23  ;;  %v3154_v60 = vunpack.i.l.bf16 %v3153_v23 }
 0x186   : > { %v3165_v11 = vunpack.i.h.bf16 %v3163_v35  ;;  %v3164_v0 = vunpack.i.l.bf16 %v3163_v35 }
 0x187   : > { %v2054_v48 = vsel %vm867_vm2, %v2022_v3, %v3154_v60  ;;  %v2055_v5 = vsel %vm867_vm2, %v2023_v61, %v3155_v2  ;;  %v4351_v3 = vld [vmem:[#allocation2 + $0x187] sm:$0xff] }
 0x188   : > { %v2074_v26 = vpack.c.bf16 %v2055_v5, %v2054_v48  ;;  %v1320_v38 = vsel %vm867_vm2, %v1288_v25, %v3164_v0  ;;  %v3188_v37 = vpop.permute.xlu2 %3187 }
 0x189   : > { %2635 = vmatmul.msk.bf16.gmra.mxu3 %vm1358_vm3, %v915_v16  ;;  %v4299_v16 = vld [vmem:[#allocation2 + $0x16f] sm:$0xff]  ;;  %v3190_v5 = vunpack.i.h.bf16 %v3188_v37 }
 0x18a   : > { %2650 = vmatmul.msk.bf16.gmra.mxu2 %vm1358_vm3, %v2070_v59  ;;  %v2017_v15 = vsel %vm408_vm0, %v4299_v16, %v3140_v4  ;;  %v3174_v59 = vunpack.i.l.bf16 %v3173_v31 }
 0x18b   : > { %v2049_v12 = vsel %vm867_vm2, %v2017_v15, %v3150_v53  ;;  %v2025_v53 = vsel %vm408_vm0, %v1673_v39, %v3175_v40 }
 0x18c   : > { %v4295_v17 = vpop.permute.xlu1 %3167  ;;  %v2071_v19 = vpack.c.bf16 %v2049_v12, %v2048_v13  ;;  %v2024_v24 = vsel %vm408_vm0, %v1672_v57, %v3174_v59 }
 0x18d   : > { %v2146_v34 = vpop.f32.mrf.mxu2  ;;  %v3178_v50 = vpop.permute.xlu0 %3177  ;;  %v3169_v2 = vunpack.i.l.bf16 %v4295_v17 }
 0x18e   : > { %v1420_v20 = vpop.f32.mrf.mxu0  ;;  %v3179_v31 = vunpack.i.l.bf16 %v3178_v50 }
 0x18f   : > { %v1566_v51 = vadd.f32 %v4225_v1, %v1420_v20  ;;  %v4316_v1 = vpop.f32.mrf.mxu1  ;;  %v4348_v20 = vld [vmem:[#allocation2 + $0x18f] sm:$0xff]  ;;  %v2018_v28 = vsel %vm408_vm0, %v4351_v3, %v3169_v2 }
 0x190   : > { %v2050_v0 = vsel %vm867_vm2, %v2018_v28, %v3179_v31 }
 0x191   : > { %v2226_v55 = vadd.f32 %v2146_v34, %v1566_v51  ;;  %2608 = vmatmul.msk.bf16.gmra.mxu0 %vm1358_vm3, %v1342_v32  ;;  %2631 = vmatmul.msk.bf16.gmra.mxu1 %vm1358_vm3, %v4716_v7  ;;  %v3170_v34 = vunpack.i.h.bf16 %v4295_v17  ;;  %v3180_v7 = vunpack.i.h.bf16 %v3178_v50 }
 0x193   : > { %v2432_v8 = vpack.c.bf16 %v2226_v55, %v2226_v55  ;;  %v2327_v45 = vmul.f32 %v2226_v55, %v2226_v55  ;;  %v2258_v52 = vsel %vm408_vm0, %v2226_v55, 0.0  ;;  %v2019_v54 = vsel %vm408_vm0, %v4348_v20, %v3170_v34 }
 0x194   : > { %v3183_v36 = vpop.permute.xlu1 %3182 }
 0x195   : > { %2465 = vst.msk [vmem:[%s4314_s24] sm:$0xf] %vm2464_vm4, %v2432_v8  ;;  %v2148_v47 = vpop.f32.mrf.mxu2  ;;  %v2359_v10 = vsel %vm408_vm0, %v2327_v45, 0.0  ;;  %v3185_v51 = vunpack.i.h.bf16 %v3183_v36  ;;  %v3184_v61 = vunpack.i.l.bf16 %v3183_v36  ;;  %v3193_v17 = vpop.permute.xlu0 %3192 }
 0x196   : > { %v1422_v56 = vpop.f32.mrf.mxu0  ;;  %v3194_v45 = vunpack.i.l.bf16 %v3193_v17 }
 0x197   : > { %v1568_v18 = vadd.f32 %v4244_v42, %v1422_v56  ;;  %v1321_v42 = vsel %vm867_vm2, %v1289_v63, %v3165_v11  ;;  %v4339_v43 = vpop.f32.mrf.mxu1  ;;  %v2057_v48 = vsel %vm867_vm2, %v2025_v53, %v3185_v51  ;;  %v3203_v63 = vpop.permute.xlu2 %3202 }
 0x198   : > { %v1343_v4 = vpack.c.bf16 %v1321_v42, %v1320_v38  ;;  %v1291_v38 = vsel %vm408_vm0, %v4299_v16, %v3190_v5 }
 0x199   : > { %v2227_v23 = vadd.f32 %v2148_v47, %v1568_v18  ;;  %2654 = vmatmul.msk.bf16.vlgmr.msra.gmra.mxu3 %vm1358_vm3, %v2074_v26  ;;  %v3189_v26 = vunpack.i.l.bf16 %v3188_v37  ;;  %v2051_v18 = vsel %vm867_vm2, %v2019_v54, %v3180_v7 }
 0x19a   : > { %2651 = vmatmul.msk.bf16.gmra.mxu2 %vm1358_vm3, %v2071_v19  ;;  %v3195_v19 = vunpack.i.h.bf16 %v3193_v17  ;;  %v2072_v40 = vpack.c.bf16 %v2051_v18, %v2050_v0 }
 0x19b   : > { %v2259_v27 = vsel %vm408_vm0, %v2227_v23, 0.0  ;;  %v2328_v14 = vmul.f32 %v2227_v23, %v2227_v23  ;;  %v2433_v21 = vpack.c.bf16 %v2227_v23, %v2227_v23  ;;  %v1290_v42 = vsel %vm408_vm0, %v4297_v62, %v3189_v26 }
 0x19c   : > { %v2260_v44 = vadd.f32 %v2259_v27, %v2258_v52  ;;  %v4341_v46 = vpop.f32.mrf.mxu3  ;;  %v4359_v15 = vpop.permute.xlu1 %3197  ;;  %v1322_v52 = vsel %vm867_vm2, %v1290_v42, %v3194_v45  ;;  %v1323_v27 = vsel %vm867_vm2, %v1291_v38, %v3195_v19 }
 0x19d   : > { %v2360_v35 = vsel %vm408_vm0, %v2328_v14, 0.0  ;;  %2466 = vst.msk [vmem:[%s4314_s24 + $0x4] sm:$0xf] %vm2464_vm4, %v2433_v21  ;;  %v2151_v32 = vpop.f32.mrf.mxu2  ;;  %v3205_v14 = vunpack.i.h.bf16 %v3203_v63  ;;  %v3208_v16 = vpop.permute.xlu0 %3207  ;;  %v3199_v2 = vunpack.i.l.bf16 %v4359_v15 }
 0x19e   : > { %v2361_v30 = vadd.f32 %v2360_v35, %v2359_v10  ;;  %v1425_v60 = vpop.f32.mrf.mxu0  ;;  %v3200_v35 = vunpack.i.h.bf16 %v4359_v15  ;;  %v3210_v15 = vunpack.i.h.bf16 %v3208_v16  ;;  %v3209_v28 = vunpack.i.l.bf16 %v3208_v16 }
 0x19f   : > { %v1571_v55 = vadd.f32 %v4262_v33, %v1425_v60  ;;  %v2056_v33 = vsel %vm867_vm2, %v2024_v24, %v3184_v61  ;;  %v4373_v25 = vpop.f32.mrf.mxu1  ;;  %v2027_v24 = vsel %vm408_vm0, %v4181_v29, %v3205_v14 }
 0x1a0   : > { %v2075_v11 = vpack.c.bf16 %v2057_v48, %v2056_v33 }
 0x1a1   : > { %v2228_v9 = vadd.f32 %v2151_v32, %v1571_v55  ;;  %2609 = vmatmul.msk.bf16.gmra.mxu0 %vm1358_vm3, %v1343_v4  ;;  %v1344_v32 = vpack.c.bf16 %v1323_v27, %v1322_v52  ;;  %v1668_v55 = vld [vmem:[#allocation2 + $0x1a7] sm:$0xff] }
 0x1a2   : > { %v2020_v33 = vsel %vm408_vm0, %v1668_v55, %v3199_v2 }
 0x1a3   : > { %v2261_v8 = vsel %vm408_vm0, %v2228_v9, 0.0  ;;  %v2329_v49 = vmul.f32 %v2228_v9, %v2228_v9  ;;  %v2434_v22 = vpack.c.bf16 %v2228_v9, %v2228_v9  ;;  %v3218_v9 = vpop.permute.xlu2 %3217  ;;  %v2052_v0 = vsel %vm867_vm2, %v2020_v33, %v3209_v28 }
 0x1a4   : > { %v2262_v47 = vadd.f32 %v2261_v8, %v2260_v44  ;;  %v4366_v13 = vpop.f32.mrf.mxu3  ;;  %v3204_v44 = vunpack.i.l.bf16 %v3203_v63  ;;  %v3213_v57 = vpop.permute.xlu1 %3212  ;;  %v3220_v48 = vunpack.i.h.bf16 %v3218_v9 }
 0x1a5   : > { %v2362_v12 = vsel %vm408_vm0, %v2329_v49, 0.0  ;;  %2467 = vst.msk [vmem:[%s4314_s24 + $0x8] sm:$0xf] %vm2464_vm4, %v2434_v22  ;;  %v2153_v56 = vpop.f32.mrf.mxu2  ;;  %v3215_v51 = vunpack.i.h.bf16 %v3213_v57  ;;  %v3214_v61 = vunpack.i.l.bf16 %v3213_v57  ;;  %v3219_v49 = vunpack.i.l.bf16 %v3218_v9  ;;  %v3223_v22 = vpop.permute.xlu0 %3222  ;;  %v1676_v57 = vld [vmem:[#allocation2 + $0x227] sm:$0xff] }
 0x1a6   : > { %v2363_v50 = vadd.f32 %v2362_v12, %v2361_v30  ;;  %v1427_v36 = vpop.f32.mrf.mxu0  ;;  %v1669_v30 = vld [vmem:[#allocation2 + $0x1af] sm:$0xff]  ;;  %v2026_v54 = vsel %vm408_vm0, %v4172_v58, %v3204_v44  ;;  %v3224_v19 = vunpack.i.l.bf16 %v3223_v22 }
 0x1a7   : > { %v1573_v23 = vadd.f32 %v4274_v6, %v1427_v36  ;;  %v4397_v7 = vpop.f32.mrf.mxu1  ;;  %v2021_v31 = vsel %vm408_vm0, %v1669_v30, %v3200_v35  ;;  %v2059_v29 = vsel %vm867_vm2, %v2027_v24, %v3215_v51  ;;  %v3225_v36 = vunpack.i.h.bf16 %v3223_v22 }
 0x1a8   : > { %v2053_v18 = vsel %vm867_vm2, %v2021_v31, %v3210_v15  ;;  %v1292_v38 = vsel %vm408_vm0, %v4351_v3, %v3219_v49 }
 0x1a9   : > { %v2229_v59 = vadd.f32 %v2153_v56, %v1573_v23  ;;  %2655 = vmatmul.msk.bf16.gmra.mxu3 %vm1358_vm3, %v2075_v11  ;;  %v1293_v23 = vsel %vm408_vm0, %v4348_v20, %v3220_v48  ;;  %v1324_v27 = vsel %vm867_vm2, %v1292_v38, %v3224_v19 }
 0x1aa   : > { %2652 = vmatmul.msk.bf16.gmra.mxu2 %vm1358_vm3, %v2072_v40  ;;  %v2073_v40 = vpack.c.bf16 %v2053_v18, %v2052_v0 }
 0x1ab   : > { %v2263_v6 = vsel %vm408_vm0, %v2229_v59, 0.0  ;;  %v2330_v21 = vmul.f32 %v2229_v59, %v2229_v59  ;;  %v2435_v37 = vpack.c.bf16 %v2229_v59, %v2229_v59 }
 0x1ac   : > { %v2264_v62 = vadd.f32 %v2263_v6, %v2262_v47  ;;  %v4385_v39 = vpop.f32.mrf.mxu3  ;;  %v3228_v42 = vpop.permute.xlu1 %3227 }
 0x1ad   : > { %v2364_v10 = vsel %vm408_vm0, %v2330_v21, 0.0  ;;  %2468 = vst.msk [vmem:[%s4314_s24 + $0xc] sm:$0xf] %vm2464_vm4, %v2435_v37  ;;  %v2156_v34 = vpop.f32.mrf.mxu2  ;;  %v3230_v14 = vunpack.i.h.bf16 %v3228_v42  ;;  %v3229_v3 = vunpack.i.l.bf16 %v3228_v42  ;;  %v3233_v37 = vpop.permute.xlu2 %3232 }
 0x1ae   : > { %v2365_v4 = vadd.f32 %v2364_v10, %v2363_v50  ;;  %v1430_v60 = vpop.f32.mrf.mxu0  ;;  %v3235_v30 = vunpack.i.h.bf16 %v3233_v37  ;;  %v3234_v2 = vunpack.i.l.bf16 %v3233_v37 }
 0x1af   : > { %v1576_v53 = vadd.f32 %v4289_v41, %v1430_v60  ;;  %v2058_v41 = vsel %vm867_vm2, %v2026_v54, %v3214_v61  ;;  %v4418_v52 = vpop.f32.mrf.mxu1  ;;  %v2028_v61 = vsel %vm408_vm0, %v1676_v57, %v3229_v3 }
 0x1b0   : > { %v2076_v11 = vpack.c.bf16 %v2059_v29, %v2058_v41 }
 0x1b1   : > { %v2230_v17 = vadd.f32 %v2156_v34, %v1576_v53  ;;  %2610 = vmatmul.msk.bf16.gmra.mxu0 %vm1358_vm3, %v1344_v32  ;;  %v2060_v53 = vsel %vm867_vm2, %v2028_v61, %v3234_v2 }
 0x1b3   : > { %v2265_v58 = vsel %vm408_vm0, %v2230_v17, 0.0  ;;  %v2331_v5 = vmul.f32 %v2230_v17, %v2230_v17  ;;  %v2436_v8 = vpack.c.bf16 %v2230_v17, %v2230_v17 }
 0x1b4   : > { %v2266_v26 = vadd.f32 %v2265_v58, %v2264_v62  ;;  %v4405_v47 = vpop.f32.mrf.mxu3  ;;  %v1677_v62 = vld [vmem:[#allocation2 + $0x22f] sm:$0xff] }
 0x1b5   : > { %v2366_v12 = vsel %vm408_vm0, %v2331_v5, 0.0  ;;  %2469 = vst.msk [vmem:[%s4314_s24 + $0x10] sm:$0xf] %vm2464_vm4, %v2436_v8  ;;  %v2158_v56 = vpop.f32.mrf.mxu2  ;;  %v2029_v51 = vsel %vm408_vm0, %v1677_v62, %v3230_v14 }
 0x1b6   : > { %v2367_v63 = vadd.f32 %v2366_v12, %v2365_v4  ;;  %v1432_v50 = vpop.f32.mrf.mxu0  ;;  %v2061_v24 = vsel %vm867_vm2, %v2029_v51, %v3235_v30 }
 0x1b7   : > { %v1578_v45 = vadd.f32 %v4316_v1, %v1432_v50  ;;  %v1325_v1 = vsel %vm867_vm2, %v1293_v23, %v3225_v36  ;;  %v1590_v17 = vpop.f32.mrf.mxu1  ;;  %v2077_v41 = vpack.c.bf16 %v2061_v24, %v2060_v53 }
 0x1b8   : > { %v1345_v34 = vpack.c.bf16 %v1325_v1, %v1324_v27 }
 0x1b9   : > { %v2231_v59 = vadd.f32 %v2158_v56, %v1578_v45  ;;  %2656 = vmatmul.msk.bf16.gmra.mxu3 %vm1358_vm3, %v2076_v11 }
 0x1ba   : > { %2653 = vmatmul.msk.bf16.gmra.mxu2 %vm1358_vm3, %v2073_v40 }
 0x1bb   : > { %v2267_v20 = vsel %vm408_vm0, %v2231_v59, 0.0  ;;  %v2332_v6 = vmul.f32 %v2231_v59, %v2231_v59  ;;  %v2437_v21 = vpack.c.bf16 %v2231_v59, %v2231_v59 }
 0x1bc   : > { %v2268_v16 = vadd.f32 %v2267_v20, %v2266_v26  ;;  %v4424_v44 = vpop.f32.mrf.mxu3 }
 0x1bd   : > { %v2368_v10 = vsel %vm408_vm0, %v2332_v6, 0.0  ;;  %2470 = vst.msk [vmem:[%s4314_s24 + $0x14] sm:$0xf] %vm2464_vm4, %v2437_v21  ;;  %v2161_v35 = vpop.f32.mrf.mxu2 }
 0x1be   : > { %v2369_v32 = vadd.f32 %v2368_v10, %v2367_v63  ;;  %v1435_v4 = vpop.f32.mrf.mxu0 }
 0x1bf   : > { %v1581_v60 = vadd.f32 %v4339_v43, %v1435_v4  ;;  %v1592_v0 = vpop.f32.mrf.mxu1 }
 0x1c1   : > { %v2232_v55 = vadd.f32 %v2161_v35, %v1581_v60  ;;  %2611 = vmatmul.msk.bf16.gmra.mxu0 %vm1358_vm3, %v1345_v34 }
 0x1c3   : > { %v2269_v54 = vsel %vm408_vm0, %v2232_v55, 0.0  ;;  %v2333_v9 = vmul.f32 %v2232_v55, %v2232_v55  ;;  %v2438_v31 = vpack.c.bf16 %v2232_v55, %v2232_v55 }
 0x1c4   : > { %v2270_v15 = vadd.f32 %v2269_v54, %v2268_v16  ;;  %v4436_v28 = vpop.f32.mrf.mxu3 }
 0x1c5   : > { %v2370_v43 = vsel %vm408_vm0, %v2333_v9, 0.0  ;;  %2471 = vst.msk [vmem:[%s4314_s24 + $0x18] sm:$0xf] %vm2464_vm4, %v2438_v31  ;;  %v2163_v33 = vpop.f32.mrf.mxu2 }
 0x1c6   : > { %v2371_v29 = vadd.f32 %v2370_v43, %v2369_v32  ;;  %v1437_v48 = vpop.f32.mrf.mxu0 }
 0x1c7   : > { %v1583_v58 = vadd.f32 %v4373_v25, %v1437_v48  ;;  %v1595_v14 = vpop.f32.mrf.mxu1 }
 0x1c9   : > { %v2233_v5 = vadd.f32 %v2163_v33, %v1583_v58  ;;  %2657 = vmatmul.msk.bf16.gmra.mxu3 %vm1358_vm3, %v2077_v41 }
 0x1cb   : > { %v2271_v8 = vsel %vm408_vm0, %v2233_v5, 0.0  ;;  %v2334_v49 = vmul.f32 %v2233_v5, %v2233_v5  ;;  %v2439_v22 = vpack.c.bf16 %v2233_v5, %v2233_v5 }
 0x1cc   : > { %v2272_v26 = vadd.f32 %v2271_v8, %v2270_v15  ;;  %v4444_v12 = vpop.f32.mrf.mxu3 }
 0x1cd   : > { %v2372_v56 = vsel %vm408_vm0, %v2334_v49, 0.0  ;;  %2472 = vst.msk [vmem:[%s4314_s24 + $0x1c] sm:$0xf] %vm2464_vm4, %v2439_v22  ;;  %v2166_v11 = vpop.f32.mrf.mxu2 }
 0x1ce   : > { %v2373_v18 = vadd.f32 %v2372_v56, %v2371_v29  ;;  %v1440_v63 = vpop.f32.mrf.mxu0 }
 0x1cf   : > { %v1586_v25 = vadd.f32 %v4397_v7, %v1440_v63 }
 0x1d1   : > { %v2234_v50 = vadd.f32 %v2166_v11, %v1586_v25 }
 0x1d3   : > { %v2273_v36 = vsel %vm408_vm0, %v2234_v50, 0.0  ;;  %v2335_v19 = vmul.f32 %v2234_v50, %v2234_v50  ;;  %v2440_v45 = vpack.c.bf16 %v2234_v50, %v2234_v50 }
 0x1d4   : > { %v2274_v23 = vadd.f32 %v2273_v36, %v2272_v26  ;;  %v4451_v38 = vpop.f32.mrf.mxu3 }
 0x1d5   : > { %v2374_v42 = vsel %vm408_vm0, %v2335_v19, 0.0  ;;  %2473 = vst.msk [vmem:[%s4314_s24 + $0x20] sm:$0xf] %vm2464_vm4, %v2440_v45  ;;  %v2168_v40 = vpop.f32.mrf.mxu2 }
 0x1d6   : > { %v2375_v59 = vadd.f32 %v2374_v42, %v2373_v18  ;;  %v1442_v27 = vpop.f32.mrf.mxu0 }
 0x1d7   : > { %v1588_v1 = vadd.f32 %v4418_v52, %v1442_v27  ;;  %v1597_v52 = vpop.f32.mrf.mxu1 }
 0x1d9   : > { %v2235_v7 = vadd.f32 %v2168_v40, %v1588_v1 }
 0x1db   : > { %v2275_v20 = vsel %vm408_vm0, %v2235_v7, 0.0  ;;  %v2336_v6 = vmul.f32 %v2235_v7, %v2235_v7  ;;  %v2441_v21 = vpack.c.bf16 %v2235_v7, %v2235_v7 }
 0x1dc   : > { %v2276_v3 = vadd.f32 %v2275_v20, %v2274_v23  ;;  %v4458_v37 = vpop.f32.mrf.mxu3 }
 0x1dd   : > { %v2376_v16 = vsel %vm408_vm0, %v2336_v6, 0.0  ;;  %2474 = vst.msk [vmem:[%s4314_s24 + $0x24] sm:$0xf] %vm2464_vm4, %v2441_v21  ;;  %v2171_v57 = vpop.f32.mrf.mxu2 }
 0x1de   : > { %v2377_v62 = vadd.f32 %v2376_v16, %v2375_v59  ;;  %v1445_v10 = vpop.f32.mrf.mxu0 }
 0x1df   : > { %v1591_v35 = vadd.f32 %v1590_v17, %v1445_v10  ;;  %v1600_v15 = vpop.f32.mrf.mxu1 }
 0x1e1   : > { %v2236_v34 = vadd.f32 %v2171_v57, %v1591_v35 }
 0x1e3   : > { %v2277_v32 = vsel %vm408_vm0, %v2236_v34, 0.0  ;;  %v2337_v4 = vmul.f32 %v2236_v34, %v2236_v34  ;;  %v2442_v30 = vpack.c.bf16 %v2236_v34, %v2236_v34 }
 0x1e4   : > { %v2278_v2 = vadd.f32 %v2277_v32, %v2276_v3  ;;  %v4464_v60 = vpop.f32.mrf.mxu3 }
 0x1e5   : > { %v2378_v51 = vsel %vm408_vm0, %v2337_v4, 0.0  ;;  %2475 = vst.msk [vmem:[%s4314_s24 + $0x28] sm:$0xf] %vm2464_vm4, %v2442_v30  ;;  %v2173_v61 = vpop.f32.mrf.mxu2 }
 0x1e6   : > { %v2379_v55 = vadd.f32 %v2378_v51, %v2377_v62  ;;  %v1447_v53 = vpop.f32.mrf.mxu0 }
 0x1e7   : > { %v1593_v24 = vadd.f32 %v1592_v0, %v1447_v53  ;;  %v1602_v63 = vpop.f32.mrf.mxu1  ;;  %v1626_v53 = vadd.f32 %v4458_v37, %v4341_v46  ;;  %v1628_v46 = vadd.f32 %v4464_v60, %v4366_v13 }
 0x1e9   : > { %v2237_v54 = vadd.f32 %v2173_v61, %v1593_v24 }
 0x1eb   : > { %v2279_v9 = vsel %vm408_vm0, %v2237_v54, 0.0  ;;  %v2338_v31 = vmul.f32 %v2237_v54, %v2237_v54  ;;  %v2443_v17 = vpack.c.bf16 %v2237_v54, %v2237_v54 }
 0x1ec   : > { %v2280_v43 = vadd.f32 %v2279_v9, %v2278_v2  ;;  %v4470_v33 = vpop.f32.mrf.mxu3 }
 0x1ed   : > { %v2380_v41 = vsel %vm408_vm0, %v2338_v31, 0.0  ;;  %2476 = vst.msk [vmem:[%s4314_s24 + $0x2c] sm:$0xf] %vm2464_vm4, %v2443_v17  ;;  %v2176_v29 = vpop.f32.mrf.mxu2  ;;  %v1631_v13 = vadd.f32 %v4470_v33, %v4385_v39 }
 0x1ee   : > { %v2381_v48 = vadd.f32 %v2380_v41, %v2379_v55  ;;  %v1450_v58 = vpop.f32.mrf.mxu0 }
 0x1ef   : > { %v1596_v5 = vadd.f32 %v1595_v14, %v1450_v58  ;;  %v1605_v27 = vpop.f32.mrf.mxu1 }
 0x1f1   : > { %v2238_v8 = vadd.f32 %v2176_v29, %v1596_v5 }
 0x1f3   : > { %v2281_v49 = vsel %vm408_vm0, %v2238_v8, 0.0  ;;  %v2339_v22 = vmul.f32 %v2238_v8, %v2238_v8  ;;  %v2444_v26 = vpack.c.bf16 %v2238_v8, %v2238_v8 }
 0x1f4   : > { %v4476_v56 = vadd.f32 %v2281_v49, %v2280_v43  ;;  %v4478_v11 = vpop.f32.mrf.mxu3 }
 0x1f5   : > { %v2382_v0 = vsel %vm408_vm0, %v2339_v22, 0.0  ;;  %2477 = vst.msk [vmem:[%s4314_s24 + $0x30] sm:$0xf] %vm2464_vm4, %v2444_v26  ;;  %v2178_v18 = vpop.f32.mrf.mxu2  ;;  %v1633_v33 = vadd.f32 %v4478_v11, %v4405_v47 }
 0x1f6   : > { %v4483_v25 = vadd.f32 %v2382_v0, %v2381_v48  ;;  %v1452_v50 = vpop.f32.mrf.mxu0 }
 0x1f7   : > { %v1598_v36 = vadd.f32 %v1597_v52, %v1452_v50  ;;  %v1607_v16 = vpop.f32.mrf.mxu1 }
 0x1f9   : > { %v4485_v19 = vadd.f32 %v2178_v18, %v1598_v36 }
 0x1fb   : > { %v2445_v45 = vpack.c.bf16 %v4485_v19, %v4485_v19 }
 0x1fc   : > { %v4489_v23 = vpop.f32.mrf.mxu3 }
 0x1fd   : > { %2478 = vst.msk [vmem:[%s4314_s24 + $0x34] sm:$0xf] %vm2464_vm4, %v2445_v45  ;;  %v2181_v42 = vpop.f32.mrf.mxu2 }
 0x1fe   : > { %v1455_v40 = vpop.f32.mrf.mxu0 }
 0x1ff   : > { %v1601_v59 = vadd.f32 %v1600_v15, %v1455_v40  ;;  %v1610_v4 = vpop.f32.mrf.mxu1 }
 0x201   : > { %v4493_v1 = vadd.f32 %v2181_v42, %v1601_v59  ;;  %v2340_v59 = vmul.f32 %v4485_v19, %v4485_v19 }
 0x203   : > { %v2446_v14 = vpack.c.bf16 %v4493_v1, %v4493_v1  ;;  %v2285_v47 = vsel %vm408_vm0, %v4493_v1, 0.0 }
 0x204   : > { %v4497_v7 = vpop.f32.mrf.mxu3 }
 0x205   : > { %2479 = vst.msk [vmem:[%s4314_s24 + $0x38] sm:$0xf] %vm2464_vm4, %v2446_v14  ;;  %v2183_v20 = vpop.f32.mrf.mxu2 }
 0x206   : > { %v1457_v6 = vpop.f32.mrf.mxu0 }
 0x207   : > { %v1603_v21 = vadd.f32 %v1602_v63, %v1457_v6  ;;  %v1612_v17 = vpop.f32.mrf.mxu1  ;;  %v2341_v6 = vmul.f32 %v4493_v1, %v4493_v1 }
 0x209   : > { %v4501_v3 = vadd.f32 %v2183_v20, %v1603_v21  ;;  %v2283_v20 = vsel %vm408_vm0, %v4485_v19, 0.0 }
 0x20b   : > { %v2447_v57 = vpack.c.bf16 %v4501_v3, %v4501_v3  ;;  %v2342_v11 = vmul.f32 %v4501_v3, %v4501_v3 }
 0x20c   : > { %v4505_v62 = vpop.f32.mrf.mxu3 }
 0x20d   : > { %2480 = vst.msk [vmem:[%s4314_s24 + $0x3c] sm:$0xf] %vm2464_vm4, %v2447_v57  ;;  %v2186_v10 = vpop.f32.mrf.mxu2  ;;  %v2384_v57 = vsel %vm408_vm0, %v2340_v59, 0.0 }
 0x20e   : > { %v1460_v35 = vpop.f32.mrf.mxu0 }
 0x20f   : > { %v1606_v34 = vadd.f32 %v1605_v27, %v1460_v35  ;;  %v1615_v26 = vpop.f32.mrf.mxu1 }
 0x211   : > { %v4509_v52 = vadd.f32 %v2186_v10, %v1606_v34  ;;  %v2284_v34 = vadd.f32 %v2283_v20, %v4476_v56  ;;  %v1636_v56 = vadd.f32 %v4489_v23, %v4424_v44 }
 0x213   : > { %v2448_v32 = vpack.c.bf16 %v4509_v52, %v4509_v52 }
 0x214   : > { %v4513_v30 = vpop.f32.mrf.mxu3 }
 0x215   : > { %2481 = vst.msk [vmem:[%s4314_s24 + $0x40] sm:$0xf] %vm2464_vm4, %v2448_v32  ;;  %v2188_v2 = vpop.f32.mrf.mxu2  ;;  %v2386_v32 = vsel %vm408_vm0, %v2341_v6, 0.0 }
 0x216   : > { %v1462_v51 = vpop.f32.mrf.mxu0 }
 0x217   : > { %v1608_v61 = vadd.f32 %v1607_v16, %v1462_v51  ;;  %v1617_v39 = vpop.f32.mrf.mxu1  ;;  %v2385_v51 = vadd.f32 %v2384_v57, %v4483_v25 }
 0x219   : > { %v4517_v55 = vadd.f32 %v2188_v2, %v1608_v61  ;;  %v2343_v2 = vmul.f32 %v4509_v52, %v4509_v52  ;;  %v2286_v61 = vadd.f32 %v2285_v47, %v2284_v34 }
 0x21b   : > { %v2449_v24 = vpack.c.bf16 %v4517_v55, %v4517_v55  ;;  %v2291_v25 = vsel %vm408_vm0, %v4517_v55, 0.0 }
 0x21c   : > { %v2206_v54 = vpop.f32.mrf.mxu3 }
 0x21d   : > { %2482 = vst.msk [vmem:[%s4314_s24 + $0x44] sm:$0xf] %vm2464_vm4, %v2449_v24  ;;  %v4525_v9 = vadd.f32 %v2206_v54, %v1626_v53  ;;  %v2191_v31 = vpop.f32.mrf.mxu2  ;;  %v2344_v53 = vmul.f32 %v4517_v55, %v4517_v55  ;;  %v2388_v24 = vsel %vm408_vm0, %v2342_v11, 0.0 }
 0x21e   : > { %v1465_v15 = vpop.f32.mrf.mxu0 }
 0x21f   : > { %v2456_v43 = vpack.c.bf16 %v4525_v9, %v4525_v9  ;;  %v1611_v41 = vadd.f32 %v1610_v4, %v1465_v15  ;;  %v2287_v4 = vsel %vm408_vm0, %v4501_v3, 0.0  ;;  %v2289_v3 = vsel %vm408_vm0, %v4509_v52, 0.0  ;;  %v1620_v15 = vpop.f32.mrf.mxu1 }
 0x221   : > { %2489 = vst.msk [vmem:[%s4314_s24 + $0x60] sm:$0xf] %vm2464_vm4, %v2456_v43  ;;  %v4531_v29 = vadd.f32 %v2191_v31, %v1611_v41  ;;  %v2387_v31 = vadd.f32 %v2386_v32, %v2385_v51  ;;  %v2390_v41 = vsel %vm408_vm0, %v2343_v2, 0.0 }
 0x223   : > { %v2450_v37 = vpack.c.bf16 %v4531_v29, %v4531_v29  ;;  %v2389_v23 = vadd.f32 %v2388_v24, %v2387_v31  ;;  %v2351_v24 = vmul.f32 %v4525_v9, %v4525_v9 }
 0x224   : > { %v2208_v48 = vpop.f32.mrf.mxu3 }
 0x225   : > { %2483 = vst.msk [vmem:[%s4314_s24 + $0x48] sm:$0xf] %vm2464_vm4, %v2450_v37  ;;  %v4539_v58 = vadd.f32 %v2208_v48, %v1628_v46  ;;  %v2193_v5 = vpop.f32.mrf.mxu2  ;;  %v2345_v46 = vmul.f32 %v4531_v29, %v4531_v29  ;;  %v2392_v37 = vsel %vm408_vm0, %v2344_v53, 0.0 }
 0x226   : > { %v1467_v8 = vpop.f32.mrf.mxu0 }
 0x227   : > { %v2457_v49 = vpack.c.bf16 %v4539_v58, %v4539_v58  ;;  %v1613_v22 = vadd.f32 %v1612_v17, %v1467_v8  ;;  %v2288_v17 = vadd.f32 %v2287_v4, %v2286_v61  ;;  %v2293_v8 = vsel %vm408_vm0, %v4531_v29, 0.0 }
 0x228   : > { %v1641_v61 = vadd.f32 %v4505_v62, %v4444_v12 }
 0x229   : > { %2490 = vst.msk [vmem:[%s4314_s24 + $0x64] sm:$0xf] %vm2464_vm4, %v2457_v49  ;;  %v2245_v0 = vadd.f32 %v2193_v5, %v1613_v22  ;;  %v2290_v52 = vadd.f32 %v2289_v3, %v2288_v17 }
 0x22b   : > { %v2451_v60 = vpack.c.bf16 %v2245_v0, %v2245_v0  ;;  %v2346_v49 = vmul.f32 %v2245_v0, %v2245_v0 }
 0x22c   : > { %v2211_v18 = vpop.f32.mrf.mxu3 }
 0x22d   : > { %2484 = vst.msk [vmem:[%s4314_s24 + $0x4c] sm:$0xf] %vm2464_vm4, %v2451_v60  ;;  %v4549_v63 = vadd.f32 %v2211_v18, %v1631_v13  ;;  %v2196_v50 = vpop.f32.mrf.mxu2  ;;  %v2292_v13 = vadd.f32 %v2291_v25, %v2290_v52  ;;  %v2394_v60 = vsel %vm408_vm0, %v2345_v46, 0.0  ;;  %v2295_v18 = vsel %vm408_vm0, %v2245_v0, 0.0 }
 0x22e   : > { %v1470_v36 = vpop.f32.mrf.mxu0  ;;  %v2396_v59 = vsel %vm408_vm0, %v2346_v49, 0.0  ;;  %v2352_v25 = vmul.f32 %v4539_v58, %v4539_v58  ;;  %v2406_v52 = vsel %vm408_vm0, %v2351_v24, 0.0 }
 0x22f   : > { %v2458_v45 = vpack.c.bf16 %v4549_v63, %v4549_v63  ;;  %v1616_v42 = vadd.f32 %v1615_v26, %v1470_v36  ;;  %v2391_v26 = vadd.f32 %v2390_v41, %v2389_v23  ;;  %v2305_v41 = vsel %vm408_vm0, %v4525_v9, 0.0 }
 0x230   : > { %v2408_v49 = vsel %vm408_vm0, %v2352_v25, 0.0 }
 0x231   : > { %2491 = vst.msk [vmem:[%s4314_s24 + $0x68] sm:$0xf] %vm2464_vm4, %v2458_v45  ;;  %v2246_v40 = vadd.f32 %v2196_v50, %v1616_v42  ;;  %v1638_v45 = vadd.f32 %v4497_v7, %v4436_v28  ;;  %v2393_v29 = vadd.f32 %v2392_v37, %v2391_v26  ;;  %v2294_v42 = vadd.f32 %v2293_v8, %v2292_v13  ;;  %v1622_v7 = vpop.f32.mrf.mxu1 }
 0x232   : > { %v2307_v37 = vsel %vm408_vm0, %v4539_v58, 0.0  ;;  %v1643_v58 = vadd.f32 %v4513_v30, %v4451_v38 }
 0x233   : > { %v2452_v27 = vpack.c.bf16 %v2246_v40, %v2246_v40  ;;  %v2347_v50 = vmul.f32 %v2246_v40, %v2246_v40  ;;  %v2296_v20 = vadd.f32 %v2295_v18, %v2294_v42 }
 0x234   : > { %v2213_v14 = vpop.f32.mrf.mxu3 }
 0x235   : > { %2485 = vst.msk [vmem:[%s4314_s24 + $0x50] sm:$0xf] %vm2464_vm4, %v2452_v27  ;;  %v4565_v21 = vadd.f32 %v2213_v14, %v1633_v33  ;;  %v2198_v16 = vpop.f32.mrf.mxu2  ;;  %v2395_v14 = vadd.f32 %v2394_v60, %v2393_v29  ;;  %v2398_v0 = vsel %vm408_vm0, %v2347_v50, 0.0 }
 0x236   : > { %v1472_v10 = vpop.f32.mrf.mxu0 }
 0x237   : > { %v2459_v19 = vpack.c.bf16 %v4565_v21, %v4565_v21  ;;  %v1618_v35 = vadd.f32 %v1617_v39, %v1472_v10  ;;  %v2297_v39 = vsel %vm408_vm0, %v2246_v40, 0.0  ;;  %v2397_v10 = vadd.f32 %v2396_v59, %v2395_v14 }
 0x238   : > { %v2298_v47 = vadd.f32 %v2297_v39, %v2296_v20  ;;  %v2311_v18 = vsel %vm408_vm0, %v4565_v21, 0.0 }
 0x239   : > { %2492 = vst.msk [vmem:[%s4314_s24 + $0x6c] sm:$0xf] %vm2464_vm4, %v2459_v19  ;;  %v2247_v1 = vadd.f32 %v2198_v16, %v1618_v35  ;;  %v2399_v32 = vadd.f32 %v2398_v0, %v2397_v10 }
 0x23b   : > { %v2453_v54 = vpack.c.bf16 %v2247_v1, %v2247_v1  ;;  %v2348_v33 = vmul.f32 %v2247_v1, %v2247_v1  ;;  %v2299_v16 = vsel %vm408_vm0, %v2247_v1, 0.0 }
 0x23c   : > { %v2216_v43 = vpop.f32.mrf.mxu3  ;;  %v2300_v4 = vadd.f32 %v2299_v16, %v2298_v47 }
 0x23d   : > { %2486 = vst.msk [vmem:[%s4314_s24 + $0x54] sm:$0xf] %vm2464_vm4, %v2453_v54  ;;  %v4597_v44 = vadd.f32 %v2216_v43, %v1636_v56  ;;  %v2201_v48 = vpop.f32.mrf.mxu2  ;;  %v2400_v40 = vsel %vm408_vm0, %v2348_v33, 0.0 }
 0x23e   : > { %v1475_v5 = vpop.f32.mrf.mxu0  ;;  %v2401_v53 = vadd.f32 %v2400_v40, %v2399_v32 }
 0x23f   : > { %v2460_v55 = vpack.c.bf16 %v4597_v44, %v4597_v44  ;;  %v1621_v22 = vadd.f32 %v1620_v15, %v1475_v5  ;;  %v2355_v50 = vmul.f32 %v4597_v44, %v4597_v44  ;;  %v2313_v42 = vsel %vm408_vm0, %v4597_v44, 0.0 }
 0x241   : > { %2493 = vst.msk [vmem:[%s4314_s24 + $0x70] sm:$0xf] %vm2464_vm4, %v2460_v55  ;;  %v2248_v36 = vadd.f32 %v2201_v48, %v1621_v22  ;;  %v2353_v48 = vmul.f32 %v4549_v63, %v4549_v63  ;;  %v2309_v55 = vsel %vm408_vm0, %v4549_v63, 0.0  ;;  %v2354_v22 = vmul.f32 %v4565_v21, %v4565_v21 }
 0x242   : > { %v2414_v33 = vsel %vm408_vm0, %v2355_v50, 0.0 }
 0x243   : > { %v2454_v27 = vpack.c.bf16 %v2248_v36, %v2248_v36  ;;  %v2349_v57 = vmul.f32 %v2248_v36, %v2248_v36  ;;  %v2301_v19 = vsel %vm408_vm0, %v2248_v36, 0.0  ;;  %v2410_v60 = vsel %vm408_vm0, %v2353_v48, 0.0 }
 0x244   : > { %v2218_v6 = vpop.f32.mrf.mxu3  ;;  %v2302_v56 = vadd.f32 %v2301_v19, %v2300_v4  ;;  %v2412_v29 = vsel %vm408_vm0, %v2354_v22, 0.0 }
 0x245   : > { %2487 = vst.msk [vmem:[%s4314_s24 + $0x58] sm:$0xf] %vm2464_vm4, %v2454_v27  ;;  %v2255_v28 = vadd.f32 %v2218_v6, %v1638_v45  ;;  %v2203_v2 = vpop.f32.mrf.mxu2  ;;  %v2402_v1 = vsel %vm408_vm0, %v2349_v57, 0.0 }
 0x246   : > { %v1477_v11 = vpop.f32.mrf.mxu0  ;;  %v2403_v17 = vadd.f32 %v2402_v1, %v2401_v53 }
 0x247   : > { %v2461_v35 = vpack.c.bf16 %v2255_v28, %v2255_v28  ;;  %v1623_v34 = vadd.f32 %v1622_v7, %v1477_v11  ;;  %v2356_v59 = vmul.f32 %v2255_v28, %v2255_v28  ;;  %v2315_v21 = vsel %vm408_vm0, %v2255_v28, 0.0 }
 0x249   : > { %2494 = vst.msk [vmem:[%s4314_s24 + $0x74] sm:$0xf] %vm2464_vm4, %v2461_v35  ;;  %v2249_v51 = vadd.f32 %v2203_v2, %v1623_v34  ;;  %v2416_v0 = vsel %vm408_vm0, %v2356_v59, 0.0 }
 0x24b   : > { %v2303_v3 = vsel %vm408_vm0, %v2249_v51, 0.0  ;;  %v2350_v54 = vmul.f32 %v2249_v51, %v2249_v51  ;;  %v2455_v31 = vpack.c.bf16 %v2249_v51, %v2249_v51 }
 0x24c   : > { %v2304_v15 = vadd.f32 %v2303_v3, %v2302_v56  ;;  %v2221_v43 = vpop.f32.mrf.mxu3 }
 0x24d   : > { %v2404_v12 = vsel %vm408_vm0, %v2350_v54, 0.0  ;;  %2488 = vst.msk [vmem:[%s4314_s24 + $0x5c] sm:$0xf] %vm2464_vm4, %v2455_v31  ;;  %v2256_v62 = vadd.f32 %v2221_v43, %v1641_v61 }
 0x24e   : > { %v2306_v46 = vadd.f32 %v2305_v41, %v2304_v15  ;;  %v2405_v23 = vadd.f32 %v2404_v12, %v2403_v17 }
 0x24f   : > { %v2462_v9 = vpack.c.bf16 %v2256_v62, %v2256_v62  ;;  %v2357_v27 = vmul.f32 %v2256_v62, %v2256_v62  ;;  %v2317_v16 = vsel %vm408_vm0, %v2256_v62, 0.0 }
 0x250   : > { %v2308_v5 = vadd.f32 %v2307_v37, %v2306_v46  ;;  %v2407_v8 = vadd.f32 %v2406_v52, %v2405_v23 }
 0x251   : > { %2495 = vst.msk [vmem:[%s4314_s24 + $0x78] sm:$0xf] %vm2464_vm4, %v2462_v9  ;;  %v2418_v10 = vsel %vm408_vm0, %v2357_v27, 0.0 }
 0x252   : > { %v2409_v26 = vadd.f32 %v2408_v49, %v2407_v8  ;;  %v2310_v13 = vadd.f32 %v2309_v55, %v2308_v5 }
 0x254   : > { %v2312_v36 = vadd.f32 %v2311_v18, %v2310_v13  ;;  %v2411_v63 = vadd.f32 %v2410_v60, %v2409_v26  ;;  %v2223_v45 = vpop.f32.mrf.mxu3 }
 0x255   : > { %v2257_v39 = vadd.f32 %v2223_v45, %v1643_v58 }
 0x256   : > { %v2314_v38 = vadd.f32 %v2313_v42, %v2312_v36  ;;  %v2413_v30 = vadd.f32 %v2412_v29, %v2411_v63 }
 0x257   : > { %v2463_v14 = vpack.c.bf16 %v2257_v39, %v2257_v39  ;;  %v2358_v57 = vmul.f32 %v2257_v39, %v2257_v39  ;;  %v2319_v47 = vsel %vm408_vm0, %v2257_v39, 0.0 }
 0x258   : > { %v2316_v20 = vadd.f32 %v2315_v21, %v2314_v38  ;;  %v2415_v6 = vadd.f32 %v2414_v33, %v2413_v30 }
 0x259   : > { %2496 = vst.msk [vmem:[%s4314_s24 + $0x7c] sm:$0xf] %vm2464_vm4, %v2463_v14  ;;  %v2420_v40 = vsel %vm408_vm0, %v2358_v57, 0.0 }
 0x25a   : > { %v2318_v44 = vadd.f32 %v2317_v16, %v2316_v20  ;;  %v2417_v7 = vadd.f32 %v2416_v0, %v2415_v6 }
 0x25c   : > { %v2419_v28 = vadd.f32 %v2418_v10, %v2417_v7  ;;  %v2320_v11 = vadd.f32 %v2319_v47, %v2318_v44 }
 0x25e   : > { %v2321_v19 = vrot.slane %v2320_v11, 4  ;;  %v2421_v35 = vadd.f32 %v2420_v40, %v2419_v28 }
 0x260   : > { %v2322_v34 = vadd.f32 %v2321_v19, %v2320_v11  ;;  %v2422_v32 = vrot.slane %v2421_v35, 4 }
 0x262   : > { %v2323_v4 = vrot.slane %v2322_v34, 2  ;;  %v2423_v2 = vadd.f32 %v2422_v32, %v2421_v35 }
 0x264   : > { %v2324_v1 = vadd.f32 %v2323_v4, %v2322_v34  ;;  %v2424_v51 = vrot.slane %v2423_v2, 2 }
 0x266   : > { %v2325_v61 = vrot.slane %v2324_v1, 1  ;;  %v2425_v53 = vadd.f32 %v2424_v51, %v2423_v2 }
 0x268   : > { %v2426_v56 = vrot.slane %v2425_v53, 1  ;;  %v2326_v24 = vadd.f32 %v2325_v61, %v2324_v1 }
 0x26a   : > { %v2427_v3 = vadd.f32 %v2426_v56, %v2425_v53 }
 0x26c   : > { %v2429_v54 = vsel %vm2428_vm5, %v2326_v24, %v2427_v3 }
 0x26d   : > { %2431 = vst.msk [vmem:[%s238_s26] sm:$0x3] %vm2430_vm6, %v2429_v54 }
 0x26e PF: > { %s16_s18 = sadd.s32 1, %s3244_s18  }
 0x26f   : > { %p13_p5 = scmp.ge.s32.totalorder %s16_s18, 4  }
 0x271   :  { %15 = sbr.rel (!%p13_p5) target bundleno = 1 (0x1), region = 83 }

</bundles_post_ra>
